<compile_context>
chip_gen: v5e
topology: v5e:2x2
jax: 0.10.0
libtpu: 0.0.40
codegen_flags: <defaults>
</compile_context>

<pallas_src>
import math
import functools

import jax
import jax.numpy as jnp
from jax.experimental import pallas as pl
from jax.experimental.pallas import tpu as pltpu

_SQRT_2 = math.sqrt(2.0)
_LANE = 128


# ----------------------------------------------------------------------------
# In-kernel exact-ish GELU (erf via Abramowitz & Stegun 7.1.26).  The 1/(1+pt)
# term uses the EUP approximate reciprocal to keep the VALU slot free.
# ----------------------------------------------------------------------------
def _erf(x):
    p = 0.3275911
    a1, a2, a3, a4, a5 = (0.254829592, -0.284496736, 1.421413741,
                          -1.453152027, 1.061405429)
    sign = jnp.where(x >= 0.0, 1.0, -1.0)
    ax = jnp.abs(x)
    t = pl.reciprocal(1.0 + p * ax, approx=True)      # EUP, not VALU
    poly = ((((a5 * t + a4) * t + a3) * t + a2) * t + a1) * t
    return sign * (1.0 - poly * jnp.exp(-ax * ax))


def _gelu(x):
    return 0.5 * x * (1.0 + _erf(x / _SQRT_2))


# ----------------------------------------------------------------------------
# Tiling helpers.
# ----------------------------------------------------------------------------
def _round_up(n, m):
    return -(-n // m) * m


def _pick_tile(n, cap):
    """Lane tile: power-of-two multiple of 128, <= cap.  Prefer >= 4 grid steps
    (>= 2 per TensorCore on v7x) once the problem is large enough; for tiny
    problems take the whole 128-padded extent in one step."""
    n128 = _round_up(n, _LANE)
    if n128 <= 4 * _LANE:
        return min(cap, n128)
    t = _LANE
    while t * 2 <= cap and 4 * (t * 2) <= n128:
        t *= 2
    return t


def _pad_to(a, n_pad):
    n = a.shape[-1]
    return a if n == n_pad else jnp.pad(a, ((0, 0), (0, n_pad - n)))


# ----------------------------------------------------------------------------
# Pallas kernel 1: lane-dense channel mix  y = W @ x + b   (fc0_time).
# ----------------------------------------------------------------------------
def _cmix_kernel(x_ref, w_ref, b_ref, o_ref):
    y = jnp.dot(w_ref[...], x_ref[...].astype(jnp.float32),
                preferred_element_type=jnp.float32) + b_ref[...]
    o_ref[...] = y.astype(o_ref.dtype)


def channel_mix(x, w, b, tile, out_dtype=jnp.bfloat16):
    cin, n_pad = x.shape
    cout = w.shape[0]
    return pl.pallas_call(
        _cmix_kernel,
        out_shape=jax.ShapeDtypeStruct((cout, n_pad), out_dtype),
        grid_spec=pltpu.PrefetchScalarGridSpec(
            num_scalar_prefetch=0,
            grid=(n_pad // tile,),
            in_specs=[
                pl.BlockSpec((cin, tile), lambda i: (0, i)),
                pl.BlockSpec((cout, cin), lambda i: (0, 0)),
                pl.BlockSpec((cout, 1), lambda i: (0, 0)),
            ],
            out_specs=pl.BlockSpec((cout, tile), lambda i: (0, i)),
        ),
        compiler_params=pltpu.CompilerParams(dimension_semantics=("parallel",)),
    )(x, w, b)


# ----------------------------------------------------------------------------
# Pallas kernel 2: fused FNO2d pointwise block.
#   h   = GELU(M1 @ x1 + b1)
#   y   = [M2 | Ww] @ [h ; x] + (b2 + bw + bb)      (merged matmul, K = 2W)
#   y  += Bw[:,0]*gx + Bw[:,1]*gy                   (grid conv, 2 VPU FMAs)
#   out = GELU(y)
# ----------------------------------------------------------------------------
def _fno_block_kernel(x1_ref, x_ref, g_ref, m1w_ref, m1b_ref, whx_ref,
                      bcat_ref, bw_ref, o_ref, hx_ref):
    w = m1w_ref.shape[0]
    x1 = x1_ref[...].astype(jnp.float32)
    xx = x_ref[...].astype(jnp.float32)
    h = _gelu(jnp.dot(m1w_ref[...], x1,
                      preferred_element_type=jnp.float32) + m1b_ref[...])
    hx_ref[0:w, :] = h
    hx_ref[w:2 * w, :] = xx
    y = jnp.dot(whx_ref[...], hx_ref[...],
                preferred_element_type=jnp.float32) + bcat_ref[...]
    g = g_ref[...]                         # (2, tile) f32
    bw = bw_ref[...]                       # (W, 2)
    y = y + bw[:, 0:1] * g[0:1, :] + bw[:, 1:2] * g[1:2, :]
    o_ref[...] = _gelu(y).astype(o_ref.dtype)


def fno_pointwise(x1, x, g2, bp, tile):
    wc, n_pad = x1.shape
    full = lambda i: (0, 0)
    col = lambda i: (0, i)
    return pl.pallas_call(
        _fno_block_kernel,
        out_shape=jax.ShapeDtypeStruct((wc, n_pad), jnp.bfloat16),
        grid_spec=pltpu.PrefetchScalarGridSpec(
            num_scalar_prefetch=0,
            grid=(n_pad // tile,),
            in_specs=[
                pl.BlockSpec((wc, tile), col),       # x1 (spectral conv output)
                pl.BlockSpec((wc, tile), col),       # x  (block input)
                pl.BlockSpec((2, tile), col),        # grid (gx; gy)
                pl.BlockSpec((wc, wc), full),        # mlp1_w
                pl.BlockSpec((wc, 1), full),         # mlp1_b
                pl.BlockSpec((wc, 2 * wc), full),    # [mlp2_w | w_w]
                pl.BlockSpec((wc, 1), full),         # mlp2_b + w_b + b_b
                pl.BlockSpec((wc, 2), full),         # b_w
            ],
            out_specs=pl.BlockSpec((wc, tile), col),
            scratch_shapes=[pltpu.VMEM((2 * wc, tile), jnp.float32)],
        ),
        compiler_params=pltpu.CompilerParams(dimension_semantics=("parallel",)),
    )(x1, x, g2, bp['mlp1_w'], bp['mlp1_b'], bp['w_hx'], bp['b_cat'], bp['b_w'])


# ----------------------------------------------------------------------------
# Pallas kernel 3: fused Bayesian head  out = W2 @ GELU(W1 @ x + b1) + b2.
# ----------------------------------------------------------------------------
def _head_kernel(x_ref, w1_ref, b1_ref, w2_ref, b2_ref, o_ref):
    xx = x_ref[...].astype(jnp.float32)
    h = _gelu(jnp.dot(w1_ref[...], xx,
                      preferred_element_type=jnp.float32) + b1_ref[...])
    o_ref[...] = (jnp.dot(w2_ref[...], h,
                          preferred_element_type=jnp.float32)
                  + b2_ref[...]).astype(o_ref.dtype)


def bayes_head(x, w1, b1, w2, b2, tile):
    cin, n_pad = x.shape
    mid = w1.shape[0]
    cout = w2.shape[0]
    return pl.pallas_call(
        _head_kernel,
        out_shape=jax.ShapeDtypeStruct((cout, n_pad), jnp.float32),
        grid_spec=pltpu.PrefetchScalarGridSpec(
            num_scalar_prefetch=0,
            grid=(n_pad // tile,),
            in_specs=[
                pl.BlockSpec((cin, tile), lambda i: (0, i)),
                pl.BlockSpec((mid, cin), lambda i: (0, 0)),
                pl.BlockSpec((mid, 1), lambda i: (0, 0)),
                pl.BlockSpec((cout, mid), lambda i: (0, 0)),
                pl.BlockSpec((cout, 1), lambda i: (0, 0)),
            ],
            out_specs=pl.BlockSpec((cout, tile), lambda i: (0, i)),
        ),
        compiler_params=pltpu.CompilerParams(dimension_semantics=("parallel",)),
    )(x, w1, b1, w2, b2)


# ----------------------------------------------------------------------------
# Pallas kernel 4: batched block-complex spectral mode mixing.
#   x_blk: (P, B, 2Cin) = [xr | xi],  w_blk: (P, 2Cin, 2Cout) = [[wr,wi],[-wi,wr]]
# ----------------------------------------------------------------------------
def _spectral_kernel(x_ref, w_ref, o_ref):
    o_ref[...] = jnp.einsum('pbc,pcd->pbd', x_ref[...], w_ref[...],
                            preferred_element_type=jnp.float32
                            ).astype(o_ref.dtype)


def spectral_mode_matmul(x_blk, w_blk):
    p, b, c2 = x_blk.shape
    d2 = w_blk.shape[2]
    g = next(gg for gg in (4, 2, 1) if p % gg == 0)   # >= 2 steps per TC on v7x
    pt = p // g
    return pl.pallas_call(
        _spectral_kernel,
        out_shape=jax.ShapeDtypeStruct((p, b, d2), jnp.float32),
        grid_spec=pltpu.PrefetchScalarGridSpec(
            num_scalar_prefetch=0,
            grid=(g,),
            in_specs=[
                pl.BlockSpec((pt, b, c2), lambda i: (i, 0, 0)),
                pl.BlockSpec((pt, c2, d2), lambda i: (i, 0, 0)),
            ],
            out_specs=pl.BlockSpec((pt, b, d2), lambda i: (i, 0, 0)),
        ),
        compiler_params=pltpu.CompilerParams(dimension_semantics=("parallel",)),
    )(x_blk, w_blk)


# ----------------------------------------------------------------------------
# Truncated DFT bases (replace rfft2 / zero-scatter / irfft2).
# Forward matches torch.fft.rfft2 (negative exponent, unnormalized).
# Inverse matches torch.fft.irfft2 with only the kept modes nonzero
# (complex ifft over kx scaled 1/X; real reconstruction over ky with factor 2
# for 0 < ky < Y/2 and the imaginary part of the ky=0 / ky=Y/2 bins ignored).
# ----------------------------------------------------------------------------
def _dft_bases(X, Y, m1, m2):
    xs = jnp.arange(X, dtype=jnp.float32)
    ys = jnp.arange(Y, dtype=jnp.float32)
    kx = jnp.concatenate([jnp.arange(m1, dtype=jnp.float32),
                          jnp.arange(X - m1, X, dtype=jnp.float32)])   # (2m1,)
    ky = jnp.arange(m2, dtype=jnp.float32)                             # (m2,)

    ax_ = -2.0 * jnp.pi * kx[:, None] * xs[None, :] / X    # (2m1, X)
    ay_ = -2.0 * jnp.pi * ky[:, None] * ys[None, :] / Y    # (m2, Y)
    exr, exi = jnp.cos(ax_), jnp.sin(ax_)
    eyr, eyi = jnp.cos(ay_), jnp.sin(ay_)

    adx = 2.0 * jnp.pi * xs[:, None] * kx[None, :] / X     # (X, 2m1)
    dxr, dxi = jnp.cos(adx) / X, jnp.sin(adx) / X

    acy = 2.0 * jnp.pi * ys[:, None] * ky[None, :] / Y     # (Y, m2)
    special = (ky == 0.0) | (2.0 * ky == float(Y))
    two = jnp.where(special, 1.0, 2.0)[None, :]
    cr = jnp.cos(acy) * two / Y
    ci = -jnp.sin(acy) * two / Y * jnp.where(special, 0.0, 1.0)[None, :]
    return (exr, exi, eyr, eyi, dxr, dxi, cr, ci)


def spectral_conv2d(h_cf, spec_w, bases, dims, n_valid, n_pad):
    """h_cf: (C, n_pad) bf16; returns (C, n_pad) bf16."""
    B, V, X, Y, C = dims
    exr, exi, eyr, eyi, dxr, dxi, cr, ci = bases
    m2 = eyr.shape[0]
    F = exr.shape[0]                                        # 2*m1

    h5 = h_cf[:, :n_valid].astype(jnp.float32).reshape(C, B, V, X, Y)

    # Forward truncated DFT (only the kept modes are ever formed).
    tr = jnp.einsum('cbvxy,gy->cbvxg', h5, eyr)
    ti = jnp.einsum('cbvxy,gy->cbvxg', h5, eyi)
    xfr = (jnp.einsum('cbvxg,fx->cbvfg', tr, exr)
           - jnp.einsum('cbvxg,fx->cbvfg', ti, exi))
    xfi = (jnp.einsum('cbvxg,fx->cbvfg', tr, exi)
           + jnp.einsum('cbvxg,fx->cbvfg', ti, exr))

    def pack(a):                                            # -> (P, B, C)
        return jnp.transpose(a, (2, 3, 4, 1, 0)).reshape(V * F * m2, B, C)

    x_blk = jnp.concatenate([pack(xfr), pack(xfi)], axis=-1)   # (P, B, 2C)
    o_blk = spectral_mode_matmul(x_blk, spec_w)                # (P, B, 2C)

    def unpack(a):                                          # -> (C, B, V, F, m2)
        return jnp.transpose(a.reshape(V, F, m2, B, C), (4, 3, 0, 1, 2))

    or5 = unpack(o_blk[..., :C])
    oi5 = unpack(o_blk[..., C:])

    # Truncated inverse DFT (no full-spectrum out_ft, no scatter).
    zr = (jnp.einsum('cbvfg,xf->cbvxg', or5, dxr)
          - jnp.einsum('cbvfg,xf->cbvxg', oi5, dxi))
    zi = (jnp.einsum('cbvfg,xf->cbvxg', or5, dxi)
          + jnp.einsum('cbvfg,xf->cbvxg', oi5, dxr))
    y = (jnp.einsum('cbvxg,yg->cbvxy', zr, cr)
         + jnp.einsum('cbvxg,yg->cbvxy', zi, ci))

    y = y.reshape(C, n_valid)
    y = _pad_to(y, n_pad)
    return y.astype(jnp.bfloat16)


# ----------------------------------------------------------------------------
# Parameter init (deterministic, shapes follow the PyTorch __init__).
# ----------------------------------------------------------------------------
def _pack_spectral_weights(w1, w2):
    # w1/w2: (cin, cout, V, m1, m2) complex.  Mode order (v, f, g) with the
    # first m1 'f' rows from weights1 (kx = 0..m1-1) and the last m1 from
    # weights2 (kx = X-m1..X-1), matching spectral_conv2d's packing.
    w = jnp.concatenate([w1, w2], axis=3)                   # (cin,cout,V,2m1,m2)
    cin, cout = w.shape[0], w.shape[1]
    wp = jnp.transpose(w, (2, 3, 4, 0, 1)).reshape(-1, cin, cout)
    wr = wp.real.astype(jnp.float32)
    wi = wp.imag.astype(jnp.float32)
    top = jnp.concatenate([wr, wi], axis=-1)                # multiplies x_real
    bot = jnp.concatenate([-wi, wr], axis=-1)               # multiplies x_imag
    return jnp.concatenate([top, bot], axis=-2)             # (P, 2cin, 2cout)


def init_params(key, T_in, step, m1, m2, V, W):
    keys = iter(jax.random.split(key, 128))
    uni = lambda shape, b: jax.random.uniform(next(keys), shape, jnp.float32, -b, b)
    p = {}
    b0 = 1.0 / math.sqrt(T_in + 2)
    p['fc0_w'] = uni((W, T_in + 2), b0)                     # stored (out, in)
    p['fc0_b'] = uni((W, 1), b0)

    p['blocks'] = []
    scale = 1.0 / W
    for _ in range(6):
        bp = {}
        wshape = (W, W, V, m1, m2)

        def cplx():
            re = scale * jax.random.uniform(next(keys), wshape, jnp.float32)
            im = scale * jax.random.uniform(next(keys), wshape, jnp.float32)
            return (re + 1j * im).astype(jnp.complex64)

        bp['spec_w'] = _pack_spectral_weights(cplx(), cplx())   # (P, 2W, 2W)
        bw = 1.0 / math.sqrt(W)
        bp['mlp1_w'] = uni((W, W), bw)
        bp['mlp1_b'] = uni((W, 1), bw)
        mlp2_w = uni((W, W), bw); mlp2_b = uni((W, 1), bw)
        w_w = uni((W, W), bw);    w_b = uni((W, 1), bw)
        bg = 1.0 / math.sqrt(2)
        b_w = uni((W, 2), bg);    b_b = uni((W, 1), bg)
        bp['w_hx'] = jnp.concatenate([mlp2_w, w_w], axis=1)     # (W, 2W)
        bp['b_cat'] = mlp2_b + w_b + b_b                        # folded biases
        bp['b_w'] = b_w
        p['blocks'].append(bp)

    prior_log_sigma = math.log(0.1)                          # prior_sigma = 0.1
    s1 = 1.0 / math.sqrt(W)
    p['fc1_w_mu'] = uni((256, W), s1)
    p['fc1_w_ls'] = jnp.full((256, W), prior_log_sigma, jnp.float32)
    p['fc1_b_mu'] = uni((256, 1), s1)
    p['fc1_b_ls'] = jnp.full((256, 1), prior_log_sigma, jnp.float32)
    s2 = 1.0 / math.sqrt(256)
    p['fc2_w_mu'] = uni((step, 256), s2)
    p['fc2_w_ls'] = jnp.full((step, 256), prior_log_sigma, jnp.float32)
    p['fc2_b_mu'] = uni((step, 1), s2)
    p['fc2_b_ls'] = jnp.full((step, 1), prior_log_sigma, jnp.float32)
    return p


# ----------------------------------------------------------------------------
# Full forward (matches FNO_multi2d_Bayesian.forward).
# ----------------------------------------------------------------------------
def fno_multi2d_bayesian_forward(params, x, eps_key, *, modes1, modes2, width):
    # x: (B, num_vars, X, Y, T_in) float32 — same layout as the PyTorch input.
    B, V, X, Y, T_in = x.shape
    N = B * V * X * Y
    assert 2 * modes1 <= X and modes2 <= Y // 2 + 1

    tile_pw = _pick_tile(N, cap=8192)       # W=16 pointwise path
    tile_head = _pick_tile(N, cap=2048)     # 256-wide head: smaller VMEM cap
    n_pad = _round_up(N, tile_pw)           # multiple of both tiles

    # get_grid
    gx = jnp.linspace(0.0, 1.0, X, dtype=jnp.float32).reshape(1, 1, X, 1, 1)
    gy = jnp.linspace(0.0, 1.0, Y, dtype=jnp.float32).reshape(1, 1, 1, Y, 1)
    grid5 = jnp.concatenate([jnp.broadcast_to(gx, (B, V, X, Y, 1)),
                             jnp.broadcast_to(gy, (B, V, X, Y, 1))], axis=-1)

    # channels-first flattening; pad ONCE for the whole stack.
    x_cf = jnp.transpose(jnp.concatenate([x, grid5], axis=-1)
                         .reshape(N, T_in + 2))              # (T_in+2, N)
    g2 = jnp.transpose(grid5.reshape(N, 2))                  # (2, N)
    x_cf = _pad_to(x_cf, n_pad)
    g2 = _pad_to(g2, n_pad)

    h = channel_mix(x_cf, params['fc0_w'], params['fc0_b'], tile_pw)  # bf16

    dims = (B, V, X, Y, width)
    bases = _dft_bases(X, Y, modes1, modes2)

    def blk(z, i):
        bp = params['blocks'][i]
        x1 = spectral_conv2d(z, bp['spec_w'], bases, dims, N, n_pad)
        return fno_pointwise(x1, z, g2, bp, tile_pw)

    x0 = blk(h, 0)
    h = blk(x0, 1)
    h = blk(h, 2) + x0
    x1b = blk(h, 3)
    h = blk(x1b, 4)
    h = blk(h, 5) + x1b

    # Bayesian heads: weight = mu + exp(log_sigma) * eps, eps ~ N(0, 1).
    k1, k2, k3, k4 = jax.random.split(eps_key, 4)
    sample = lambda mu, ls, k: mu + jnp.exp(ls) * jax.random.normal(
        k, mu.shape, jnp.float32)
    fc1_w = sample(params['fc1_w_mu'], params['fc1_w_ls'], k1)
    fc1_b = sample(params['fc1_b_mu'], params['fc1_b_ls'], k2)
    fc2_w = sample(params['fc2_w_mu'], params['fc2_w_ls'], k3)
    fc2_b = sample(params['fc2_b_mu'], params['fc2_b_ls'], k4)

    out_cf = bayes_head(h, fc1_w, fc1_b, fc2_w, fc2_b, tile_head)  # (step, n_pad)
    step = fc2_b.shape[0]
    out = out_cf[:, :N].reshape(step, B, V, X, Y)
    return jnp.transpose(out, (1, 2, 3, 4, 0))


if __name__ == "__main__":
    T_in, step = 10, 5
    modes1, modes2 = 6, 6
    num_vars = 2
    width_time = 16
    B, X, Y = 2, 16, 16

    key = jax.random.PRNGKey(0)
    pkey, xkey, ekey = jax.random.split(key, 3)
    params = init_params(pkey, T_in, step, modes1, modes2, num_vars, width_time)
    x = jax.random.normal(xkey, (B, num_vars, X, Y, T_in), dtype=jnp.float32)

    fwd = jax.jit(functools.partial(fno_multi2d_bayesian_forward,
                                    modes1=modes1, modes2=modes2,
                                    width=width_time))
    out = jax.block_until_ready(fwd(params, x, ekey))
    assert out.shape == (B, num_vars, X, Y, step), out.shape
    assert bool(jnp.all(jnp.isfinite(out)))
    print("KERNEL_OK")
</pallas_src>

<mosaic_0001>
module attributes {stable_mosaic.version = 11 : i64} {
  func.func @_cmix_kernel(%arg0: i32, %arg1: memref<12x256xf32, #tpu.memory_space<vmem>>, %arg2: memref<16x12xf32, #tpu.memory_space<vmem>>, %arg3: memref<16x1xf32, #tpu.memory_space<vmem>>, %arg4: memref<16x256xbf16, #tpu.memory_space<vmem>>) attributes {dimension_semantics = [#tpu.dimension_semantics<parallel>], iteration_bounds = array<i64: 4>, scalar_prefetch = 0 : i64, scratch_operands = 0 : i64, tpu.core_type = #tpu.core_type<tc>, window_params = [{transform_indices = @transform_0, window_bounds = array<i64: 12, 256>}, {pipeline_mode = #tpu.pipeline_mode<synchronous>, transform_indices = @transform_1, window_bounds = array<i64: 16, 12>}, {pipeline_mode = #tpu.pipeline_mode<synchronous>, transform_indices = @transform_2, window_bounds = array<i64: 16, 1>}, {transform_indices = @transform_3, window_bounds = array<i64: 16, 256>}]} {
    %c0 = arith.constant 0 : index
    %c0_0 = arith.constant 0 : index
    %0 = vector.load %arg2[%c0, %c0_0] : memref<16x12xf32, #tpu.memory_space<vmem>>, vector<16x12xf32>
    %c0_1 = arith.constant 0 : index
    %c0_2 = arith.constant 0 : index
    %1 = vector.load %arg1[%c0_1, %c0_2] : memref<12x256xf32, #tpu.memory_space<vmem>>, vector<12x256xf32>
    %cst = arith.constant dense<0.000000e+00> : vector<16x256xf32>
    %2 = tpu.matmul %0, %1, %cst {dimension_numbers = #tpu.dot_dimension_numbers<[1], [0], [0], [1], [0, 0, 1, 1], [], []>} : vector<16x12xf32>, vector<12x256xf32>, vector<16x256xf32> -> vector<16x256xf32>
    %c0_3 = arith.constant 0 : index
    %c0_4 = arith.constant 0 : index
    %3 = vector.load %arg3[%c0_3, %c0_4] : memref<16x1xf32, #tpu.memory_space<vmem>>, vector<16x1xf32>
    %4 = vector.broadcast %3 : vector<16x1xf32> to vector<16x256xf32>
    %5 = arith.addf %2, %4 : vector<16x256xf32>
    %6 = arith.truncf %5 : vector<16x256xf32> to vector<16x256xbf16>
    %c0_5 = arith.constant 0 : index
    %c0_6 = arith.constant 0 : index
    %7 = vector.load %arg4[%c0_5, %c0_6] : memref<16x256xbf16, #tpu.memory_space<vmem>>, vector<16x256xbf16>
    tpu.vector_store %arg4[%c0_5, %c0_6], %6 {strides = array<i32>} : memref<16x256xbf16, #tpu.memory_space<vmem>>, vector<16x256xbf16>,
    return
  }
  func.func @transform_0(%arg0: i32) -> (i32, i32) {
    %c0_i32 = arith.constant 0 : i32
    %c0_i32_0 = arith.constant 0 : i32
    return %c0_i32, %arg0 : i32, i32
  }
  func.func @transform_1(%arg0: i32) -> (i32, i32) {
    %c0_i32 = arith.constant 0 : i32
    %c0_i32_0 = arith.constant 0 : i32
    %c0_i32_1 = arith.constant 0 : i32
    return %c0_i32, %c0_i32_0 : i32, i32
  }
  func.func @transform_2(%arg0: i32) -> (i32, i32) {
    %c0_i32 = arith.constant 0 : i32
    %c0_i32_0 = arith.constant 0 : i32
    %c0_i32_1 = arith.constant 0 : i32
    return %c0_i32, %c0_i32_0 : i32, i32
  }
  func.func @transform_3(%arg0: i32) -> (i32, i32) {
    %c0_i32 = arith.constant 0 : i32
    %c0_i32_0 = arith.constant 0 : i32
    return %c0_i32, %arg0 : i32, i32
  }
}

module attributes {stable_mosaic.version = 11 : i64} {
  func.func @_spectral_kernel(%arg0: i32, %arg1: memref<36x2x32xf32, #tpu.memory_space<vmem>>, %arg2: memref<36x32x32xf32, #tpu.memory_space<vmem>>, %arg3: memref<36x2x32xf32, #tpu.memory_space<vmem>>) attributes {dimension_semantics = [#tpu.dimension_semantics<parallel>], iteration_bounds = array<i64: 4>, scalar_prefetch = 0 : i64, scratch_operands = 0 : i64, tpu.core_type = #tpu.core_type<tc>, window_params = [{transform_indices = @transform_0, window_bounds = array<i64: 36, 2, 32>}, {transform_indices = @transform_1, window_bounds = array<i64: 36, 32, 32>}, {transform_indices = @transform_2, window_bounds = array<i64: 36, 2, 32>}]} {
    %c0 = arith.constant 0 : index
    %c0_0 = arith.constant 0 : index
    %c0_1 = arith.constant 0 : index
    %0 = vector.load %arg1[%c0, %c0_0, %c0_1] : memref<36x2x32xf32, #tpu.memory_space<vmem>>, vector<36x2x32xf32>
    %c0_2 = arith.constant 0 : index
    %c0_3 = arith.constant 0 : index
    %c0_4 = arith.constant 0 : index
    %1 = vector.load %arg2[%c0_2, %c0_3, %c0_4] : memref<36x32x32xf32, #tpu.memory_space<vmem>>, vector<36x32x32xf32>
    "tpu.trace_start"() <{level = 10 : i32, message = "pbc,pcd->pbd"}> : () -> ()
    %cst = arith.constant dense<0.000000e+00> : vector<36x2x32xf32>
    %2 = tpu.matmul %0, %1, %cst {dimension_numbers = #tpu.dot_dimension_numbers<[2], [1], [1], [2], [0, 0, 0, 1, 1, 2], [0], [0]>} : vector<36x2x32xf32>, vector<36x32x32xf32>, vector<36x2x32xf32> -> vector<36x2x32xf32>
    "tpu.trace_stop"() : () -> ()
    %c0_5 = arith.constant 0 : index
    %c0_6 = arith.constant 0 : index
    %c0_7 = arith.constant 0 : index
    %3 = vector.load %arg3[%c0_5, %c0_6, %c0_7] : memref<36x2x32xf32, #tpu.memory_space<vmem>>, vector<36x2x32xf32>
    tpu.vector_store %arg3[%c0_5, %c0_6, %c0_7], %2 {strides = array<i32>} : memref<36x2x32xf32, #tpu.memory_space<vmem>>, vector<36x2x32xf32>,
    return
  }
  func.func @transform_0(%arg0: i32) -> (i32, i32, i32) {
    %c0_i32 = arith.constant 0 : i32
    %c0_i32_0 = arith.constant 0 : i32
    %c0_i32_1 = arith.constant 0 : i32
    return %arg0, %c0_i32, %c0_i32_0 : i32, i32, i32
  }
  func.func @transform_1(%arg0: i32) -> (i32, i32, i32) {
    %c0_i32 = arith.constant 0 : i32
    %c0_i32_0 = arith.constant 0 : i32
    %c0_i32_1 = arith.constant 0 : i32
    return %arg0, %c0_i32, %c0_i32_0 : i32, i32, i32
  }
  func.func @transform_2(%arg0: i32) -> (i32, i32, i32) {
    %c0_i32 = arith.constant 0 : i32
    %c0_i32_0 = arith.constant 0 : i32
    %c0_i32_1 = arith.constant 0 : i32
    return %arg0, %c0_i32, %c0_i32_0 : i32, i32, i32
  }
}

module attributes {stable_mosaic.version = 11 : i64} {
  func.func @_fno_block_kernel(%arg0: i32, %arg1: memref<16x256xbf16, #tpu.memory_space<vmem>>, %arg2: memref<16x256xbf16, #tpu.memory_space<vmem>>, %arg3: memref<2x256xf32, #tpu.memory_space<vmem>>, %arg4: memref<16x16xf32, #tpu.memory_space<vmem>>, %arg5: memref<16x1xf32, #tpu.memory_space<vmem>>, %arg6: memref<16x32xf32, #tpu.memory_space<vmem>>, %arg7: memref<16x1xf32, #tpu.memory_space<vmem>>, %arg8: memref<16x2xf32, #tpu.memory_space<vmem>>, %arg9: memref<16x256xbf16, #tpu.memory_space<vmem>>, %arg10: memref<32x256xf32, #tpu.memory_space<vmem>>) attributes {dimension_semantics = [#tpu.dimension_semantics<parallel>], iteration_bounds = array<i64: 4>, scalar_prefetch = 0 : i64, scratch_operands = 1 : i64, tpu.core_type = #tpu.core_type<tc>, window_params = [{transform_indices = @transform_0, window_bounds = array<i64: 16, 256>}, {transform_indices = @transform_1, window_bounds = array<i64: 16, 256>}, {transform_indices = @transform_2, window_bounds = array<i64: 2, 256>}, {pipeline_mode = #tpu.pipeline_mode<synchronous>, transform_indices = @transform_3, window_bounds = array<i64: 16, 16>}, {pipeline_mode = #tpu.pipeline_mode<synchronous>, transform_indices = @transform_4, window_bounds = array<i64: 16, 1>}, {pipeline_mode = #tpu.pipeline_mode<synchronous>, transform_indices = @transform_5, window_bounds = array<i64: 16, 32>}, {pipeline_mode = #tpu.pipeline_mode<synchronous>, transform_indices = @transform_6, window_bounds = array<i64: 16, 1>}, {pipeline_mode = #tpu.pipeline_mode<synchronous>, transform_indices = @transform_7, window_bounds = array<i64: 16, 2>}, {transform_indices = @transform_8, window_bounds = array<i64: 16, 256>}]} {
    %c0 = arith.constant 0 : index
    %c0_0 = arith.constant 0 : index
    %0 = vector.load %arg1[%c0, %c0_0] : memref<16x256xbf16, #tpu.memory_space<vmem>>, vector<16x256xbf16>
    %1 = arith.extf %0 : vector<16x256xbf16> to vector<16x256xf32>
    %c0_1 = arith.constant 0 : index
    %c0_2 = arith.constant 0 : index
    %2 = vector.load %arg2[%c0_1, %c0_2] : memref<16x256xbf16, #tpu.memory_space<vmem>>, vector<16x256xbf16>
    %3 = arith.extf %2 : vector<16x256xbf16> to vector<16x256xf32>
    %c0_3 = arith.constant 0 : index
    %c0_4 = arith.constant 0 : index
    %4 = vector.load %arg4[%c0_3, %c0_4] : memref<16x16xf32, #tpu.memory_space<vmem>>, vector<16x16xf32>
    %cst = arith.constant dense<0.000000e+00> : vector<16x256xf32>
    %5 = tpu.matmul %4, %1, %cst {dimension_numbers = #tpu.dot_dimension_numbers<[1], [0], [0], [1], [0, 0, 1, 1], [], []>} : vector<16x16xf32>, vector<16x256xf32>, vector<16x256xf32> -> vector<16x256xf32>
    %c0_5 = arith.constant 0 : index
    %c0_6 = arith.constant 0 : index
    %6 = vector.load %arg5[%c0_5, %c0_6] : memref<16x1xf32, #tpu.memory_space<vmem>>, vector<16x1xf32>
    %7 = vector.broadcast %6 : vector<16x1xf32> to vector<16x256xf32>
    %8 = arith.addf %5, %7 : vector<16x256xf32>
    %cst_7 = arith.constant 5.000000e-01 : f32
    %9 = vector.broadcast %cst_7 : f32 to vector<16x256xf32>
    %10 = arith.mulf %9, %8 : vector<16x256xf32>
    %cst_8 = arith.constant 1.41421354 : f32
    %11 = vector.broadcast %cst_8 : f32 to vector<16x256xf32>
    %12 = arith.divf %8, %11 : vector<16x256xf32>
    %cst_9 = arith.constant 0.000000e+00 : f32
    %13 = vector.broadcast %cst_9 : f32 to vector<16x256xf32>
    %14 = arith.cmpf oge, %12, %13 : vector<16x256xf32>
    %cst_10 = arith.constant 1.000000e+00 : f32
    %cst_11 = arith.constant -1.000000e+00 : f32
    %15 = vector.broadcast %cst_10 : f32 to vector<16x256xf32>
    %16 = vector.broadcast %cst_11 : f32 to vector<16x256xf32>
    %17 = arith.select %14, %15, %16 : vector<16x256xi1>, vector<16x256xf32>
    %18 = math.absf %12 : vector<16x256xf32>
    %cst_12 = arith.constant 0.327591091 : f32
    %19 = vector.broadcast %cst_12 : f32 to vector<16x256xf32>
    %20 = arith.mulf %19, %18 : vector<16x256xf32>
    %cst_13 = arith.constant 1.000000e+00 : f32
    %21 = vector.broadcast %cst_13 : f32 to vector<16x256xf32>
    %22 = arith.addf %21, %20 : vector<16x256xf32>
    %23 = tpu.reciprocal %22 {approx = true} : vector<16x256xf32> -> vector<16x256xf32>
    %cst_14 = arith.constant 1.06140542 : f32
    %24 = vector.broadcast %cst_14 : f32 to vector<16x256xf32>
    %25 = arith.mulf %24, %23 : vector<16x256xf32>
    %cst_15 = arith.constant -1.45315206 : f32
    %26 = vector.broadcast %cst_15 : f32 to vector<16x256xf32>
    %27 = arith.addf %25, %26 : vector<16x256xf32>
    %28 = arith.mulf %27, %23 : vector<16x256xf32>
    %cst_16 = arith.constant 1.42141378 : f32
    %29 = vector.broadcast %cst_16 : f32 to vector<16x256xf32>
    %30 = arith.addf %28, %29 : vector<16x256xf32>
    %31 = arith.mulf %30, %23 : vector<16x256xf32>
    %cst_17 = arith.constant -0.284496725 : f32
    %32 = vector.broadcast %cst_17 : f32 to vector<16x256xf32>
    %33 = arith.addf %31, %32 : vector<16x256xf32>
    %34 = arith.mulf %33, %23 : vector<16x256xf32>
    %cst_18 = arith.constant 0.254829586 : f32
    %35 = vector.broadcast %cst_18 : f32 to vector<16x256xf32>
    %36 = arith.addf %34, %35 : vector<16x256xf32>
    %37 = arith.mulf %36, %23 : vector<16x256xf32>
    %cst_19 = arith.constant 0.000000e+00 : f32
    %38 = vector.broadcast %cst_19 : f32 to vector<16x256xf32>
    %39 = arith.subf %38, %18 : vector<16x256xf32>
    %40 = arith.mulf %39, %18 : vector<16x256xf32>
    %41 = math.exp %40 : vector<16x256xf32>
    %42 = arith.mulf %37, %41 : vector<16x256xf32>
    %cst_20 = arith.constant 1.000000e+00 : f32
    %43 = vector.broadcast %cst_20 : f32 to vector<16x256xf32>
    %44 = arith.subf %43, %42 : vector<16x256xf32>
    %45 = arith.mulf %17, %44 : vector<16x256xf32>
    %cst_21 = arith.constant 1.000000e+00 : f32
    %46 = vector.broadcast %cst_21 : f32 to vector<16x256xf32>
    %47 = arith.addf %46, %45 : vector<16x256xf32>
    %48 = arith.mulf %10, %47 : vector<16x256xf32>
    %c0_22 = arith.constant 0 : index
    %c0_23 = arith.constant 0 : index
    %49 = vector.load %arg10[%c0_22, %c0_23] : memref<32x256xf32, #tpu.memory_space<vmem>>, vector<16x256xf32>
    tpu.vector_store %arg10[%c0_22, %c0_23], %48 {strides = array<i32>} : memref<32x256xf32, #tpu.memory_space<vmem>>, vector<16x256xf32>,
    %c16 = arith.constant 16 : index
    %c0_24 = arith.constant 0 : index
    %50 = vector.load %arg10[%c16, %c0_24] : memref<32x256xf32, #tpu.memory_space<vmem>>, vector<16x256xf32>
    tpu.vector_store %arg10[%c16, %c0_24], %3 {strides = array<i32>} : memref<32x256xf32, #tpu.memory_space<vmem>>, vector<16x256xf32>,
    %c0_25 = arith.constant 0 : index
    %c0_26 = arith.constant 0 : index
    %51 = vector.load %arg6[%c0_25, %c0_26] : memref<16x32xf32, #tpu.memory_space<vmem>>, vector<16x32xf32>
    %c0_27 = arith.constant 0 : index
    %c0_28 = arith.constant 0 : index
    %52 = vector.load %arg10[%c0_27, %c0_28] : memref<32x256xf32, #tpu.memory_space<vmem>>, vector<32x256xf32>
    %cst_29 = arith.constant dense<0.000000e+00> : vector<16x256xf32>
    %53 = tpu.matmul %51, %52, %cst_29 {dimension_numbers = #tpu.dot_dimension_numbers<[1], [0], [0], [1], [0, 0, 1, 1], [], []>} : vector<16x32xf32>, vector<32x256xf32>, vector<16x256xf32> -> vector<16x256xf32>
    %c0_30 = arith.constant 0 : index
    %c0_31 = arith.constant 0 : index
    %54 = vector.load %arg7[%c0_30, %c0_31] : memref<16x1xf32, #tpu.memory_space<vmem>>, vector<16x1xf32>
    %55 = vector.broadcast %54 : vector<16x1xf32> to vector<16x256xf32>
    %56 = arith.addf %53, %55 : vector<16x256xf32>
    %c0_32 = arith.constant 0 : index
    %c0_33 = arith.constant 0 : index
    %57 = vector.load %arg3[%c0_32, %c0_33] : memref<2x256xf32, #tpu.memory_space<vmem>>, vector<2x256xf32>
    %c0_34 = arith.constant 0 : index
    %c0_35 = arith.constant 0 : index
    %58 = vector.load %arg8[%c0_34, %c0_35] : memref<16x2xf32, #tpu.memory_space<vmem>>, vector<16x2xf32>
    %59 = vector.extract_strided_slice %58 {offsets = [0, 0], sizes = [16, 1], strides = [1, 1]} : vector<16x2xf32> to vector<16x1xf32>
    %60 = vector.extract_strided_slice %57 {offsets = [0, 0], sizes = [1, 256], strides = [1, 1]} : vector<2x256xf32> to vector<1x256xf32>
    %61 = vector.broadcast %59 : vector<16x1xf32> to vector<16x256xf32>
    %62 = vector.broadcast %60 : vector<1x256xf32> to vector<16x256xf32>
    %63 = arith.mulf %61, %62 : vector<16x256xf32>
    %64 = arith.addf %56, %63 : vector<16x256xf32>
    %65 = vector.extract_strided_slice %58 {offsets = [0, 1], sizes = [16, 1], strides = [1, 1]} : vector<16x2xf32> to vector<16x1xf32>
    %66 = vector.extract_strided_slice %57 {offsets = [1, 0], sizes = [1, 256], strides = [1, 1]} : vector<2x256xf32> to vector<1x256xf32>
    %67 = vector.broadcast %65 : vector<16x1xf32> to vector<16x256xf32>
    %68 = vector.broadcast %66 : vector<1x256xf32> to vector<16x256xf32>
    %69 = arith.mulf %67, %68 : vector<16x256xf32>
    %70 = arith.addf %64, %69 : vector<16x256xf32>
    %cst_36 = arith.constant 5.000000e-01 : f32
    %71 = vector.broadcast %cst_36 : f32 to vector<16x256xf32>
    %72 = arith.mulf %71, %70 : vector<16x256xf32>
    %cst_37 = arith.constant 1.41421354 : f32
    %73 = vector.broadcast %cst_37 : f32 to vector<16x256xf32>
    %74 = arith.divf %70, %73 : vector<16x256xf32>
    %cst_38 = arith.constant 0.000000e+00 : f32
    %75 = vector.broadcast %cst_38 : f32 to vector<16x256xf32>
    %76 = arith.cmpf oge, %74, %75 : vector<16x256xf32>
    %cst_39 = arith.constant 1.000000e+00 : f32
    %cst_40 = arith.constant -1.000000e+00 : f32
    %77 = vector.broadcast %cst_39 : f32 to vector<16x256xf32>
    %78 = vector.broadcast %cst_40 : f32 to vector<16x256xf32>
    %79 = arith.select %76, %77, %78 : vector<16x256xi1>, vector<16x256xf32>
    %80 = math.absf %74 : vector<16x256xf32>
    %cst_41 = arith.constant 0.327591091 : f32
    %81 = vector.broadcast %cst_41 : f32 to vector<16x256xf32>
    %82 = arith.mulf %81, %80 : vector<16x256xf32>
    %cst_42 = arith.constant 1.000000e+00 : f32
    %83 = vector.broadcast %cst_42 : f32 to vector<16x256xf32>
    %84 = arith.addf %83, %82 : vector<16x256xf32>
    %85 = tpu.reciprocal %84 {approx = true} : vector<16x256xf32> -> vector<16x256xf32>
    %cst_43 = arith.constant 1.06140542 : f32
    %86 = vector.broadcast %cst_43 : f32 to vector<16x256xf32>
    %87 = arith.mulf %86, %85 : vector<16x256xf32>
    %cst_44 = arith.constant -1.45315206 : f32
    %88 = vector.broadcast %cst_44 : f32 to vector<16x256xf32>
    %89 = arith.addf %87, %88 : vector<16x256xf32>
    %90 = arith.mulf %89, %85 : vector<16x256xf32>
    %cst_45 = arith.constant 1.42141378 : f32
    %91 = vector.broadcast %cst_45 : f32 to vector<16x256xf32>
    %92 = arith.addf %90, %91 : vector<16x256xf32>
    %93 = arith.mulf %92, %85 : vector<16x256xf32>
    %cst_46 = arith.constant -0.284496725 : f32
    %94 = vector.broadcast %cst_46 : f32 to vector<16x256xf32>
    %95 = arith.addf %93, %94 : vector<16x256xf32>
    %96 = arith.mulf %95, %85 : vector<16x256xf32>
    %cst_47 = arith.constant 0.254829586 : f32
    %97 = vector.broadcast %cst_47 : f32 to vector<16x256xf32>
    %98 = arith.addf %96, %97 : vector<16x256xf32>
    %99 = arith.mulf %98, %85 : vector<16x256xf32>
    %cst_48 = arith.constant 0.000000e+00 : f32
    %100 = vector.broadcast %cst_48 : f32 to vector<16x256xf32>
    %101 = arith.subf %100, %80 : vector<16x256xf32>
    %102 = arith.mulf %101, %80 : vector<16x256xf32>
    %103 = math.exp %102 : vector<16x256xf32>
    %104 = arith.mulf %99, %103 : vector<16x256xf32>
    %cst_49 = arith.constant 1.000000e+00 : f32
    %105 = vector.broadcast %cst_49 : f32 to vector<16x256xf32>
    %106 = arith.subf %105, %104 : vector<16x256xf32>
    %107 = arith.mulf %79, %106 : vector<16x256xf32>
    %cst_50 = arith.constant 1.000000e+00 : f32
    %108 = vector.broadcast %cst_50 : f32 to vector<16x256xf32>
    %109 = arith.addf %108, %107 : vector<16x256xf32>
    %110 = arith.mulf %72, %109 : vector<16x256xf32>
    %111 = arith.truncf %110 : vector<16x256xf32> to vector<16x256xbf16>
    %c0_51 = arith.constant 0 : index
    %c0_52 = arith.constant 0 : index
    %112 = vector.load %arg9[%c0_51, %c0_52] : memref<16x256xbf16, #tpu.memory_space<vmem>>, vector<16x256xbf16>
    tpu.vector_store %arg9[%c0_51, %c0_52], %111 {strides = array<i32>} : memref<16x256xbf16, #tpu.memory_space<vmem>>, vector<16x256xbf16>,
    return
  }
  func.func @transform_0(%arg0: i32) -> (i32, i32) {
    %c0_i32 = arith.constant 0 : i32
    %c0_i32_0 = arith.constant 0 : i32
    return %c0_i32, %arg0 : i32, i32
  }
  func.func @transform_1(%arg0: i32) -> (i32, i32) {
    %c0_i32 = arith.constant 0 : i32
    %c0_i32_0 = arith.constant 0 : i32
    return %c0_i32, %arg0 : i32, i32
  }
  func.func @transform_2(%arg0: i32) -> (i32, i32) {
    %c0_i32 = arith.constant 0 : i32
    %c0_i32_0 = arith.constant 0 : i32
    return %c0_i32, %arg0 : i32, i32
  }
  func.func @transform_3(%arg0: i32) -> (i32, i32) {
    %c0_i32 = arith.constant 0 : i32
    %c0_i32_0 = arith.constant 0 : i32
    %c0_i32_1 = arith.constant 0 : i32
    return %c0_i32, %c0_i32_0 : i32, i32
  }
  func.func @transform_4(%arg0: i32) -> (i32, i32) {
    %c0_i32 = arith.constant 0 : i32
    %c0_i32_0 = arith.constant 0 : i32
    %c0_i32_1 = arith.constant 0 : i32
    return %c0_i32, %c0_i32_0 : i32, i32
  }
  func.func @transform_5(%arg0: i32) -> (i32, i32) {
    %c0_i32 = arith.constant 0 : i32
    %c0_i32_0 = arith.constant 0 : i32
    %c0_i32_1 = arith.constant 0 : i32
    return %c0_i32, %c0_i32_0 : i32, i32
  }
  func.func @transform_6(%arg0: i32) -> (i32, i32) {
    %c0_i32 = arith.constant 0 : i32
    %c0_i32_0 = arith.constant 0 : i32
    %c0_i32_1 = arith.constant 0 : i32
    return %c0_i32, %c0_i32_0 : i32, i32
  }
  func.func @transform_7(%arg0: i32) -> (i32, i32) {
    %c0_i32 = arith.constant 0 : i32
    %c0_i32_0 = arith.constant 0 : i32
    %c0_i32_1 = arith.constant 0 : i32
    return %c0_i32, %c0_i32_0 : i32, i32
  }
  func.func @transform_8(%arg0: i32) -> (i32, i32) {
    %c0_i32 = arith.constant 0 : i32
    %c0_i32_0 = arith.constant 0 : i32
    return %c0_i32, %arg0 : i32, i32
  }
}

module attributes {stable_mosaic.version = 11 : i64} {
  func.func @_head_kernel(%arg0: i32, %arg1: memref<16x256xbf16, #tpu.memory_space<vmem>>, %arg2: memref<256x16xf32, #tpu.memory_space<vmem>>, %arg3: memref<256x1xf32, #tpu.memory_space<vmem>>, %arg4: memref<5x256xf32, #tpu.memory_space<vmem>>, %arg5: memref<5x1xf32, #tpu.memory_space<vmem>>, %arg6: memref<5x256xf32, #tpu.memory_space<vmem>>) attributes {dimension_semantics = [#tpu.dimension_semantics<parallel>], iteration_bounds = array<i64: 4>, scalar_prefetch = 0 : i64, scratch_operands = 0 : i64, tpu.core_type = #tpu.core_type<tc>, window_params = [{transform_indices = @transform_0, window_bounds = array<i64: 16, 256>}, {pipeline_mode = #tpu.pipeline_mode<synchronous>, transform_indices = @transform_1, window_bounds = array<i64: 256, 16>}, {pipeline_mode = #tpu.pipeline_mode<synchronous>, transform_indices = @transform_2, window_bounds = array<i64: 256, 1>}, {pipeline_mode = #tpu.pipeline_mode<synchronous>, transform_indices = @transform_3, window_bounds = array<i64: 5, 256>}, {pipeline_mode = #tpu.pipeline_mode<synchronous>, transform_indices = @transform_4, window_bounds = array<i64: 5, 1>}, {transform_indices = @transform_5, window_bounds = array<i64: 5, 256>}]} {
    %c0 = arith.constant 0 : index
    %c0_0 = arith.constant 0 : index
    %0 = vector.load %arg1[%c0, %c0_0] : memref<16x256xbf16, #tpu.memory_space<vmem>>, vector<16x256xbf16>
    %1 = arith.extf %0 : vector<16x256xbf16> to vector<16x256xf32>
    %c0_1 = arith.constant 0 : index
    %c0_2 = arith.constant 0 : index
    %2 = vector.load %arg2[%c0_1, %c0_2] : memref<256x16xf32, #tpu.memory_space<vmem>>, vector<256x16xf32>
    %cst = arith.constant dense<0.000000e+00> : vector<256x256xf32>
    %3 = tpu.matmul %2, %1, %cst {dimension_numbers = #tpu.dot_dimension_numbers<[1], [0], [0], [1], [0, 0, 1, 1], [], []>} : vector<256x16xf32>, vector<16x256xf32>, vector<256x256xf32> -> vector<256x256xf32>
    %c0_3 = arith.constant 0 : index
    %c0_4 = arith.constant 0 : index
    %4 = vector.load %arg3[%c0_3, %c0_4] : memref<256x1xf32, #tpu.memory_space<vmem>>, vector<256x1xf32>
    %5 = vector.broadcast %4 : vector<256x1xf32> to vector<256x256xf32>
    %6 = arith.addf %3, %5 : vector<256x256xf32>
    %cst_5 = arith.constant 5.000000e-01 : f32
    %7 = vector.broadcast %cst_5 : f32 to vector<256x256xf32>
    %8 = arith.mulf %7, %6 : vector<256x256xf32>
    %cst_6 = arith.constant 1.41421354 : f32
    %9 = vector.broadcast %cst_6 : f32 to vector<256x256xf32>
    %10 = arith.divf %6, %9 : vector<256x256xf32>
    %cst_7 = arith.constant 0.000000e+00 : f32
    %11 = vector.broadcast %cst_7 : f32 to vector<256x256xf32>
    %12 = arith.cmpf oge, %10, %11 : vector<256x256xf32>
    %cst_8 = arith.constant 1.000000e+00 : f32
    %cst_9 = arith.constant -1.000000e+00 : f32
    %13 = vector.broadcast %cst_8 : f32 to vector<256x256xf32>
    %14 = vector.broadcast %cst_9 : f32 to vector<256x256xf32>
    %15 = arith.select %12, %13, %14 : vector<256x256xi1>, vector<256x256xf32>
    %16 = math.absf %10 : vector<256x256xf32>
    %cst_10 = arith.constant 0.327591091 : f32
    %17 = vector.broadcast %cst_10 : f32 to vector<256x256xf32>
    %18 = arith.mulf %17, %16 : vector<256x256xf32>
    %cst_11 = arith.constant 1.000000e+00 : f32
    %19 = vector.broadcast %cst_11 : f32 to vector<256x256xf32>
    %20 = arith.addf %19, %18 : vector<256x256xf32>
    %21 = tpu.reciprocal %20 {approx = true} : vector<256x256xf32> -> vector<256x256xf32>
    %cst_12 = arith.constant 1.06140542 : f32
    %22 = vector.broadcast %cst_12 : f32 to vector<256x256xf32>
    %23 = arith.mulf %22, %21 : vector<256x256xf32>
    %cst_13 = arith.constant -1.45315206 : f32
    %24 = vector.broadcast %cst_13 : f32 to vector<256x256xf32>
    %25 = arith.addf %23, %24 : vector<256x256xf32>
    %26 = arith.mulf %25, %21 : vector<256x256xf32>
    %cst_14 = arith.constant 1.42141378 : f32
    %27 = vector.broadcast %cst_14 : f32 to vector<256x256xf32>
    %28 = arith.addf %26, %27 : vector<256x256xf32>
    %29 = arith.mulf %28, %21 : vector<256x256xf32>
    %cst_15 = arith.constant -0.284496725 : f32
    %30 = vector.broadcast %cst_15 : f32 to vector<256x256xf32>
    %31 = arith.addf %29, %30 : vector<256x256xf32>
    %32 = arith.mulf %31, %21 : vector<256x256xf32>
    %cst_16 = arith.constant 0.254829586 : f32
    %33 = vector.broadcast %cst_16 : f32 to vector<256x256xf32>
    %34 = arith.addf %32, %33 : vector<256x256xf32>
    %35 = arith.mulf %34, %21 : vector<256x256xf32>
    %cst_17 = arith.constant 0.000000e+00 : f32
    %36 = vector.broadcast %cst_17 : f32 to vector<256x256xf32>
    %37 = arith.subf %36, %16 : vector<256x256xf32>
    %38 = arith.mulf %37, %16 : vector<256x256xf32>
    %39 = math.exp %38 : vector<256x256xf32>
    %40 = arith.mulf %35, %39 : vector<256x256xf32>
    %cst_18 = arith.constant 1.000000e+00 : f32
    %41 = vector.broadcast %cst_18 : f32 to vector<256x256xf32>
    %42 = arith.subf %41, %40 : vector<256x256xf32>
    %43 = arith.mulf %15, %42 : vector<256x256xf32>
    %cst_19 = arith.constant 1.000000e+00 : f32
    %44 = vector.broadcast %cst_19 : f32 to vector<256x256xf32>
    %45 = arith.addf %44, %43 : vector<256x256xf32>
    %46 = arith.mulf %8, %45 : vector<256x256xf32>
    %c0_20 = arith.constant 0 : index
    %c0_21 = arith.constant 0 : index
    %47 = vector.load %arg4[%c0_20, %c0_21] : memref<5x256xf32, #tpu.memory_space<vmem>>, vector<5x256xf32>
    %cst_22 = arith.constant dense<0.000000e+00> : vector<5x256xf32>
    %48 = tpu.matmul %47, %46, %cst_22 {dimension_numbers = #tpu.dot_dimension_numbers<[1], [0], [0], [1], [0, 0, 1, 1], [], []>} : vector<5x256xf32>, vector<256x256xf32>, vector<5x256xf32> -> vector<5x256xf32>
    %c0_23 = arith.constant 0 : index
    %c0_24 = arith.constant 0 : index
    %49 = vector.load %arg5[%c0_23, %c0_24] : memref<5x1xf32, #tpu.memory_space<vmem>>, vector<5x1xf32>
    %50 = vector.broadcast %49 : vector<5x1xf32> to vector<5x256xf32>
    %51 = arith.addf %48, %50 : vector<5x256xf32>
    %c0_25 = arith.constant 0 : index
    %c0_26 = arith.constant 0 : index
    %52 = vector.load %arg6[%c0_25, %c0_26] : memref<5x256xf32, #tpu.memory_space<vmem>>, vector<5x256xf32>
    tpu.vector_store %arg6[%c0_25, %c0_26], %51 {strides = array<i32>} : memref<5x256xf32, #tpu.memory_space<vmem>>, vector<5x256xf32>,
    return
  }
  func.func @transform_0(%arg0: i32) -> (i32, i32) {
    %c0_i32 = arith.constant 0 : i32
    %c0_i32_0 = arith.constant 0 : i32
    return %c0_i32, %arg0 : i32, i32
  }
  func.func @transform_1(%arg0: i32) -> (i32, i32) {
    %c0_i32 = arith.constant 0 : i32
    %c0_i32_0 = arith.constant 0 : i32
    %c0_i32_1 = arith.constant 0 : i32
    return %c0_i32, %c0_i32_0 : i32, i32
  }
  func.func @transform_2(%arg0: i32) -> (i32, i32) {
    %c0_i32 = arith.constant 0 : i32
    %c0_i32_0 = arith.constant 0 : i32
    %c0_i32_1 = arith.constant 0 : i32
    return %c0_i32, %c0_i32_0 : i32, i32
  }
  func.func @transform_3(%arg0: i32) -> (i32, i32) {
    %c0_i32 = arith.constant 0 : i32
    %c0_i32_0 = arith.constant 0 : i32
    %c0_i32_1 = arith.constant 0 : i32
    return %c0_i32, %c0_i32_0 : i32, i32
  }
  func.func @transform_4(%arg0: i32) -> (i32, i32) {
    %c0_i32 = arith.constant 0 : i32
    %c0_i32_0 = arith.constant 0 : i32
    %c0_i32_1 = arith.constant 0 : i32
    return %c0_i32, %c0_i32_0 : i32, i32
  }
  func.func @transform_5(%arg0: i32) -> (i32, i32) {
    %c0_i32 = arith.constant 0 : i32
    %c0_i32_0 = arith.constant 0 : i32
    return %c0_i32, %arg0 : i32, i32
  }
}

</mosaic_0001>

<bundles_post_ra>
// kernel: fno_multi2d_bayesian_forward.16
= control target key start
LH: loop header
LB: loop body
LE: loop exit
PB: predicated region body
PF: predicated region fallthrough
CT: control target
= control target key end

     0   :  { %8 = vsyncpa [#allocation4], 0  ;;  %s557_s12 = smov 0   ;;  %s559_s13 = smov 0   ;;  %s651_s0 = inlined_call_operand.vmem [shape: f32[12,1024], index: 0, kind: input, shape index: {}]   ;;  %s652_s1 = inlined_call_operand.hbm [shape: f32[16,12], index: 1, kind: input, shape index: {}]   ;;  %s653_s2 = inlined_call_operand.vmem [shape: f32[16,1], index: 2, kind: input, shape index: {}]   ;;  %s654_s3 = inlined_call_operand.vmem [shape: bf16[16,1024], index: 3, kind: output, shape index: {}]  }
   0x1   :  { %s561_s14 = smov 0  }
   0x2 LB: > { %s573_s15 = sadd.s32 4294967295, %s531_s14   ;;  %s576_s16 = sadd.s32 1, %s531_s14   ;;  %s531_s14 = sphi %s561_s14, %s660_s14   ;;  %s527_s13 = sphi %s559_s13, %s659_s13   ;;  %s523_s12 = sphi %s557_s12, %s658_s12  }
   0x3   : > { %s18_s17 = ssub.s32 %s531_s14, %s576_s16  ;;  %s21_s18 = sadd.s32 1, %s527_s13 }
   0x4   : > { %p19_p0 = scmp.eq.s32.totalorder %s18_s17, 0  ;;  %p28_p1 = scmp.ne.s32.totalorder %s527_s13, %s523_s12 }
   0x5   : > { %p29_p2 = scmp.eq.s32.totalorder %s531_s14, 0  ;;  %p100_p3 = scmp.eq.s32.totalorder %s573_s15, 3 }
   0x6   : > { %s586_s19 = scalar_select %p19_p0, %s527_s13, %s21_s18  }
   0x7   : > { %p588_p4 = por %p29_p2, %p28_p1  ;;  %p592_p5 = por %p100_p3, %p28_p1 }
   0x8   : > { %p409_p6 = scmp.ge.s32.totalorder %s531_s14, 1  ;;  %p113_p7 = scmp.lt.s32.totalorder %s531_s14, 5 }
   0x9   : > { %p444_p8 = scmp.eq.s32.totalorder %s573_s15, 0  ;;  %s124_s25 = sshll.u32 %s652_s1, 4  ;;  %s125_s25 = int_to_ptr.hbm [resolvable:$true] %s124_s25 }
   0xa   : > { %p599_p9 = pnand %p409_p6, %p113_p7  ;;  %s533_s26 = smov [#allocation3]  }
   0xb   : > { %s126_s27 = sshll.u32 %s533_s26, 4  ;;  %s534_s28 = smov 128   ;;  %s127_s27 = int_to_ptr.vmem [resolvable:$true] %s126_s27 }
   0xc   : > { %p440_p10 = pneg %p599_p9  ;;  %s535_s29 = smov 8  }
   0xd   : > { %p411_p12 = scmp.ge.s32.totalorder %s531_s14, 4 }
   0xe   : > { %p441_p11 = pnand %p444_p8, %p440_p10 }
   0xf   : > { %139 = sbr.rel (%p411_p12) target bundleno = 28 (0x1c), region = 24 }
  0x10   : > { %443 = dma.hbm_to_vmem [thread:$0]  (!%p441_p11), %s125_s25, 256, %s127_s27, [#allocation4], %s534_s28, %s534_s28, %s535_s29  }
  0x14   : > { %142 = sbr.rel (!%p588_p4) target bundleno = 28 (0x1c), region = 28  ;;  %s144_s30 = sand.u32 (%p588_p4), 1, %s527_s13  }
  0x15   : > { %s430_s4 = sshll.u32 (%p588_p4), %s531_s14, 4  ;;  %s412_s5 = sshll.u32 (%p588_p4), %s144_s30, 5 }
  0x16   : > { %s149_s8 = scalar_lea.vmem (%p588_p4), %s651_s0, %s430_s4  ;;  %s146_s9 = scalar_lea.vmem (%p588_p4), [#allocation2], %s412_s5 }
  0x17   : > { %v162_v0 = vld [vmem:[%s149_s8] sm:$0xff] (%p588_p4)  ;;  %v164_v1 = vld [vmem:[%s149_s8 + $0x8] sm:$0xff] (%p588_p4) }
  0x18   : > { %v166_v2 = vld [vmem:[%s149_s8 + $0x40] sm:$0xff] (%p588_p4)  ;;  %163 = vst [vmem:[%s146_s9] sm:$0xff] (%p588_p4), %v162_v0  ;;  %v168_v3 = vld [vmem:[%s149_s8 + $0x48] sm:$0xff] (%p588_p4) }
  0x19   : > { %165 = vst [vmem:[%s146_s9 + $0x8] sm:$0xff] %v164_v1 }
  0x1a   : > { %167 = vst [vmem:[%s146_s9 + $0x10] sm:$0xff] %v166_v2 }
  0x1b   : > { %169 = vst [vmem:[%s146_s9 + $0x18] sm:$0xff] %v168_v3 }
  0x1c PF: > { %178 = sbr.rel (%p599_p9) target bundleno = 186 (0xba), region = 51  ;;  %s181_s10 = sand.u32 (!%p599_p9), 1, %s523_s12  }
  0x1d   : > { %s416_s11 = sshll.u32 (!%p599_p9), %s181_s10, 5 }
  0x1e   : > { %s183_s14 = scalar_lea.vmem (!%p599_p9), [#allocation2], %s416_s11 }
  0x21   : > { %518 = dma.done.wait (%p444_p8), [#allocation4], 256  }
  0x22   : > { %520 = vsyncadd (%p444_p8), [#allocation4], 4294967040  ;;  %v536_v4 = vmov 0   ;;  %vm235_vm0 = vcmask 1043456   ;;  %v214_v5 = vld [vmem:[%s183_s14 + $0x10] sm:$0xf] }
  0x23   : > { %474 = vset.pattern.permute.xlu0 %v536_v4  ;;  %v215_v6 = vld [vmem:[%s183_s14 + $0x18] sm:$0xf]  ;;  %v212_v7 = vld [vmem:[%s183_s14] sm:$0xff]  ;;  %419 = vmatpush.msk.msra.mxu0 %vm235_vm0, %v214_v5  ;;  %v213_v8 = vld [vmem:[%s183_s14 + $0x8] sm:$0xff]  ;;  %vm228_vm1 = vcmask 97280   ;;  %s418_s23 = sshll.u32 %s181_s10, 4 }
  0x24   : > { %432 = vmatpush.msk.msra.mxu2 %vm235_vm0, %v214_v5  ;;  %422 = vmatpush.msk.msra.mxu1 %vm235_vm0, %v215_v6  ;;  %v210_v9 = vld [vmem:[#allocation3] sm:$0xff]  ;;  %v211_v10 = vld [vmem:[#allocation3 + $0x8] sm:$0xff]  ;;  %s207_s24 = scalar_lea.vmem [#allocation5], %s418_s23  ;;  %s431_s25 = sshll.u32 (%p592_p5), %s573_s15, 3 }
  0x25   : > { %434 = vmatpush.msk.msra.mxu3 %vm235_vm0, %v215_v6  ;;  %257 = vmatpush.msra.mxu0 %v212_v7  ;;  %v216_v11 = vld [vmem:[%s653_s2] sm:$0xff]  ;;  %v217_v12 = vld [vmem:[%s653_s2 + $0x8] sm:$0xff]  ;;  %s301_s27 = scalar_lea.vmem (%p592_p5), %s654_s3, %s431_s25 }
  0x26   : > { %433 = vmatpush.msra.mxu2 %v212_v7  ;;  %280 = vmatpush.msra.mxu1 %v213_v8 }
  0x27   : > { %435 = vmatpush.msra.mxu3 %v213_v8  ;;  %420 = vmatmul.msk.f32.vlgmr.msra.gmra.mxu0 %vm228_vm1, %v210_v9 }
  0x28   : > { %421 = vmatmul.msk.f32.vlgmr.msra.gmra.mxu2 %vm228_vm1, %v211_v10  ;;  %423 = vmatmul.msk.f32.vlgmr.msra.gmra.mxu1 %vm228_vm1, %v210_v9 }
  0x29   : > { %424 = vmatmul.msk.f32.vlgmr.msra.gmra.mxu3 %vm228_vm1, %v211_v10  ;;  %220 = vperm.xlu0 %474, %v216_v11  }
  0x31   : > { %225 = vperm.xlu0 %474, %v217_v12  }
  0x9b   : > { %v221_v13 = vpop.permute.xlu0 %220 }
  0xa3   : > { %v226_v19 = vpop.permute.xlu0 %225 }
  0xa4   : > { %v259_v14 = vpop.f32.mrf.mxu0 }
  0xa5   : > { %v260_v15 = vadd.f32 %v259_v14, %v221_v13  ;;  %v282_v16 = vpop.f32.mrf.mxu1 }
  0xa6   : > { %v283_v17 = vadd.f32 %v282_v16, %v221_v13 }
  0xa8   : > { %v288_v18 = vpack.c.bf16 %v283_v17, %v260_v15 }
  0xaa   : > { %290 = vst [vmem:[%s207_s24] sm:$0xff] %v288_v18 }
  0xab   : > { %v262_v20 = vpop.f32.mrf.mxu2 }
  0xac   : > { %v263_v21 = vadd.f32 %v262_v20, %v226_v19  ;;  %v285_v22 = vpop.f32.mrf.mxu3 }
  0xad   : > { %v286_v23 = vadd.f32 %v285_v22, %v226_v19  ;;  %298 = sbr.rel (!%p592_p5) target bundleno = 186 (0xba), region = 63 }
  0xaf   : > { %v289_v24 = vpack.c.bf16 %v286_v23, %v263_v21 }
  0xb1   : > { %291 = vst [vmem:[%s207_s24 + $0x8] sm:$0xff] %v289_v24  ;;  %v332_v25 = vld [vmem:[%s207_s24] sm:$0xff] (%p592_p5) }
  0xb2   : > { %333 = vst [vmem:[%s301_s27] sm:$0xff] %v332_v25 }
  0xb8   : > { %v334_v26 = vld [vmem:[%s207_s24 + $0x8] sm:$0xff] }
  0xb9   : > { %335 = vst [vmem:[%s301_s27 + $0x20] sm:$0xff] %v334_v26 }
  0xba PF: > { %p11_p13 = scmp.ge.s32.totalorder %s576_s16, 6   ;;  %s658_s12 = smov %s527_s13 }
  0xbb   : > { %s659_s13 = smov %s586_s19  ;;  %s660_s14 = smov %s576_s16 }
  0xbc   :  { %13 = sbr.rel (!%p11_p13) target bundleno = 2 (0x2), region = 133 }
  0xc1   :  { %351 = vsyncpa [#allocation4], 1 }
  0xc2   :  { %353 = vsyncpa [#allocation4 + $0x1], 1 }

// kernel: fno_multi2d_bayesian_forward.17
= control target key start
LH: loop header
LB: loop body
LE: loop exit
PB: predicated region body
PF: predicated region fallthrough
CT: control target
= control target key end

     0   :  { %s1365_s9 = smov 0   ;;  %s1687_s0 = inlined_call_operand.vmem [shape: f32[144,2,32], index: 0, kind: input, shape index: {}]   ;;  %s1688_s1 = inlined_call_operand.vmem [shape: f32[144,32,32], index: 1, kind: input, shape index: {}]   ;;  %s1689_s2 = inlined_call_operand.vmem [shape: f32[144,2,32], index: 2, kind: output, shape index: {}]  }
   0x1 LB: > { %s1286_s10 = sadd.s32 4294967295, %s1348_s9   ;;  %p1290_p0 = scmp.ge.s32.totalorder %s1348_s9, 1  ;;  %s1348_s9 = sphi %s1365_s9, %s12_s9  }
   0x2   : > { %p125_p1 = scmp.lt.s32.totalorder %s1348_s9, 5 }
   0x4   : > { %p126_p2 = pnand %p1290_p0, %p125_p1 }
   0x5   : > { %s153_s11 = smul.u32 (!%p126_p2), 36, %s1286_s10 }
   0x6   : > { %129 = sbr.rel (%p126_p2) target bundleno = 236 (0xec), region = 28 }
   0x7   : > { %p154_p3 = scmp.lt.s32.totalorder (!%p126_p2), %s153_s11, 143 }
   0xb   : > { %s1691_s11 = smov (!%p154_p3, %s153_s11), 143  ;;  %vm352_vm0 = vcmask 261120   ;;  %vm1181_vm1 = vcmask 254976  }
   0xc   : > { %s1333_s12 = sshll.u32 %s1691_s11, 5  ;;  %s1291_s16 = sshll.u32 %s1691_s11, 1 }
   0xd   : > { %s1379_s15 = scalar_lea.vmem %s1688_s1, %s1333_s12  ;;  %s1395_s19 = scalar_lea.vmem %s1687_s0, %s1291_s16 }
   0xe   : > { %v219_v0 = vld [vmem:[%s1379_s15 + $0x58] sm:$0xff]  ;;  %v218_v2 = vld [vmem:[%s1379_s15 + $0x50] sm:$0xff]  ;;  %v217_v4 = vld [vmem:[%s1379_s15 + $0x48] sm:$0xff]  ;;  %s1610_s22 = scalar_lea.vmem %s1689_s2, %s1291_s16 }
   0xf   : > { %v223_v1 = vld [vmem:[%s1379_s15 + $0x78] sm:$0xff]  ;;  %414 = vmatpush.msra.mxu2 %v219_v0  ;;  %v222_v3 = vld [vmem:[%s1379_s15 + $0x70] sm:$0xff]  ;;  %v221_v5 = vld [vmem:[%s1379_s15 + $0x68] sm:$0xff] }
  0x10   : > { %437 = vmatpush.msra.mxu3 %v223_v1  ;;  %v211_v6 = vld [vmem:[%s1379_s15 + $0x18] sm:$0xff]  ;;  %v216_v8 = vld [vmem:[%s1379_s15 + $0x40] sm:$0xff]  ;;  %v210_v10 = vld [vmem:[%s1379_s15 + $0x10] sm:$0xff] }
  0x11   : > { %v215_v7 = vld [vmem:[%s1379_s15 + $0x38] sm:$0xff]  ;;  %415 = vmatpush.msra.mxu2 %v218_v2  ;;  %368 = vmatpush.msra.mxu0 %v211_v6  ;;  %v220_v9 = vld [vmem:[%s1379_s15 + $0x60] sm:$0xff]  ;;  %v214_v13 = vld [vmem:[%s1379_s15 + $0x30] sm:$0xff] }
  0x12   : > { %438 = vmatpush.msra.mxu3 %v222_v3  ;;  %391 = vmatpush.msra.mxu1 %v215_v7  ;;  %v174_v11 = vld [vmem:[%s1395_s19 + $0x4] sm:$0x3]  ;;  %v175_v12 = vld [vmem:[%s1395_s19 + $0x6] sm:$0x3]  ;;  %v235_v14 = vld [vmem:[%s1379_s15 + $0xd8] sm:$0xff] }
  0x13   : > { %416 = vmatpush.msra.mxu2 %v217_v4  ;;  %v239_v15 = vld [vmem:[%s1379_s15 + $0xf8] sm:$0xff]  ;;  %369 = vmatpush.msra.mxu0 %v210_v10  ;;  %v209_v16 = vld [vmem:[%s1379_s15 + $0x8] sm:$0xff]  ;;  %v234_v18 = vld [vmem:[%s1379_s15 + $0xd0] sm:$0xff] }
  0x14   : > { %439 = vmatpush.msra.mxu3 %v221_v5  ;;  %392 = vmatpush.msra.mxu1 %v214_v13  ;;  %v213_v17 = vld [vmem:[%s1379_s15 + $0x28] sm:$0xff]  ;;  %v238_v19 = vld [vmem:[%s1379_s15 + $0xf0] sm:$0xff]  ;;  %v208_v20 = vld [vmem:[%s1379_s15] sm:$0xff] }
  0x15   : > { %417 = vmatpush.msra.mxu2 %v216_v8  ;;  %v212_v21 = vld [vmem:[%s1379_s15 + $0x20] sm:$0xff]  ;;  %370 = vmatpush.msra.mxu0 %v209_v16  ;;  %v233_v22 = vld [vmem:[%s1379_s15 + $0xc8] sm:$0xff]  ;;  %v227_v26 = vld [vmem:[%s1379_s15 + $0x98] sm:$0xff] }
  0x16   : > { %440 = vmatpush.msra.mxu3 %v220_v9  ;;  %1297 = vmatmul.msk.f32.vlgmr.msra.gmra.mxu2 %vm352_vm0, %v174_v11  ;;  %v237_v23 = vld [vmem:[%s1379_s15 + $0xe8] sm:$0xff]  ;;  %v172_v24 = vld [vmem:[%s1395_s19] sm:$0x3]  ;;  %v173_v25 = vld [vmem:[%s1395_s19 + $0x2] sm:$0x3] }
  0x17   : > { %1298 = vmatmul.msk.f32.vlgmr.msra.gmra.mxu3 %vm352_vm0, %v175_v12  ;;  %506 = vmatpush.msrb.mxu2 %v235_v14  ;;  %v231_v27 = vld [vmem:[%s1379_s15 + $0xb8] sm:$0xff]  ;;  %v232_v28 = vld [vmem:[%s1379_s15 + $0xc0] sm:$0xff]  ;;  %v226_v30 = vld [vmem:[%s1379_s15 + $0x90] sm:$0xff] }
  0x18   : > { %529 = vmatpush.msrb.mxu3 %v239_v15  ;;  %393 = vmatpush.msra.mxu1 %v213_v17  ;;  %v236_v29 = vld [vmem:[%s1379_s15 + $0xe0] sm:$0xff]  ;;  %v230_v31 = vld [vmem:[%s1379_s15 + $0xb0] sm:$0xff]  ;;  %v178_v32 = vld [vmem:[%s1395_s19 + $0xc] sm:$0x3] }
  0x19   : > { %507 = vmatpush.msrb.mxu2 %v234_v18  ;;  %371 = vmatpush.msra.mxu0 %v208_v20  ;;  %v179_v33 = vld [vmem:[%s1395_s19 + $0xe] sm:$0x3]  ;;  %v251_v34 = vld [vmem:[%s1379_s15 + $0x158] sm:$0xff]  ;;  %v250_v38 = vld [vmem:[%s1379_s15 + $0x150] sm:$0xff] }
  0x1a   : > { %530 = vmatpush.msrb.mxu3 %v238_v19  ;;  %394 = vmatpush.msra.mxu1 %v212_v21  ;;  %v255_v35 = vld [vmem:[%s1379_s15 + $0x178] sm:$0xff]  ;;  %v225_v36 = vld [vmem:[%s1379_s15 + $0x88] sm:$0xff]  ;;  %v254_v39 = vld [vmem:[%s1379_s15 + $0x170] sm:$0xff] }
  0x1b   : > { %508 = vmatpush.msrb.mxu2 %v233_v22  ;;  %1295 = vmatmul.msk.f32.vlgmr.msra.gmra.mxu0 %vm352_vm0, %v172_v24  ;;  %v229_v37 = vld [vmem:[%s1379_s15 + $0xa8] sm:$0xff]  ;;  %v224_v40 = vld [vmem:[%s1379_s15 + $0x80] sm:$0xff]  ;;  %v243_v46 = vld [vmem:[%s1379_s15 + $0x118] sm:$0xff] }
  0x1c   : > { %531 = vmatpush.msrb.mxu3 %v237_v23  ;;  %1296 = vmatmul.msk.f32.vlgmr.msra.gmra.mxu1 %vm352_vm0, %v173_v25  ;;  %v228_v41 = vld [vmem:[%s1379_s15 + $0xa0] sm:$0xff]  ;;  %v249_v42 = vld [vmem:[%s1379_s15 + $0x148] sm:$0xff]  ;;  %v247_v47 = vld [vmem:[%s1379_s15 + $0x138] sm:$0xff] }
  0x1d   : > { %460 = vmatpush.msrb.mxu0 %v227_v26  ;;  %483 = vmatpush.msrb.mxu1 %v231_v27  ;;  %v253_v43 = vld [vmem:[%s1379_s15 + $0x168] sm:$0xff]  ;;  %v248_v48 = vld [vmem:[%s1379_s15 + $0x140] sm:$0xff]  ;;  %v242_v50 = vld [vmem:[%s1379_s15 + $0x110] sm:$0xff] }
  0x1e   : > { %509 = vmatpush.msrb.mxu2 %v232_v28  ;;  %532 = vmatpush.msrb.mxu3 %v236_v29  ;;  %v176_v44 = vld [vmem:[%s1395_s19 + $0x8] sm:$0x3]  ;;  %v177_v45 = vld [vmem:[%s1395_s19 + $0xa] sm:$0x3]  ;;  %v252_v49 = vld [vmem:[%s1379_s15 + $0x160] sm:$0xff] }
  0x1f   : > { %461 = vmatpush.msrb.mxu0 %v226_v30  ;;  %484 = vmatpush.msrb.mxu1 %v230_v31  ;;  %v246_v51 = vld [vmem:[%s1379_s15 + $0x130] sm:$0xff]  ;;  %v267_v54 = vld [vmem:[%s1379_s15 + $0x1d8] sm:$0xff]  ;;  %v241_v56 = vld [vmem:[%s1379_s15 + $0x108] sm:$0xff] }
  0x20   : > { %1301 = vmatmul.msk.f32.vlgmr.msrb.gmra.mxu2 %vm352_vm0, %v178_v32  ;;  %1302 = vmatmul.msk.f32.vlgmr.msrb.gmra.mxu3 %vm352_vm0, %v179_v33  ;;  %v182_v52 = vld [vmem:[%s1395_s19 + $0x14] sm:$0x3]  ;;  %v183_v53 = vld [vmem:[%s1395_s19 + $0x16] sm:$0x3]  ;;  %v271_v55 = vld [vmem:[%s1379_s15 + $0x1f8] sm:$0xff] }
  0x21   : > { %598 = vmatpush.msra.mxu2 %v251_v34  ;;  %621 = vmatpush.msra.mxu3 %v255_v35  ;;  %v245_v57 = vld [vmem:[%s1379_s15 + $0x128] sm:$0xff]  ;;  %v266_v58 = vld [vmem:[%s1379_s15 + $0x1d0] sm:$0xff]  ;;  %v240_v60 = vld [vmem:[%s1379_s15 + $0x100] sm:$0xff] }
  0x22   : > { %462 = vmatpush.msrb.mxu0 %v225_v36  ;;  %485 = vmatpush.msrb.mxu1 %v229_v37  ;;  %v270_v59 = vld [vmem:[%s1379_s15 + $0x1f0] sm:$0xff]  ;;  %v244_v61 = vld [vmem:[%s1379_s15 + $0x120] sm:$0xff]  ;;  %v265_v62 = vld [vmem:[%s1379_s15 + $0x1c8] sm:$0xff] }
  0x23   : > { %599 = vmatpush.msra.mxu2 %v250_v38  ;;  %622 = vmatpush.msra.mxu3 %v254_v39  ;;  %v269_v63 = vld [vmem:[%s1379_s15 + $0x1e8] sm:$0xff]  ;;  %v180_v0 = vld [vmem:[%s1395_s19 + $0x10] sm:$0x3]  ;;  %v181_v1 = vld [vmem:[%s1395_s19 + $0x12] sm:$0x3] }
  0x24   : > { %463 = vmatpush.msrb.mxu0 %v224_v40  ;;  %486 = vmatpush.msrb.mxu1 %v228_v41  ;;  %v259_v2 = vld [vmem:[%s1379_s15 + $0x198] sm:$0xff]  ;;  %v264_v4 = vld [vmem:[%s1379_s15 + $0x1c0] sm:$0xff]  ;;  %v258_v6 = vld [vmem:[%s1379_s15 + $0x190] sm:$0xff] }
  0x25   : > { %600 = vmatpush.msra.mxu2 %v249_v42  ;;  %623 = vmatpush.msra.mxu3 %v253_v43  ;;  %v263_v3 = vld [vmem:[%s1379_s15 + $0x1b8] sm:$0xff]  ;;  %v268_v5 = vld [vmem:[%s1379_s15 + $0x1e0] sm:$0xff]  ;;  %v262_v7 = vld [vmem:[%s1379_s15 + $0x1b0] sm:$0xff] }
  0x26   : > { %1299 = vmatmul.msk.f32.vlgmr.msrb.gmra.mxu0 %vm352_vm0, %v176_v44  ;;  %1300 = vmatmul.msk.f32.vlgmr.msrb.gmra.mxu1 %vm352_vm0, %v177_v45  ;;  %v186_v8 = vld [vmem:[%s1395_s19 + $0x1c] sm:$0x3]  ;;  %v187_v9 = vld [vmem:[%s1395_s19 + $0x1e] sm:$0x3]  ;;  %v257_v12 = vld [vmem:[%s1379_s15 + $0x188] sm:$0xff] }
  0x27   : > { %552 = vmatpush.msra.mxu0 %v243_v46  ;;  %575 = vmatpush.msra.mxu1 %v247_v47  ;;  %v283_v10 = vld [vmem:[%s1379_s15 + $0x258] sm:$0xff]  ;;  %v261_v13 = vld [vmem:[%s1379_s15 + $0x1a8] sm:$0xff]  ;;  %v282_v14 = vld [vmem:[%s1379_s15 + $0x250] sm:$0xff] }
  0x28   : > { %601 = vmatpush.msra.mxu2 %v248_v48  ;;  %624 = vmatpush.msra.mxu3 %v252_v49  ;;  %v287_v11 = vld [vmem:[%s1379_s15 + $0x278] sm:$0xff]  ;;  %v286_v15 = vld [vmem:[%s1379_s15 + $0x270] sm:$0xff]  ;;  %v256_v16 = vld [vmem:[%s1379_s15 + $0x180] sm:$0xff] }
  0x29   : > { %553 = vmatpush.msra.mxu0 %v242_v50  ;;  %576 = vmatpush.msra.mxu1 %v246_v51  ;;  %v260_v17 = vld [vmem:[%s1379_s15 + $0x1a0] sm:$0xff]  ;;  %v281_v18 = vld [vmem:[%s1379_s15 + $0x248] sm:$0xff]  ;;  %v184_v20 = vld [vmem:[%s1395_s19 + $0x18] sm:$0x3] }
  0x2a   : > { %1305 = vmatmul.msk.f32.vlgmr.msra.gmra.mxu2 %vm352_vm0, %v182_v52  ;;  %1306 = vmatmul.msk.f32.vlgmr.msra.gmra.mxu3 %vm352_vm0, %v183_v53  ;;  %v285_v19 = vld [vmem:[%s1379_s15 + $0x268] sm:$0xff]  ;;  %v185_v21 = vld [vmem:[%s1395_s19 + $0x1a] sm:$0x3]  ;;  %v280_v24 = vld [vmem:[%s1379_s15 + $0x240] sm:$0xff] }
  0x2b   : > { %690 = vmatpush.msrb.mxu2 %v267_v54  ;;  %713 = vmatpush.msrb.mxu3 %v271_v55  ;;  %v275_v22 = vld [vmem:[%s1379_s15 + $0x218] sm:$0xff]  ;;  %v284_v25 = vld [vmem:[%s1379_s15 + $0x260] sm:$0xff]  ;;  %v274_v26 = vld [vmem:[%s1379_s15 + $0x210] sm:$0xff] }
  0x2c   : > { %554 = vmatpush.msra.mxu0 %v241_v56  ;;  %577 = vmatpush.msra.mxu1 %v245_v57  ;;  %v279_v23 = vld [vmem:[%s1379_s15 + $0x238] sm:$0xff]  ;;  %v278_v27 = vld [vmem:[%s1379_s15 + $0x230] sm:$0xff]  ;;  %v190_v28 = vld [vmem:[%s1395_s19 + $0x24] sm:$0x3] }
  0x2d   : > { %691 = vmatpush.msrb.mxu2 %v266_v58  ;;  %714 = vmatpush.msrb.mxu3 %v270_v59  ;;  %v191_v29 = vld [vmem:[%s1395_s19 + $0x26] sm:$0x3]  ;;  %v299_v30 = vld [vmem:[%s1379_s15 + $0x2d8] sm:$0xff]  ;;  %v273_v32 = vld [vmem:[%s1379_s15 + $0x208] sm:$0xff] }
  0x2e   : > { %555 = vmatpush.msra.mxu0 %v240_v60  ;;  %578 = vmatpush.msra.mxu1 %v244_v61  ;;  %v303_v31 = vld [vmem:[%s1379_s15 + $0x2f8] sm:$0xff]  ;;  %v277_v33 = vld [vmem:[%s1379_s15 + $0x228] sm:$0xff]  ;;  %v298_v34 = vld [vmem:[%s1379_s15 + $0x2d0] sm:$0xff] }
  0x2f   : > { %692 = vmatpush.msrb.mxu2 %v265_v62  ;;  %715 = vmatpush.msrb.mxu3 %v269_v63  ;;  %v302_v35 = vld [vmem:[%s1379_s15 + $0x2f0] sm:$0xff]  ;;  %v272_v36 = vld [vmem:[%s1379_s15 + $0x200] sm:$0xff]  ;;  %v297_v38 = vld [vmem:[%s1379_s15 + $0x2c8] sm:$0xff] }
  0x30   : > { %1303 = vmatmul.msk.f32.vlgmr.msra.gmra.mxu0 %vm352_vm0, %v180_v0  ;;  %1304 = vmatmul.msk.f32.vlgmr.msra.gmra.mxu1 %vm352_vm0, %v181_v1  ;;  %v276_v37 = vld [vmem:[%s1379_s15 + $0x220] sm:$0xff]  ;;  %v301_v39 = vld [vmem:[%s1379_s15 + $0x2e8] sm:$0xff]  ;;  %v291_v42 = vld [vmem:[%s1379_s15 + $0x298] sm:$0xff] }
  0x31   : > { %644 = vmatpush.msrb.mxu0 %v259_v2  ;;  %667 = vmatpush.msrb.mxu1 %v263_v3  ;;  %v188_v40 = vld [vmem:[%s1395_s19 + $0x20] sm:$0x3]  ;;  %v189_v41 = vld [vmem:[%s1395_s19 + $0x22] sm:$0x3]  ;;  %v295_v43 = vld [vmem:[%s1379_s15 + $0x2b8] sm:$0xff] }
  0x32   : > { %693 = vmatpush.msrb.mxu2 %v264_v4  ;;  %716 = vmatpush.msrb.mxu3 %v268_v5  ;;  %v296_v44 = vld [vmem:[%s1379_s15 + $0x2c0] sm:$0xff]  ;;  %v290_v46 = vld [vmem:[%s1379_s15 + $0x290] sm:$0xff]  ;;  %v194_v48 = vld [vmem:[%s1395_s19 + $0x2c] sm:$0x3] }
  0x33   : > { %645 = vmatpush.msrb.mxu0 %v258_v6  ;;  %668 = vmatpush.msrb.mxu1 %v262_v7  ;;  %v300_v45 = vld [vmem:[%s1379_s15 + $0x2e0] sm:$0xff]  ;;  %v294_v47 = vld [vmem:[%s1379_s15 + $0x2b0] sm:$0xff]  ;;  %v195_v49 = vld [vmem:[%s1395_s19 + $0x2e] sm:$0x3] }
  0x34   : > { %1309 = vmatmul.msk.f32.vlgmr.msrb.gmra.mxu2 %vm352_vm0, %v186_v8  ;;  %1310 = vmatmul.msk.f32.vlgmr.msrb.gmra.mxu3 %vm352_vm0, %v187_v9  ;;  %v315_v50 = vld [vmem:[%s1379_s15 + $0x358] sm:$0xff]  ;;  %v289_v52 = vld [vmem:[%s1379_s15 + $0x288] sm:$0xff]  ;;  %v314_v54 = vld [vmem:[%s1379_s15 + $0x350] sm:$0xff] }
  0x35   : > { %782 = vmatpush.msra.mxu2 %v283_v10  ;;  %805 = vmatpush.msra.mxu3 %v287_v11  ;;  %v319_v51 = vld [vmem:[%s1379_s15 + $0x378] sm:$0xff]  ;;  %v293_v53 = vld [vmem:[%s1379_s15 + $0x2a8] sm:$0xff]  ;;  %v318_v55 = vld [vmem:[%s1379_s15 + $0x370] sm:$0xff] }
  0x36   : > { %646 = vmatpush.msrb.mxu0 %v257_v12  ;;  %669 = vmatpush.msrb.mxu1 %v261_v13  ;;  %v288_v56 = vld [vmem:[%s1379_s15 + $0x280] sm:$0xff]  ;;  %v313_v58 = vld [vmem:[%s1379_s15 + $0x348] sm:$0xff]  ;;  %v307_v62 = vld [vmem:[%s1379_s15 + $0x318] sm:$0xff] }
  0x37   : > { %783 = vmatpush.msra.mxu2 %v282_v14  ;;  %806 = vmatpush.msra.mxu3 %v286_v15  ;;  %v292_v57 = vld [vmem:[%s1379_s15 + $0x2a0] sm:$0xff]  ;;  %v317_v59 = vld [vmem:[%s1379_s15 + $0x368] sm:$0xff]  ;;  %v311_v63 = vld [vmem:[%s1379_s15 + $0x338] sm:$0xff] }
  0x38   : > { %647 = vmatpush.msrb.mxu0 %v256_v16  ;;  %670 = vmatpush.msrb.mxu1 %v260_v17  ;;  %v192_v60 = vld [vmem:[%s1395_s19 + $0x28] sm:$0x3]  ;;  %v193_v61 = vld [vmem:[%s1395_s19 + $0x2a] sm:$0x3]  ;;  %v312_v0 = vld [vmem:[%s1379_s15 + $0x340] sm:$0xff] }
  0x39   : > { %784 = vmatpush.msra.mxu2 %v281_v18  ;;  %807 = vmatpush.msra.mxu3 %v285_v19  ;;  %v316_v1 = vld [vmem:[%s1379_s15 + $0x360] sm:$0xff]  ;;  %v306_v2 = vld [vmem:[%s1379_s15 + $0x310] sm:$0xff]  ;;  %v331_v6 = vld [vmem:[%s1379_s15 + $0x3d8] sm:$0xff] }
  0x3a   : > { %1307 = vmatmul.msk.f32.vlgmr.msrb.gmra.mxu0 %vm352_vm0, %v184_v20  ;;  %1308 = vmatmul.msk.f32.vlgmr.msrb.gmra.mxu1 %vm352_vm0, %v185_v21  ;;  %v310_v3 = vld [vmem:[%s1379_s15 + $0x330] sm:$0xff]  ;;  %v335_v7 = vld [vmem:[%s1379_s15 + $0x3f8] sm:$0xff]  ;;  %v305_v8 = vld [vmem:[%s1379_s15 + $0x308] sm:$0xff] }
  0x3b   : > { %736 = vmatpush.msra.mxu0 %v275_v22  ;;  %759 = vmatpush.msra.mxu1 %v279_v23  ;;  %v198_v4 = vld [vmem:[%s1395_s19 + $0x34] sm:$0x3]  ;;  %v199_v5 = vld [vmem:[%s1395_s19 + $0x36] sm:$0x3]  ;;  %v309_v9 = vld [vmem:[%s1379_s15 + $0x328] sm:$0xff] }
  0x3c   : > { %785 = vmatpush.msra.mxu2 %v280_v24  ;;  %808 = vmatpush.msra.mxu3 %v284_v25  ;;  %v330_v10 = vld [vmem:[%s1379_s15 + $0x3d0] sm:$0xff]  ;;  %v304_v12 = vld [vmem:[%s1379_s15 + $0x300] sm:$0xff]  ;;  %v329_v14 = vld [vmem:[%s1379_s15 + $0x3c8] sm:$0xff] }
  0x3d   : > { %737 = vmatpush.msra.mxu0 %v274_v26  ;;  %760 = vmatpush.msra.mxu1 %v278_v27  ;;  %v334_v11 = vld [vmem:[%s1379_s15 + $0x3f0] sm:$0xff]  ;;  %v308_v13 = vld [vmem:[%s1379_s15 + $0x320] sm:$0xff]  ;;  %v333_v15 = vld [vmem:[%s1379_s15 + $0x3e8] sm:$0xff] }
  0x3e   : > { %1313 = vmatmul.msk.f32.vlgmr.msra.gmra.mxu2 %vm352_vm0, %v190_v28  ;;  %1314 = vmatmul.msk.f32.vlgmr.msra.gmra.mxu3 %vm352_vm0, %v191_v29  ;;  %v196_v16 = vld [vmem:[%s1395_s19 + $0x30] sm:$0x3]  ;;  %v197_v17 = vld [vmem:[%s1395_s19 + $0x32] sm:$0x3]  ;;  %v323_v18 = vld [vmem:[%s1379_s15 + $0x398] sm:$0xff] }
  0x3f   : > { %874 = vmatpush.msrb.mxu2 %v299_v30  ;;  %897 = vmatpush.msrb.mxu3 %v303_v31  ;;  %v327_v19 = vld [vmem:[%s1379_s15 + $0x3b8] sm:$0xff]  ;;  %v328_v20 = vld [vmem:[%s1379_s15 + $0x3c0] sm:$0xff]  ;;  %v322_v22 = vld [vmem:[%s1379_s15 + $0x390] sm:$0xff] }
  0x40   : > { %738 = vmatpush.msra.mxu0 %v273_v32  ;;  %761 = vmatpush.msra.mxu1 %v277_v33  ;;  %v332_v21 = vld [vmem:[%s1379_s15 + $0x3e0] sm:$0xff]  ;;  %v326_v23 = vld [vmem:[%s1379_s15 + $0x3b0] sm:$0xff]  ;;  %v202_v24 = vld [vmem:[%s1395_s19 + $0x3c] sm:$0x3] }
  0x41   : > { %875 = vmatpush.msrb.mxu2 %v298_v34  ;;  %898 = vmatpush.msrb.mxu3 %v302_v35  ;;  %v203_v25 = vld [vmem:[%s1395_s19 + $0x3e] sm:$0x3]  ;;  %v321_v28 = vld [vmem:[%s1379_s15 + $0x388] sm:$0xff]  ;;  %v346_v30 = vld [vmem:[%s1379_s15 + $0x450] sm:$0xff] }
  0x42   : > { %739 = vmatpush.msra.mxu0 %v272_v36  ;;  %762 = vmatpush.msra.mxu1 %v276_v37  ;;  %v347_v26 = vld [vmem:[%s1379_s15 + $0x458] sm:$0xff]  ;;  %v325_v29 = vld [vmem:[%s1379_s15 + $0x3a8] sm:$0xff]  ;;  %v350_v31 = vld [vmem:[%s1379_s15 + $0x470] sm:$0xff] }
  0x43   : > { %876 = vmatpush.msrb.mxu2 %v297_v38  ;;  %899 = vmatpush.msrb.mxu3 %v301_v39  ;;  %v351_v27 = vld [vmem:[%s1379_s15 + $0x478] sm:$0xff]  ;;  %v320_v32 = vld [vmem:[%s1379_s15 + $0x380] sm:$0xff]  ;;  %v345_v34 = vld [vmem:[%s1379_s15 + $0x448] sm:$0xff] }
  0x44   : > { %1311 = vmatmul.msk.f32.vlgmr.msra.gmra.mxu0 %vm352_vm0, %v188_v40  ;;  %1312 = vmatmul.msk.f32.vlgmr.msra.gmra.mxu1 %vm352_vm0, %v189_v41  ;;  %v324_v33 = vld [vmem:[%s1379_s15 + $0x3a0] sm:$0xff]  ;;  %v349_v35 = vld [vmem:[%s1379_s15 + $0x468] sm:$0xff]  ;;  %v200_v36 = vld [vmem:[%s1395_s19 + $0x38] sm:$0x3] }
  0x45   : > { %828 = vmatpush.msrb.mxu0 %v291_v42  ;;  %851 = vmatpush.msrb.mxu1 %v295_v43  ;;  %v201_v37 = vld [vmem:[%s1395_s19 + $0x3a] sm:$0x3]  ;;  %v344_v40 = vld [vmem:[%s1379_s15 + $0x440] sm:$0xff]  ;;  %v338_v42 = vld [vmem:[%s1379_s15 + $0x410] sm:$0xff] }
  0x46   : > { %877 = vmatpush.msrb.mxu2 %v296_v44  ;;  %900 = vmatpush.msrb.mxu3 %v300_v45  ;;  %v339_v38 = vld [vmem:[%s1379_s15 + $0x418] sm:$0xff]  ;;  %v348_v41 = vld [vmem:[%s1379_s15 + $0x460] sm:$0xff]  ;;  %v342_v43 = vld [vmem:[%s1379_s15 + $0x430] sm:$0xff] }
  0x47   : > { %829 = vmatpush.msrb.mxu0 %v290_v46  ;;  %852 = vmatpush.msrb.mxu1 %v294_v47  ;;  %v343_v39 = vld [vmem:[%s1379_s15 + $0x438] sm:$0xff]  ;;  %v206_v44 = vld [vmem:[%s1395_s19 + $0x44] sm:$0x3]  ;;  %v207_v45 = vld [vmem:[%s1395_s19 + $0x46] sm:$0x3] }
  0x48   : > { %1317 = vmatmul.msk.f32.vlgmr.msrb.gmra.mxu2 %vm352_vm0, %v194_v48  ;;  %1318 = vmatmul.msk.f32.vlgmr.msrb.gmra.mxu3 %vm352_vm0, %v195_v49  ;;  %v337_v46 = vld [vmem:[%s1379_s15 + $0x408] sm:$0xff]  ;;  %v336_v48 = vld [vmem:[%s1379_s15 + $0x400] sm:$0xff] }
  0x49   : > { %966 = vmatpush.msra.mxu2 %v315_v50  ;;  %989 = vmatpush.msra.mxu3 %v319_v51  ;;  %v341_v47 = vld [vmem:[%s1379_s15 + $0x428] sm:$0xff]  ;;  %v340_v49 = vld [vmem:[%s1379_s15 + $0x420] sm:$0xff] }
  0x4a   : > { %830 = vmatpush.msrb.mxu0 %v289_v52  ;;  %853 = vmatpush.msrb.mxu1 %v293_v53  ;;  %v204_v50 = vld [vmem:[%s1395_s19 + $0x40] sm:$0x3]  ;;  %v205_v51 = vld [vmem:[%s1395_s19 + $0x42] sm:$0x3] }
  0x4b   : > { %967 = vmatpush.msra.mxu2 %v314_v54  ;;  %990 = vmatpush.msra.mxu3 %v318_v55 }
  0x4c   : > { %831 = vmatpush.msrb.mxu0 %v288_v56  ;;  %854 = vmatpush.msrb.mxu1 %v292_v57 }
  0x4d   : > { %968 = vmatpush.msra.mxu2 %v313_v58  ;;  %991 = vmatpush.msra.mxu3 %v317_v59 }
  0x4e   : > { %1315 = vmatmul.msk.f32.vlgmr.msrb.gmra.mxu0 %vm352_vm0, %v192_v60  ;;  %1316 = vmatmul.msk.f32.vlgmr.msrb.gmra.mxu1 %vm352_vm0, %v193_v61 }
  0x4f   : > { %920 = vmatpush.msra.mxu0 %v307_v62  ;;  %943 = vmatpush.msra.mxu1 %v311_v63 }
  0x50   : > { %969 = vmatpush.msra.mxu2 %v312_v0  ;;  %992 = vmatpush.msra.mxu3 %v316_v1 }
  0x51   : > { %921 = vmatpush.msra.mxu0 %v306_v2  ;;  %944 = vmatpush.msra.mxu1 %v310_v3 }
  0x52   : > { %1321 = vmatmul.msk.f32.vlgmr.msra.gmra.mxu2 %vm352_vm0, %v198_v4  ;;  %1322 = vmatmul.msk.f32.vlgmr.msra.gmra.mxu3 %vm352_vm0, %v199_v5 }
  0x53   : > { %1058 = vmatpush.msrb.mxu2 %v331_v6  ;;  %1081 = vmatpush.msrb.mxu3 %v335_v7 }
  0x54   : > { %922 = vmatpush.msra.mxu0 %v305_v8  ;;  %945 = vmatpush.msra.mxu1 %v309_v9 }
  0x55   : > { %1059 = vmatpush.msrb.mxu2 %v330_v10  ;;  %1082 = vmatpush.msrb.mxu3 %v334_v11 }
  0x56   : > { %923 = vmatpush.msra.mxu0 %v304_v12  ;;  %946 = vmatpush.msra.mxu1 %v308_v13 }
  0x57   : > { %1060 = vmatpush.msrb.mxu2 %v329_v14  ;;  %1083 = vmatpush.msrb.mxu3 %v333_v15 }
  0x58   : > { %1319 = vmatmul.msk.f32.vlgmr.msra.gmra.mxu0 %vm352_vm0, %v196_v16  ;;  %1320 = vmatmul.msk.f32.vlgmr.msra.gmra.mxu1 %vm352_vm0, %v197_v17 }
  0x59   : > { %1012 = vmatpush.msrb.mxu0 %v323_v18  ;;  %1035 = vmatpush.msrb.mxu1 %v327_v19 }
  0x5a   : > { %1061 = vmatpush.msrb.mxu2 %v328_v20  ;;  %1084 = vmatpush.msrb.mxu3 %v332_v21 }
  0x5b   : > { %1013 = vmatpush.msrb.mxu0 %v322_v22  ;;  %1036 = vmatpush.msrb.mxu1 %v326_v23 }
  0x5c   : > { %1325 = vmatmul.msk.f32.vlgmr.msrb.gmra.mxu2 %vm352_vm0, %v202_v24  ;;  %1326 = vmatmul.msk.f32.vlgmr.msrb.gmra.mxu3 %vm352_vm0, %v203_v25 }
  0x5d   : > { %1150 = vmatpush.msra.mxu2 %v347_v26  ;;  %1173 = vmatpush.msra.mxu3 %v351_v27 }
  0x5e   : > { %1014 = vmatpush.msrb.mxu0 %v321_v28  ;;  %1037 = vmatpush.msrb.mxu1 %v325_v29 }
  0x5f   : > { %1151 = vmatpush.msra.mxu2 %v346_v30  ;;  %1174 = vmatpush.msra.mxu3 %v350_v31 }
  0x60   : > { %1015 = vmatpush.msrb.mxu0 %v320_v32  ;;  %1038 = vmatpush.msrb.mxu1 %v324_v33 }
  0x61   : > { %1152 = vmatpush.msra.mxu2 %v345_v34  ;;  %1175 = vmatpush.msra.mxu3 %v349_v35 }
  0x62   : > { %1323 = vmatmul.msk.f32.vlgmr.msrb.gmra.mxu0 %vm352_vm0, %v200_v36  ;;  %1324 = vmatmul.msk.f32.vlgmr.msrb.gmra.mxu1 %vm352_vm0, %v201_v37 }
  0x63   : > { %1104 = vmatpush.msra.mxu0 %v339_v38  ;;  %1127 = vmatpush.msra.mxu1 %v343_v39 }
  0x64   : > { %1153 = vmatpush.msra.mxu2 %v344_v40  ;;  %1176 = vmatpush.msra.mxu3 %v348_v41 }
  0x65   : > { %1105 = vmatpush.msra.mxu0 %v338_v42  ;;  %1128 = vmatpush.msra.mxu1 %v342_v43 }
  0x66   : > { %1329 = vmatmul.msk.f32.vlgmr.msra.gmra.mxu2 %vm352_vm0, %v206_v44  ;;  %1330 = vmatmul.msk.f32.vlgmr.msra.gmra.mxu3 %vm352_vm0, %v207_v45 }
  0x67   : > { %1106 = vmatpush.msra.mxu0 %v337_v46  ;;  %1129 = vmatpush.msra.mxu1 %v341_v47 }
  0x69   : > { %1107 = vmatpush.msra.mxu0 %v336_v48  ;;  %1130 = vmatpush.msra.mxu1 %v340_v49 }
  0x6a   : > { %1327 = vmatmul.msk.f32.vlgmr.msra.gmra.mxu0 %vm352_vm0, %v204_v50  ;;  %1328 = vmatmul.msk.f32.vlgmr.msra.gmra.mxu1 %vm352_vm0, %v205_v51 }
  0x98   : > { %v373_v52 = vpop.f32.mrf.mxu0 }
  0x99   : > { %v396_v53 = vpop.f32.mrf.mxu1  ;;  %1182 = vst.msk [vmem:[%s1610_s22] sm:$0x3] %vm1181_vm1, %v373_v52  ;;  %v419_v54 = vpop.f32.mrf.mxu2 }
  0x9a   : > { %v442_v55 = vpop.f32.mrf.mxu3  ;;  %1183 = vst.msk [vmem:[%s1610_s22 + $0x2] sm:$0x3] %vm1181_vm1, %v396_v53 }
  0x9b   : > { %1184 = vst.msk [vmem:[%s1610_s22 + $0x4] sm:$0x3] %vm1181_vm1, %v419_v54 }
  0x9c   : > { %1185 = vst.msk [vmem:[%s1610_s22 + $0x6] sm:$0x3] %vm1181_vm1, %v442_v55 }
  0xa3   : > { %v465_v56 = vpop.f32.mrf.mxu0  ;;  %v488_v57 = vpop.f32.mrf.mxu1 }
  0xa4   : > { %1186 = vst.msk [vmem:[%s1610_s22 + $0x8] sm:$0x3] %vm1181_vm1, %v465_v56  ;;  %v511_v58 = vpop.f32.mrf.mxu2  ;;  %v534_v59 = vpop.f32.mrf.mxu3 }
  0xa5   : > { %1187 = vst.msk [vmem:[%s1610_s22 + $0xa] sm:$0x3] %vm1181_vm1, %v488_v57 }
  0xa6   : > { %1188 = vst.msk [vmem:[%s1610_s22 + $0xc] sm:$0x3] %vm1181_vm1, %v511_v58 }
  0xa7   : > { %1189 = vst.msk [vmem:[%s1610_s22 + $0xe] sm:$0x3] %vm1181_vm1, %v534_v59 }
  0xad   : > { %v557_v60 = vpop.f32.mrf.mxu0  ;;  %v580_v61 = vpop.f32.mrf.mxu1 }
  0xae   : > { %1190 = vst.msk [vmem:[%s1610_s22 + $0x10] sm:$0x3] %vm1181_vm1, %v557_v60  ;;  %v603_v62 = vpop.f32.mrf.mxu2  ;;  %v626_v63 = vpop.f32.mrf.mxu3 }
  0xaf   : > { %1191 = vst.msk [vmem:[%s1610_s22 + $0x12] sm:$0x3] %vm1181_vm1, %v580_v61 }
  0xb0   : > { %1192 = vst.msk [vmem:[%s1610_s22 + $0x14] sm:$0x3] %vm1181_vm1, %v603_v62 }
  0xb1   : > { %1193 = vst.msk [vmem:[%s1610_s22 + $0x16] sm:$0x3] %vm1181_vm1, %v626_v63 }
  0xb7   : > { %v649_v0 = vpop.f32.mrf.mxu0  ;;  %v672_v1 = vpop.f32.mrf.mxu1 }
  0xb8   : > { %1194 = vst.msk [vmem:[%s1610_s22 + $0x18] sm:$0x3] %vm1181_vm1, %v649_v0  ;;  %v695_v2 = vpop.f32.mrf.mxu2  ;;  %v718_v3 = vpop.f32.mrf.mxu3 }
  0xb9   : > { %1195 = vst.msk [vmem:[%s1610_s22 + $0x1a] sm:$0x3] %vm1181_vm1, %v672_v1 }
  0xba   : > { %1196 = vst.msk [vmem:[%s1610_s22 + $0x1c] sm:$0x3] %vm1181_vm1, %v695_v2 }
  0xbb   : > { %1197 = vst.msk [vmem:[%s1610_s22 + $0x1e] sm:$0x3] %vm1181_vm1, %v718_v3 }
  0xc1   : > { %v741_v4 = vpop.f32.mrf.mxu0  ;;  %v764_v5 = vpop.f32.mrf.mxu1 }
  0xc2   : > { %1198 = vst.msk [vmem:[%s1610_s22 + $0x20] sm:$0x3] %vm1181_vm1, %v741_v4  ;;  %v787_v6 = vpop.f32.mrf.mxu2  ;;  %v810_v7 = vpop.f32.mrf.mxu3 }
  0xc3   : > { %1199 = vst.msk [vmem:[%s1610_s22 + $0x22] sm:$0x3] %vm1181_vm1, %v764_v5 }
  0xc4   : > { %1200 = vst.msk [vmem:[%s1610_s22 + $0x24] sm:$0x3] %vm1181_vm1, %v787_v6 }
  0xc5   : > { %1201 = vst.msk [vmem:[%s1610_s22 + $0x26] sm:$0x3] %vm1181_vm1, %v810_v7 }
  0xcb   : > { %v833_v8 = vpop.f32.mrf.mxu0  ;;  %v856_v9 = vpop.f32.mrf.mxu1 }
  0xcc   : > { %1202 = vst.msk [vmem:[%s1610_s22 + $0x28] sm:$0x3] %vm1181_vm1, %v833_v8  ;;  %v879_v10 = vpop.f32.mrf.mxu2  ;;  %v902_v11 = vpop.f32.mrf.mxu3 }
  0xcd   : > { %1203 = vst.msk [vmem:[%s1610_s22 + $0x2a] sm:$0x3] %vm1181_vm1, %v856_v9 }
  0xce   : > { %1204 = vst.msk [vmem:[%s1610_s22 + $0x2c] sm:$0x3] %vm1181_vm1, %v879_v10 }
  0xcf   : > { %1205 = vst.msk [vmem:[%s1610_s22 + $0x2e] sm:$0x3] %vm1181_vm1, %v902_v11 }
  0xd5   : > { %v925_v12 = vpop.f32.mrf.mxu0  ;;  %v948_v13 = vpop.f32.mrf.mxu1 }
  0xd6   : > { %1206 = vst.msk [vmem:[%s1610_s22 + $0x30] sm:$0x3] %vm1181_vm1, %v925_v12  ;;  %v971_v14 = vpop.f32.mrf.mxu2  ;;  %v994_v15 = vpop.f32.mrf.mxu3 }
  0xd7   : > { %1207 = vst.msk [vmem:[%s1610_s22 + $0x32] sm:$0x3] %vm1181_vm1, %v948_v13 }
  0xd8   : > { %1208 = vst.msk [vmem:[%s1610_s22 + $0x34] sm:$0x3] %vm1181_vm1, %v971_v14 }
  0xd9   : > { %1209 = vst.msk [vmem:[%s1610_s22 + $0x36] sm:$0x3] %vm1181_vm1, %v994_v15 }
  0xdf   : > { %v1017_v16 = vpop.f32.mrf.mxu0  ;;  %v1040_v17 = vpop.f32.mrf.mxu1 }
  0xe0   : > { %1210 = vst.msk [vmem:[%s1610_s22 + $0x38] sm:$0x3] %vm1181_vm1, %v1017_v16  ;;  %v1063_v18 = vpop.f32.mrf.mxu2  ;;  %v1086_v19 = vpop.f32.mrf.mxu3 }
  0xe1   : > { %1211 = vst.msk [vmem:[%s1610_s22 + $0x3a] sm:$0x3] %vm1181_vm1, %v1040_v17 }
  0xe2   : > { %1212 = vst.msk [vmem:[%s1610_s22 + $0x3c] sm:$0x3] %vm1181_vm1, %v1063_v18 }
  0xe3   : > { %1213 = vst.msk [vmem:[%s1610_s22 + $0x3e] sm:$0x3] %vm1181_vm1, %v1086_v19 }
  0xe7   : > { %v1109_v20 = vpop.f32.mrf.mxu0  ;;  %v1132_v21 = vpop.f32.mrf.mxu1 }
  0xe8   : > { %1214 = vst.msk [vmem:[%s1610_s22 + $0x40] sm:$0x3] %vm1181_vm1, %v1109_v20 }
  0xe9   : > { %1215 = vst.msk [vmem:[%s1610_s22 + $0x42] sm:$0x3] %vm1181_vm1, %v1132_v21  ;;  %v1155_v22 = vpop.f32.mrf.mxu2  ;;  %v1178_v23 = vpop.f32.mrf.mxu3 }
  0xea   : > { %1216 = vst.msk [vmem:[%s1610_s22 + $0x44] sm:$0x3] %vm1181_vm1, %v1155_v22 }
  0xeb   : > { %1217 = vst.msk [vmem:[%s1610_s22 + $0x46] sm:$0x3] %vm1181_vm1, %v1178_v23 }
  0xec PF: > { %s12_s9 = sadd.s32 1, %s1348_s9  }
  0xed   : > { %p9_p4 = scmp.ge.s32.totalorder %s12_s9, 6  }
  0xef   :  { %11 = sbr.rel (!%p9_p4) target bundleno = 1 (0x1), region = 61 }

// kernel: fno_multi2d_bayesian_forward.18
= control target key start
LH: loop header
LB: loop body
LE: loop exit
PB: predicated region body
PF: predicated region fallthrough
CT: control target
= control target key end

     0   :  { %s1161_s27 = smov 0   ;;  %s1163_s28 = smov 0   ;;  %s1357_s0 = inlined_call_operand.vmem [shape: bf16[16,1024], index: 0, kind: input, shape index: {}]   ;;  %s1358_s1 = inlined_call_operand.vmem [shape: bf16[16,1024], index: 1, kind: input, shape index: {}]   ;;  %s1359_s2 = inlined_call_operand.vmem [shape: f32[2,1024], index: 2, kind: input, shape index: {}]   ;;  %s1360_s3 = inlined_call_operand.vmem [shape: f32[16,16], index: 3, kind: input, shape index: {}]   ;;  %s1361_s4 = inlined_call_operand.vmem [shape: f32[16,1], index: 4, kind: input, shape index: {}]   ;;  %s1362_s5 = inlined_call_operand.vmem [shape: f32[16,32], index: 5, kind: input, shape index: {}]   ;;  %s1363_s6 = inlined_call_operand.vmem [shape: f32[16,1], index: 6, kind: input, shape index: {}]   ;;  %s1364_s7 = inlined_call_operand.vmem [shape: f32[16,2], index: 7, kind: input, shape index: {}]   ;;  %s1365_s8 = inlined_call_operand.vmem [shape: bf16[16,1024], index: 8, kind: output, shape index: {}]  }
   0x1   :  { %s1165_s29 = smov 0  }
   0x2 LB: > { %s1177_s30 = sadd.s32 4294967295, %s1110_s29   ;;  %s1180_s9 = sadd.s32 1, %s1110_s29   ;;  %s1110_s29 = sphi %s1165_s29, %s1370_s29   ;;  %s1106_s28 = sphi %s1163_s28, %s1369_s28   ;;  %s1102_s27 = sphi %s1161_s27, %s1368_s27  }
   0x3   : > { %s22_s10 = ssub.s32 %s1110_s29, %s1180_s9  ;;  %s25_s11 = sadd.s32 1, %s1106_s28 }
   0x4   : > { %p23_p0 = scmp.eq.s32.totalorder %s22_s10, 0  ;;  %p32_p1 = scmp.ne.s32.totalorder %s1106_s28, %s1102_s27 }
   0x5   : > { %p33_p2 = scmp.eq.s32.totalorder %s1110_s29, 0  ;;  %p219_p3 = scmp.eq.s32.totalorder %s1177_s30, 3 }
   0x6   : > { %s1190_s12 = scalar_select %p23_p0, %s1106_s28, %s25_s11  }
   0x7   : > { %p1192_p4 = por %p33_p2, %p32_p1  ;;  %p1196_p5 = por %p219_p3, %p32_p1 }
   0x8   : > { %p992_p6 = scmp.ge.s32.totalorder %s1110_s29, 4 }
   0xa   : > { %256 = sbr.rel (%p992_p6) target bundleno = 27 (0x1b), region = 36 }
   0xf   : > { %259 = sbr.rel (!%p1192_p4) target bundleno = 21 (0x15), region = 40  ;;  %s261_s15 = sand.u32 (%p1192_p4), 1, %s1106_s28  }
  0x10   : > { %s1018_s16 = sshll.u32 (%p1192_p4), %s1110_s29, 3  ;;  %s993_s17 = sshll.u32 (%p1192_p4), %s261_s15, 4 }
  0x11   : > { %s266_s20 = scalar_lea.vmem (%p1192_p4), %s1357_s0, %s1018_s16  ;;  %s263_s21 = scalar_lea.vmem (%p1192_p4), [#allocation3], %s993_s17 }
  0x12   : > { %v297_v0 = vld [vmem:[%s266_s20] sm:$0xff] (%p1192_p4) }
  0x13   : > { %v299_v1 = vld [vmem:[%s266_s20 + $0x20] sm:$0xff] (%p1192_p4)  ;;  %298 = vst [vmem:[%s263_s21] sm:$0xff] (%p1192_p4), %v297_v0 }
  0x14   : > { %300 = vst [vmem:[%s263_s21 + $0x8] sm:$0xff] %v299_v1 }
  0x15 PF: > { %306 = sbr.rel (!%p1192_p4) target bundleno = 27 (0x1b), region = 78  ;;  %s308_s22 = sand.u32 (%p1192_p4), 1, %s1106_s28  }
  0x16   : > { %s1019_s23 = sshll.u32 (%p1192_p4), %s1110_s29, 3  ;;  %s996_s24 = sshll.u32 (%p1192_p4), %s308_s22, 4 }
  0x17   : > { %s313_s10 = scalar_lea.vmem (%p1192_p4), %s1358_s1, %s1019_s23  ;;  %s310_s11 = scalar_lea.vmem (%p1192_p4), [#allocation4], %s996_s24 }
  0x18   : > { %v344_v2 = vld [vmem:[%s313_s10] sm:$0xff] (%p1192_p4) }
  0x19   : > { %v346_v3 = vld [vmem:[%s313_s10 + $0x20] sm:$0xff] (%p1192_p4)  ;;  %345 = vst [vmem:[%s310_s11] sm:$0xff] (%p1192_p4), %v344_v2 }
  0x1a   : > { %347 = vst [vmem:[%s310_s11 + $0x8] sm:$0xff] %v346_v3 }
  0x1b PF: > { %p999_p7 = scmp.ge.s32.totalorder %s1110_s29, 1  ;;  %p361_p8 = scmp.lt.s32.totalorder %s1110_s29, 5 }
  0x1d   : > { %p362_p9 = pnand %p999_p7, %p361_p8 }
  0x1e   : > { %s368_s13 = sand.u32 (!%p362_p9), 1, %s1102_s27   ;;  %s1003_s20 = sshll.u32 (!%p362_p9), %s1177_s30, 1 }
  0x1f   : > { %365 = sbr.rel (%p362_p9) target bundleno = 426 (0x1aa), region = 120  ;;  %s1221_s17 = sshll.u32 (!%p362_p9), %s368_s13, 4 }
  0x20   : > { %s370_s18 = scalar_lea.vmem (!%p362_p9), [#allocation3], %s1221_s17  ;;  %s377_s23 = scalar_lea.vmem (!%p362_p9), [#allocation4], %s1221_s17 }
  0x21   : > { %p419_p10 = scmp.lt.s32.totalorder (!%p362_p9), %s1003_s20, 7  ;;  %s415_s25 = scalar_lea.vmem (!%p362_p9), [#allocation5], %s1221_s17 }
  0x24   : > { %v440_v4 = vld [vmem:[%s1361_s4 + $0x8] sm:$0xff]  ;;  %v1112_v5 = vmov 0   ;;  %v425_v7 = vld [vmem:[%s370_s18] sm:$0xff]  ;;  %vm451_vm0 = vcmask 130048   ;;  %v1113_v15 = vmov 1.4142135  }
  0x25   : > { %1049 = vset.pattern.permute.xlu0 %v1112_v5  ;;  %1050 = vset.pattern.permute.xlu1 %v1112_v5  ;;  %v426_v6 = vld [vmem:[%s370_s18 + $0x8] sm:$0xff]  ;;  %v427_v10 = vunpack.c.l.bf16 %v425_v7  ;;  %v428_v11 = vunpack.c.h.bf16 %v425_v7  ;;  %v437_v12 = vld [vmem:[%s1360_s3] sm:$0xff]  ;;  %1054 = vrcp.f32 %v1113_v15  ;;  %vm645_vm6 = vcmask 261120   ;;  %s1372_s20 = smov (!%p419_p10, %s1003_s20), 7  ;;  %s1020_s26 = sshll.u32 (%p1196_p5), %s1177_s30, 3 }
  0x26   : > { %448 = vperm.xlu0 %1049, %v440_v4   ;;  %1051 = vset.pattern.permute.xlu2 %v1112_v5  ;;  %v429_v8 = vunpack.c.l.bf16 %v426_v6  ;;  %v430_v9 = vunpack.c.h.bf16 %v426_v6  ;;  %v439_v13 = vld [vmem:[%s1361_s4] sm:$0xff]  ;;  %v438_v14 = vld [vmem:[%s1360_s3 + $0x8] sm:$0xff]  ;;  %s1004_s21 = sshll.u32 %s1372_s20, 1  ;;  %s865_s11 = scalar_lea.vmem (%p1196_p5), %s1365_s8, %s1020_s26 }
  0x27   : > { %v432_v21 = vld [vmem:[%s377_s23 + $0x8] sm:$0xff]  ;;  %v431_v22 = vld [vmem:[%s377_s23] sm:$0xff]  ;;  %s422_s24 = scalar_lea.vmem %s1359_s2, %s1004_s21 }
  0x28   : > { %472 = vmatpush.msra.mxu0 %v429_v8  ;;  %495 = vmatpush.msra.mxu1 %v430_v9  ;;  %v435_v23 = vunpack.c.l.bf16 %v432_v21  ;;  %v436_v24 = vunpack.c.h.bf16 %v432_v21  ;;  %v433_v25 = vunpack.c.l.bf16 %v431_v22  ;;  %v434_v26 = vunpack.c.h.bf16 %v431_v22 }
  0x2a   : > { %473 = vmatpush.msra.mxu0 %v427_v10  ;;  %496 = vmatpush.msra.mxu1 %v428_v11  ;;  %v633_v11 = vld [vmem:[%s1363_s6] sm:$0xff] }
  0x2b   : > { %1005 = vmatmul.msk.f32.vlgmr.msra.gmra.mxu0 %vm451_vm0, %v437_v12  ;;  %1007 = vmatmul.msk.f32.vlgmr.msra.gmra.mxu1 %vm451_vm0, %v437_v12  ;;  %v1055_v16 = vpop.eup %1054 }
  0x2c   : > { %v509_v17 = vmul.f32 1.4142135, %v1055_v16  ;;  %664 = vmatpush.msra.mxu2 %v435_v23  ;;  %687 = vmatpush.msra.mxu3 %v436_v24  ;;  %vm513_vm1 = vweird.f32 %v1055_v16 }
  0x2d   : > { %637 = vperm.xlu1 %1050, %v633_v11  }
  0x2e   : > { %443 = vperm.xlu0 %1049, %v439_v13   ;;  %v510_v18 = vsub.f32 1.0, %v509_v17  ;;  %665 = vmatpush.msra.mxu2 %v433_v25 }
  0x2f   : > { %688 = vmatpush.msra.mxu3 %v434_v26 }
  0x30   : > { %v511_v20 = vmul.f32 %v1055_v16, %v510_v18 }
  0x32   : > { %v512_v27 = vadd.f32 %v1055_v16, %v511_v20 }
  0x33   : > { %1006 = vmatmul.msk.f32.gmra.mxu0 %vm451_vm0, %v438_v14  ;;  %1008 = vmatmul.msk.f32.gmra.mxu1 %vm451_vm0, %v438_v14 }
  0x34   : > { %v1234_v30 = vsel %vm513_vm1, %v1055_v16, %v512_v27 }
  0x98   : > { %v449_v19 = vpop.permute.xlu0 %448 }
  0xa0   : > { %v444_v28 = vpop.permute.xlu0 %443 }
  0xa8   : > { %v475_v29 = vpop.f32.mrf.mxu0  ;;  %v498_v31 = vpop.f32.mrf.mxu1 }
  0xa9   : > { %v1236_v32 = vadd.f32 %v475_v29, %v444_v28  ;;  %v1238_v33 = vadd.f32 %v498_v31, %v444_v28 }
  0xab   : > { %v1242_v34 = vmul.f32 %v1234_v30, %v1236_v32  ;;  %v1246_v35 = vmul.f32 %v1234_v30, %v1238_v33 }
  0xad   : > { %v527_v36 = vand.u32 2147483647, %v1242_v34  ;;  %v528_v37 = vand.u32 2147483647, %v1246_v35  ;;  %vm519_vm2 = vcmp.ge.f32.partialorder %v1242_v34, 0.0  ;;  %vm520_vm3 = vcmp.ge.f32.partialorder %v1246_v35, 0.0 }
  0xaf   : > { %v531_v38 = vmul.f32 0.3275911, %v527_v36  ;;  %v532_v39 = vmul.f32 0.3275911, %v528_v37  ;;  %v579_v58 = vsub.f32 0.0, %v527_v36  ;;  %v580_v60 = vsub.f32 0.0, %v528_v37 }
  0xb0   : > { %v478_v40 = vpop.f32.mrf.mxu0  ;;  %v501_v41 = vpop.f32.mrf.mxu1 }
  0xb1   : > { %v535_v42 = vadd.f32 1.0, %v531_v38  ;;  %v536_v43 = vadd.f32 1.0, %v532_v39  ;;  %v1250_v44 = vadd.f32 %v478_v40, %v449_v19  ;;  %v1252_v45 = vadd.f32 %v501_v41, %v449_v19  ;;  %v634_v38 = vld [vmem:[%s1363_s6 + $0x8] sm:$0xff]  ;;  %v699_v39 = vld [vmem:[%s1364_s7] sm:$0xff] }
  0xb2   : > { %v583_v0 = vmul.f32 %v579_v58, %v527_v36  ;;  %v584_v2 = vmul.f32 %v580_v60, %v528_v37  ;;  %642 = vperm.xlu1 %1050, %v634_v38   ;;  %703 = vperm.xlu2 %1051, %v699_v39  }
  0xb3   : > { %1056 = vrcp.f32 %v535_v42  ;;  %v1256_v46 = vmul.f32 %v1234_v30, %v1250_v44  ;;  %v1260_v47 = vmul.f32 %v1234_v30, %v1252_v45  ;;  %v1114_v42 = vmov 1  }
  0xb4   : > { %1058 = vrcp.f32 %v536_v43  ;;  %v587_v12 = vmul.f32 1.442695, %v583_v0  ;;  %v589_v15 = vmul.f32 1.442695, %v584_v2  ;;  %1052 = vset.pattern.permute.xlu0 %v1114_v42  ;;  %v1115_v2 = vmov -1.0  }
  0xb5   : > { %v529_v48 = vand.u32 2147483647, %v1256_v46  ;;  %v530_v49 = vand.u32 2147483647, %v1260_v47  ;;  %727 = vperm.xlu0 %1052, %v699_v39   ;;  %vm521_vm4 = vcmp.ge.f32.partialorder %v1256_v46, 0.0  ;;  %vm522_vm5 = vcmp.ge.f32.partialorder %v1260_v47, 0.0 }
  0xb6   : > { %v524_v35 = vsel %vm520_vm3, 1.0, %v1115_v2  ;;  %v506_v47 = vmul.f32 0.5, %v1250_v44 }
  0xb7   : > { %v533_v50 = vmul.f32 0.3275911, %v529_v48  ;;  %v534_v52 = vmul.f32 0.3275911, %v530_v49  ;;  %v581_v5 = vsub.f32 0.0, %v529_v48  ;;  %v582_v8 = vsub.f32 0.0, %v530_v49 }
  0xb9   : > { %v1057_v51 = vpop.eup %1056  ;;  %v537_v54 = vadd.f32 1.0, %v533_v50  ;;  %v538_v56 = vadd.f32 1.0, %v534_v52  ;;  %v585_v18 = vmul.f32 %v581_v5, %v529_v48  ;;  %v586_v21 = vmul.f32 %v582_v8, %v530_v49 }
  0xba   : > { %v1059_v53 = vpop.eup %1058  ;;  %v543_v55 = vmul.f32 1.0614054, %v1057_v51  ;;  %1053 = vset.pattern.permute.xlu1 %v1114_v42 }
  0xbb   : > { %v544_v57 = vmul.f32 1.0614054, %v1059_v53  ;;  %1060 = vrcp.f32 %v537_v54  ;;  %v591_v28 = vmul.f32 1.442695, %v585_v18  ;;  %v593_v31 = vmul.f32 1.442695, %v586_v21 }
  0xbc   : > { %v547_v59 = vadd.f32 -1.4531521, %v543_v55  ;;  %1062 = vrcp.f32 %v538_v56 }
  0xbd   : > { %v548_v61 = vadd.f32 -1.4531521, %v544_v57  ;;  %1064 = vpow2.f32 %v587_v12 }
  0xbe   : > { %v551_v62 = vmul.f32 %v1057_v51, %v547_v59  ;;  %1066 = vpow2.f32 %v589_v15  ;;  %v504_v15 = vmul.f32 0.5, %v1236_v32  ;;  %v624_v32 = vld [vmem:[%s1362_s5 + $0x8] sm:$0xff] }
  0xbf   : > { %v552_v63 = vmul.f32 %v1059_v53, %v548_v61  ;;  %1068 = vpow2.f32 %v591_v28 }
  0xc0   : > { %v555_v1 = vadd.f32 1.4214138, %v551_v62  ;;  %1070 = vpow2.f32 %v593_v31 }
  0xc1   : > { %v556_v3 = vadd.f32 1.4214138, %v552_v63  ;;  %v1061_v4 = vpop.eup %1060 }
  0xc2   : > { %v559_v6 = vmul.f32 %v1057_v51, %v555_v1  ;;  %v1063_v7 = vpop.eup %1062  ;;  %v545_v9 = vmul.f32 1.0614054, %v1061_v4 }
  0xc3   : > { %v560_v10 = vmul.f32 %v1059_v53, %v556_v3  ;;  %v546_v13 = vmul.f32 1.0614054, %v1063_v7  ;;  %v1065_v48 = vpop.eup %1064  ;;  %v523_v3 = vsel %vm519_vm2, 1.0, %v1115_v2 }
  0xc4   : > { %v563_v14 = vadd.f32 -0.28449672, %v559_v6  ;;  %v549_v16 = vadd.f32 -1.4531521, %v545_v9  ;;  %v1067_v50 = vpop.eup %1066  ;;  %v525_v6 = vsel %vm521_vm4, 1.0, %v1115_v2  ;;  %v526_v9 = vsel %vm522_vm5, 1.0, %v1115_v2 }
  0xc5   : > { %v564_v17 = vadd.f32 -0.28449672, %v560_v10  ;;  %v550_v19 = vadd.f32 -1.4531521, %v546_v13  ;;  %v1069_v60 = vpop.eup %1068  ;;  %v507_v13 = vmul.f32 0.5, %v1252_v45 }
  0xc6   : > { %v567_v20 = vmul.f32 %v1057_v51, %v563_v14  ;;  %v553_v22 = vmul.f32 %v1061_v4, %v549_v16  ;;  %v1071_v63 = vpop.eup %1070  ;;  %v698_v45 = vld [vmem:[%s422_s24] sm:$0xf] }
  0xc7   : > { %v568_v23 = vmul.f32 %v1059_v53, %v564_v17  ;;  %v554_v24 = vmul.f32 %v1063_v7, %v550_v19  ;;  %v505_v17 = vmul.f32 0.5, %v1238_v33  ;;  %v638_v33 = vpop.permute.xlu1 %637  ;;  %v712_v21 = vperm.slane %v698_v45, 0 }
  0xc8   : > { %v571_v25 = vadd.f32 0.2548296, %v567_v20  ;;  %v557_v26 = vadd.f32 1.4214138, %v553_v22  ;;  %v623_v20 = vld [vmem:[%s1362_s5] sm:$0xff]  ;;  %v713_v22 = vperm.slane %v698_v45, 2 }
  0xc9   : > { %v572_v27 = vadd.f32 0.2548296, %v568_v23  ;;  %v558_v29 = vadd.f32 1.4214138, %v554_v24  ;;  %v734_v23 = vperm.slane %v698_v45, 1  ;;  %v735_v24 = vperm.slane %v698_v45, 3 }
  0xca   : > { %v561_v36 = vmul.f32 %v1061_v4, %v557_v26  ;;  %v575_v37 = vmul.f32 %v1057_v51, %v571_v25  ;;  %v716_v25 = vperm.slane %v712_v21, 0 }
  0xcb   : > { %v562_v40 = vmul.f32 %v1063_v7, %v558_v29  ;;  %v576_v41 = vmul.f32 %v1059_v53, %v572_v27  ;;  %v700_v53 = vld [vmem:[%s1364_s7 + $0x8] sm:$0xff]  ;;  %v717_v27 = vperm.slane %v713_v22, 0  ;;  %v738_v28 = vperm.slane %v734_v23, 1 }
  0xcc   : > { %v565_v43 = vadd.f32 -0.28449672, %v561_v36  ;;  %v595_v52 = vmul.f32 %v1065_v48, %v575_v37  ;;  %731 = vperm.xlu1 %1053, %v700_v53   ;;  %708 = vperm.xlu2 %1051, %v700_v53   ;;  %v739_v36 = vperm.slane %v735_v24, 1 }
  0xcd   : > { %v566_v49 = vadd.f32 -0.28449672, %v562_v40  ;;  %v596_v55 = vmul.f32 %v1067_v50, %v576_v41 }
  0xce   : > { %v569_v51 = vmul.f32 %v1061_v4, %v565_v43  ;;  %v599_v59 = vsub.f32 1.0, %v595_v52 }
  0xcf   : > { %v570_v54 = vmul.f32 %v1063_v7, %v566_v49  ;;  %v600_v62 = vsub.f32 1.0, %v596_v55 }
  0xd0   : > { %v573_v56 = vadd.f32 0.2548296, %v569_v51  ;;  %v603_v5 = vmul.f32 %v599_v59, %v523_v3 }
  0xd1   : > { %v574_v57 = vadd.f32 0.2548296, %v570_v54  ;;  %v604_v8 = vmul.f32 %v600_v62, %v524_v35 }
  0xd2   : > { %v577_v58 = vmul.f32 %v1061_v4, %v573_v56  ;;  %v607_v12 = vadd.f32 1.0, %v603_v5 }
  0xd3   : > { %v578_v61 = vmul.f32 %v1063_v7, %v574_v57  ;;  %v608_v14 = vadd.f32 1.0, %v604_v8 }
  0xd4   : > { %v597_v0 = vmul.f32 %v1069_v60, %v577_v58  ;;  %v611_v19 = vmul.f32 %v607_v12, %v504_v15 }
  0xd5   : > { %v598_v1 = vmul.f32 %v1071_v63, %v578_v61  ;;  %v612_v44 = vmul.f32 %v608_v14, %v505_v17 }
  0xd6   : > { %v601_v4 = vsub.f32 1.0, %v597_v0 }
  0xd7   : > { %v602_v7 = vsub.f32 1.0, %v598_v1 }
  0xd8   : > { %v605_v46 = vmul.f32 %v601_v4, %v525_v6 }
  0xd9   : > { %v606_v10 = vmul.f32 %v602_v7, %v526_v9 }
  0xda   : > { %v609_v11 = vadd.f32 1.0, %v605_v46 }
  0xdb   : > { %v610_v34 = vadd.f32 1.0, %v606_v10 }
  0xdc   : > { %v613_v16 = vmul.f32 %v609_v11, %v506_v47 }
  0xdd   : > { %v614_v18 = vmul.f32 %v610_v34, %v507_v13 }
  0xde   : > { %666 = vmatpush.msra.mxu2 %v613_v16 }
  0xdf   : > { %689 = vmatpush.msra.mxu3 %v614_v18 }
  0xe0   : > { %667 = vmatpush.msra.mxu2 %v611_v19 }
  0xe1   : > { %690 = vmatpush.msra.mxu3 %v612_v44  ;;  %1009 = vmatmul.msk.f32.vlgmr.msra.gmra.mxu2 %vm645_vm6, %v623_v20 }
  0xe2   : > { %1011 = vmatmul.msk.f32.vlgmr.msra.gmra.mxu3 %vm645_vm6, %v623_v20 }
  0xe9   : > { %1010 = vmatmul.msk.f32.gmra.mxu2 %vm645_vm6, %v624_v32 }
  0xea   : > { %1012 = vmatmul.msk.f32.gmra.mxu3 %vm645_vm6, %v624_v32 }
 0x10c   : > { %v704_v26 = vpop.permute.xlu2 %703 }
 0x10d   : > { %v718_v37 = vmul.f32 %v716_v25, %v704_v26  ;;  %v719_v38 = vmul.f32 %v717_v27, %v704_v26 }
 0x124   : > { %v643_v29 = vpop.permute.xlu1 %642 }
 0x126   : > { %v709_v52 = vpop.permute.xlu2 %708 }
 0x127   : > { %v728_v31 = vpop.permute.xlu0 %727  ;;  %v720_v58 = vmul.f32 %v716_v25, %v709_v52  ;;  %v721_v63 = vmul.f32 %v717_v27, %v709_v52 }
 0x128   : > { %v740_v42 = vmul.f32 %v738_v28, %v728_v31  ;;  %v741_v48 = vmul.f32 %v739_v36, %v728_v31 }
 0x13e   : > { %v732_v55 = vpop.permute.xlu1 %731 }
 0x13f   : > { %v742_v62 = vmul.f32 %v738_v28, %v732_v55  ;;  %v743_v3 = vmul.f32 %v739_v36, %v732_v55 }
 0x164   : > { %v669_v39 = vpop.f32.mrf.mxu2 }
 0x165   : > { %v670_v40 = vadd.f32 %v669_v39, %v638_v33  ;;  %v692_v41 = vpop.f32.mrf.mxu3 }
 0x166   : > { %v693_v43 = vadd.f32 %v692_v41, %v638_v33 }
 0x167   : > { %v722_v49 = vadd.f32 %v718_v37, %v670_v40 }
 0x168   : > { %v723_v50 = vadd.f32 %v719_v38, %v693_v43 }
 0x169   : > { %v1300_v51 = vadd.f32 %v740_v42, %v722_v49 }
 0x16a   : > { %v1302_v54 = vadd.f32 %v741_v48, %v723_v50 }
 0x16b   : > { %v1306_v56 = vmul.f32 %v1300_v51, %v1234_v30 }
 0x16c   : > { %v1310_v57 = vmul.f32 %v1302_v54, %v1234_v30  ;;  %v672_v53 = vpop.f32.mrf.mxu2 }
 0x16d   : > { %v764_v59 = vand.u32 2147483647, %v1306_v56  ;;  %v673_v60 = vadd.f32 %v672_v53, %v643_v29  ;;  %v695_v61 = vpop.f32.mrf.mxu3  ;;  %vm756_vm7 = vcmp.ge.f32.partialorder %v1306_v56, 0.0 }
 0x16e   : > { %v765_v0 = vand.u32 2147483647, %v1310_v57  ;;  %v696_v1 = vadd.f32 %v695_v61, %v643_v29  ;;  %vm757_vm8 = vcmp.ge.f32.partialorder %v1310_v57, 0.0 }
 0x16f   : > { %v768_v4 = vmul.f32 0.3275911, %v764_v59  ;;  %v724_v5 = vadd.f32 %v720_v58, %v673_v60  ;;  %v816_v15 = vsub.f32 0.0, %v764_v59 }
 0x170   : > { %v769_v35 = vmul.f32 0.3275911, %v765_v0  ;;  %v725_v6 = vadd.f32 %v721_v63, %v696_v1  ;;  %v817_v19 = vsub.f32 0.0, %v765_v0 }
 0x171   : > { %v772_v7 = vadd.f32 1.0, %v768_v4  ;;  %v1314_v8 = vadd.f32 %v742_v62, %v724_v5 }
 0x172   : > { %v773_v46 = vadd.f32 1.0, %v769_v35  ;;  %v1316_v9 = vadd.f32 %v743_v3, %v725_v6  ;;  %v821_v21 = vmul.f32 %v817_v19, %v765_v0 }
 0x173   : > { %1072 = vrcp.f32 %v772_v7  ;;  %v1320_v10 = vmul.f32 %v1314_v8, %v1234_v30 }
 0x174   : > { %1074 = vrcp.f32 %v773_v46  ;;  %v1324_v47 = vmul.f32 %v1316_v9, %v1234_v30  ;;  %v820_v30 = vmul.f32 %v816_v15, %v764_v59  ;;  %v826_v31 = vmul.f32 1.442695, %v821_v21 }
 0x175   : > { %v766_v11 = vand.u32 2147483647, %v1320_v10  ;;  %vm758_vm9 = vcmp.ge.f32.partialorder %v1320_v10, 0.0  ;;  %v751_v10 = vmul.f32 0.5, %v1316_v9 }
 0x176   : > { %v767_v12 = vand.u32 2147483647, %v1324_v47  ;;  %v824_v26 = vmul.f32 1.442695, %v820_v30  ;;  %vm759_vm10 = vcmp.ge.f32.partialorder %v1324_v47, 0.0 }
 0x177   : > { %v770_v13 = vmul.f32 0.3275911, %v766_v11  ;;  %v818_v27 = vsub.f32 0.0, %v766_v11 }
 0x178   : > { %v771_v34 = vmul.f32 0.3275911, %v767_v12  ;;  %v819_v37 = vsub.f32 0.0, %v767_v12 }
 0x179   : > { %v1073_v14 = vpop.eup %1072  ;;  %v774_v16 = vadd.f32 1.0, %v770_v13  ;;  %v822_v48 = vmul.f32 %v818_v27, %v766_v11 }
 0x17a   : > { %v1075_v17 = vpop.eup %1074  ;;  %v780_v18 = vmul.f32 1.0614054, %v1073_v14  ;;  %v775_v20 = vadd.f32 1.0, %v771_v34  ;;  %v823_v52 = vmul.f32 %v819_v37, %v767_v12  ;;  %v760_v34 = vsel %vm756_vm7, 1.0, %v1115_v2 }
 0x17b   : > { %v781_v44 = vmul.f32 1.0614054, %v1075_v17  ;;  %1076 = vrcp.f32 %v774_v16  ;;  %v828_v62 = vmul.f32 1.442695, %v822_v48  ;;  %v761_v16 = vsel %vm757_vm8, 1.0, %v1115_v2 }
 0x17c   : > { %v784_v32 = vadd.f32 -1.4531521, %v780_v18  ;;  %1078 = vrcp.f32 %v775_v20  ;;  %v830_v1 = vmul.f32 1.442695, %v823_v52  ;;  %v748_v20 = vmul.f32 0.5, %v1300_v51 }
 0x17d   : > { %v785_v33 = vadd.f32 -1.4531521, %v781_v44  ;;  %1080 = vpow2.f32 %v824_v26  ;;  %v762_v51 = vsel %vm758_vm9, 1.0, %v1115_v2 }
 0x17e   : > { %v788_v45 = vmul.f32 %v1073_v14, %v784_v32  ;;  %1082 = vpow2.f32 %v826_v31  ;;  %v763_v31 = vsel %vm759_vm10, 1.0, %v1115_v2 }
 0x17f   : > { %v789_v22 = vmul.f32 %v1075_v17, %v785_v33  ;;  %1084 = vpow2.f32 %v828_v62  ;;  %v749_v33 = vmul.f32 0.5, %v1302_v54 }
 0x180   : > { %v792_v23 = vadd.f32 1.4214138, %v788_v45  ;;  %1086 = vpow2.f32 %v830_v1 }
 0x181   : > { %v1077_v24 = vpop.eup %1076  ;;  %v793_v25 = vadd.f32 1.4214138, %v789_v22 }
 0x182   : > { %v1079_v28 = vpop.eup %1078  ;;  %v796_v29 = vmul.f32 %v1073_v14, %v792_v23  ;;  %v782_v36 = vmul.f32 1.0614054, %v1077_v24 }
 0x183   : > { %v797_v38 = vmul.f32 %v1075_v17, %v793_v25  ;;  %v783_v39 = vmul.f32 1.0614054, %v1079_v28  ;;  %v1081_v3 = vpop.eup %1080 }
 0x184   : > { %v800_v40 = vadd.f32 -0.28449672, %v796_v29  ;;  %v786_v41 = vadd.f32 -1.4531521, %v782_v36  ;;  %v1083_v35 = vpop.eup %1082  ;;  %v750_v36 = vmul.f32 0.5, %v1314_v8 }
 0x185   : > { %v801_v42 = vadd.f32 -0.28449672, %v797_v38  ;;  %v787_v43 = vadd.f32 -1.4531521, %v783_v39  ;;  %v1085_v32 = vpop.eup %1084 }
 0x186   : > { %v804_v49 = vmul.f32 %v1073_v14, %v800_v40  ;;  %v790_v50 = vmul.f32 %v1077_v24, %v786_v41  ;;  %v1087_v21 = vpop.eup %1086 }
 0x187   : > { %v805_v55 = vmul.f32 %v1075_v17, %v801_v42  ;;  %v791_v53 = vmul.f32 %v1079_v28, %v787_v43 }
 0x188   : > { %v808_v58 = vadd.f32 0.2548296, %v804_v49  ;;  %v794_v59 = vadd.f32 1.4214138, %v790_v50 }
 0x189   : > { %v809_v60 = vadd.f32 0.2548296, %v805_v55  ;;  %v795_v61 = vadd.f32 1.4214138, %v791_v53 }
 0x18a   : > { %v812_v63 = vmul.f32 %v1073_v14, %v808_v58  ;;  %v798_v0 = vmul.f32 %v1077_v24, %v794_v59 }
 0x18b   : > { %v813_v4 = vmul.f32 %v1075_v17, %v809_v60  ;;  %v799_v5 = vmul.f32 %v1079_v28, %v795_v61 }
 0x18c   : > { %v832_v6 = vmul.f32 %v1081_v3, %v812_v63  ;;  %v802_v7 = vadd.f32 -0.28449672, %v798_v0 }
 0x18d   : > { %v833_v46 = vmul.f32 %v1083_v35, %v813_v4  ;;  %v803_v11 = vadd.f32 -0.28449672, %v799_v5 }
 0x18e   : > { %v836_v12 = vsub.f32 1.0, %v832_v6  ;;  %v806_v13 = vmul.f32 %v1077_v24, %v802_v7 }
 0x18f   : > { %v837_v14 = vsub.f32 1.0, %v833_v46  ;;  %v807_v15 = vmul.f32 %v1079_v28, %v803_v11 }
 0x190   : > { %v840_v17 = vmul.f32 %v836_v12, %v760_v34  ;;  %v810_v18 = vadd.f32 0.2548296, %v806_v13 }
 0x191   : > { %v841_v19 = vmul.f32 %v837_v14, %v761_v16  ;;  %v811_v56 = vadd.f32 0.2548296, %v807_v15 }
 0x192   : > { %v844_v44 = vadd.f32 1.0, %v840_v17  ;;  %v814_v57 = vmul.f32 %v1077_v24, %v810_v18 }
 0x193   : > { %v845_v30 = vadd.f32 1.0, %v841_v19  ;;  %v815_v45 = vmul.f32 %v1079_v28, %v811_v56 }
 0x194   : > { %v848_v22 = vmul.f32 %v844_v44, %v748_v20  ;;  %v834_v23 = vmul.f32 %v1085_v32, %v814_v57 }
 0x195   : > { %v849_v25 = vmul.f32 %v845_v30, %v749_v33  ;;  %v835_v26 = vmul.f32 %v1087_v21, %v815_v45 }
 0x196   : > { %v838_v27 = vsub.f32 1.0, %v834_v23 }
 0x197   : > { %v852_v29 = vpack.c.bf16 %v849_v25, %v848_v22  ;;  %v839_v24 = vsub.f32 1.0, %v835_v26 }
 0x198   : > { %v842_v54 = vmul.f32 %v838_v27, %v762_v51 }
 0x199   : > { %854 = vst [vmem:[%s415_s25] sm:$0xff] %v852_v29  ;;  %v843_v28 = vmul.f32 %v839_v24, %v763_v31 }
 0x19a   : > { %v846_v37 = vadd.f32 1.0, %v842_v54 }
 0x19b   : > { %v847_v38 = vadd.f32 1.0, %v843_v28 }
 0x19c   : > { %v850_v39 = vmul.f32 %v846_v37, %v750_v36 }
 0x19d   : > { %v851_v47 = vmul.f32 %v847_v38, %v751_v10  ;;  %862 = sbr.rel (!%p1196_p5) target bundleno = 426 (0x1aa), region = 132 }
 0x19f   : > { %v853_v40 = vpack.c.bf16 %v851_v47, %v850_v39 }
 0x1a0   : > { %v896_v2 = vld [vmem:[%s415_s25] sm:$0xff] (%p1196_p5) }
 0x1a1   : > { %855 = vst [vmem:[%s415_s25 + $0x8] sm:$0xff] %v853_v40 }
 0x1a2   : > { %897 = vst [vmem:[%s865_s11] sm:$0xff] %v896_v2 }
 0x1a8   : > { %v898_v41 = vld [vmem:[%s415_s25 + $0x8] sm:$0xff] }
 0x1a9   : > { %899 = vst [vmem:[%s865_s11 + $0x20] sm:$0xff] %v898_v41 }
 0x1aa PF: > { %p15_p11 = scmp.ge.s32.totalorder %s1180_s9, 6   ;;  %s1368_s27 = smov %s1106_s28 }
 0x1ab   : > { %s1369_s28 = smov %s1190_s12  ;;  %s1370_s29 = smov %s1180_s9 }
 0x1ac   :  { %17 = sbr.rel (!%p15_p11) target bundleno = 2 (0x2), region = 212 }

// kernel: fno_multi2d_bayesian_forward.29
= control target key start
LH: loop header
LB: loop body
LE: loop exit
PB: predicated region body
PF: predicated region fallthrough
CT: control target
= control target key end

     0   :  { %s3070_s18 = smov 0   ;;  %s3072_s19 = smov 0   ;;  %s5161_s0 = inlined_call_operand.vmem [shape: bf16[16,1024], index: 0, kind: input, shape index: {}]   ;;  %s5162_s1 = inlined_call_operand.vmem [shape: f32[256,16], index: 1, kind: input, shape index: {}]   ;;  %s5163_s2 = inlined_call_operand.vmem [shape: f32[256,1], index: 2, kind: input, shape index: {}]   ;;  %s5164_s3 = inlined_call_operand.vmem [shape: f32[5,256], index: 3, kind: input, shape index: {}]   ;;  %s5165_s4 = inlined_call_operand.vmem [shape: f32[5,1], index: 4, kind: input, shape index: {}]   ;;  %s5166_s5 = inlined_call_operand.vmem [shape: f32[5,1024], index: 5, kind: output, shape index: {}]  }
   0x1   :  { %s3074_s20 = smov 0  }
   0x2 LB: > { %s2643_s21 = sadd.s32 4294967295, %s3035_s20   ;;  %s3087_s22 = sadd.s32 1, %s3035_s20   ;;  %s3035_s20 = sphi %s3074_s20, %s5684_s20   ;;  %s3031_s19 = sphi %s3072_s19, %s5683_s19   ;;  %s3027_s18 = sphi %s3070_s18, %s5682_s18  }
   0x3   : > { %s19_s23 = ssub.s32 %s3035_s20, %s3087_s22  ;;  %s22_s24 = sadd.s32 1, %s3031_s19 }
   0x4   : > { %p20_p0 = scmp.eq.s32.totalorder %s19_s23, 0  ;;  %p29_p1 = scmp.ne.s32.totalorder %s3031_s19, %s3027_s18 }
   0x5   : > { %p30_p2 = scmp.eq.s32.totalorder %s3035_s20, 0  ;;  %p2646_p4 = scmp.ge.s32.totalorder %s3035_s20, 4 }
   0x6   : > { %s3096_s25 = scalar_select %p20_p0, %s3031_s19, %s22_s24  }
   0x7   : > { %p31_p3 = por %p30_p2, %p29_p1  ;;  %177 = sbr.rel (%p2646_p4) target bundleno = 18 (0x12), region = 32 }
   0xc   : > { %180 = sbr.rel (!%p31_p3) target bundleno = 18 (0x12), region = 36  ;;  %s182_s26 = sand.u32 (%p31_p3), 1, %s3031_s19  }
   0xd   : > { %s2720_s27 = sshll.u32 (%p31_p3), %s3035_s20, 3  ;;  %s2647_s28 = sshll.u32 (%p31_p3), %s182_s26, 4 }
   0xe   : > { %s187_s6 = scalar_lea.vmem (%p31_p3), %s5161_s0, %s2720_s27  ;;  %s184_s7 = scalar_lea.vmem (%p31_p3), [#allocation2], %s2647_s28 }
   0xf   : > { %v218_v0 = vld [vmem:[%s187_s6] sm:$0xff] (%p31_p3) }
  0x10   : > { %v220_v1 = vld [vmem:[%s187_s6 + $0x20] sm:$0xff] (%p31_p3)  ;;  %219 = vst [vmem:[%s184_s7] sm:$0xff] (%p31_p3), %v218_v0 }
  0x11   : > { %221 = vst [vmem:[%s184_s7 + $0x8] sm:$0xff] %v220_v1 }
  0x12 PF: > { %p2650_p5 = scmp.ge.s32.totalorder %s3035_s20, 1  ;;  %p226_p6 = scmp.lt.s32.totalorder %s3035_s20, 5 }
  0x14   : > { %p227_p7 = pnand %p2650_p5, %p226_p6 }
  0x16   : > { %230 = sbr.rel (%p227_p7) target bundleno = 788 (0x314), region = 74 }
  0x1b   : > { %v336_v2 = vld [vmem:[%s5163_s2 + $0xf8] sm:$0xff]  ;;  %v335_v3 = vld [vmem:[%s5163_s2 + $0xf0] sm:$0xff]  ;;  %s233_s14 = sand.u32 1, %s3027_s18   ;;  %v3037_v5 = vmov 0   ;;  %v273_v12 = vld [vmem:[%s5162_s1] sm:$0xff]  ;;  %vm497_vm0 = vcmask 130048  }
  0x1c   : > { %v320_v4 = vld [vmem:[%s5163_s2 + $0x78] sm:$0xff]  ;;  %2754 = vset.pattern.permute.xlu2 %v3037_v5  ;;  %2753 = vset.pattern.permute.xlu1 %v3037_v5  ;;  %s2651_s15 = sshll.u32 %s233_s14, 4  ;;  %v293_v13 = vld [vmem:[%s5162_s1 + $0xa0] sm:$0xff]  ;;  %v319_v15 = vld [vmem:[%s5163_s2 + $0x70] sm:$0xff]  ;;  %s2652_s30 = sshll.u32 %s2643_s21, 1 }
  0x1d   : > { %2752 = vset.pattern.permute.xlu0 %v3037_v5  ;;  %494 = vperm.xlu1 %2753, %v336_v2   ;;  %s235_s16 = scalar_lea.vmem [#allocation2], %s2651_s15  ;;  %v3125_v14 = vld [vmem:[%s5162_s1 + $0x98] sm:$0xff]  ;;  %v318_v16 = vld [vmem:[%s5163_s2 + $0x68] sm:$0xff]  ;;  %v317_v17 = vld [vmem:[%s5163_s2 + $0x60] sm:$0xff]  ;;  %p262_p8 = scmp.lt.s32.totalorder %s2652_s30, 7 }
  0x1e   : > { %489 = vperm.xlu2 %2754, %v335_v3   ;;  %414 = vperm.xlu0 %2752, %v320_v4   ;;  %v268_v6 = vld [vmem:[%s235_s16 + $0x8] sm:$0xff]  ;;  %v267_v7 = vld [vmem:[%s235_s16] sm:$0xff] }
  0x1f   : > { %v271_v8 = vunpack.c.l.bf16 %v268_v6  ;;  %v272_v9 = vunpack.c.h.bf16 %v268_v6  ;;  %v269_v10 = vunpack.c.l.bf16 %v267_v7  ;;  %v270_v11 = vunpack.c.h.bf16 %v267_v7  ;;  %v274_v18 = vld [vmem:[%s5162_s1 + $0x8] sm:$0xff]  ;;  %v316_v21 = vld [vmem:[%s5163_s2 + $0x58] sm:$0xff]  ;;  %v333_v22 = vld [vmem:[%s5163_s2 + $0xe0] sm:$0xff]  ;;  %s5686_s30 = smov (!%p262_p8, %s2652_s30), 7 }
  0x20   : > { %v294_v19 = vld [vmem:[%s5162_s1 + $0xa8] sm:$0xff]  ;;  %v275_v23 = vld [vmem:[%s5162_s1 + $0x10] sm:$0xff]  ;;  %v332_v25 = vld [vmem:[%s5163_s2 + $0xd8] sm:$0xff]  ;;  %s2653_s6 = sshll.u32 %s5686_s30, 3 }
  0x21   : > { %608 = vmatpush.msra.mxu0 %v271_v8  ;;  %2721 = vmatpush.msra.mxu2 %v271_v8  ;;  %v334_v20 = vld [vmem:[%s5163_s2 + $0xe8] sm:$0xff]  ;;  %v295_v24 = vld [vmem:[%s5162_s1 + $0xb0] sm:$0xff]  ;;  %v276_v28 = vld [vmem:[%s5162_s1 + $0x18] sm:$0xff]  ;;  %s265_s9 = scalar_lea.vmem %s5166_s5, %s2653_s6 }
  0x22   : > { %721 = vmatpush.msra.mxu1 %v272_v9  ;;  %2723 = vmatpush.msra.mxu3 %v272_v9  ;;  %v315_v26 = vld [vmem:[%s5163_s2 + $0x50] sm:$0xff]  ;;  %v314_v27 = vld [vmem:[%s5163_s2 + $0x48] sm:$0xff]  ;;  %v296_v29 = vld [vmem:[%s5162_s1 + $0xb8] sm:$0xff] }
  0x23   : > { %609 = vmatpush.msra.mxu0 %v269_v10  ;;  %2722 = vmatpush.msra.mxu2 %v269_v10  ;;  %v331_v30 = vld [vmem:[%s5163_s2 + $0xd0] sm:$0xff]  ;;  %v313_v31 = vld [vmem:[%s5163_s2 + $0x40] sm:$0xff]  ;;  %v330_v32 = vld [vmem:[%s5163_s2 + $0xc8] sm:$0xff] }
  0x24   : > { %722 = vmatpush.msra.mxu1 %v270_v11  ;;  %2724 = vmatpush.msra.mxu3 %v270_v11  ;;  %v277_v33 = vld [vmem:[%s5162_s1 + $0x20] sm:$0xff]  ;;  %v312_v36 = vld [vmem:[%s5163_s2 + $0x38] sm:$0xff]  ;;  %v311_v37 = vld [vmem:[%s5163_s2 + $0x30] sm:$0xff] }
  0x25   : > { %2654 = vmatmul.msk.f32.vlgmr.msra.gmra.mxu0 %vm497_vm0, %v273_v12  ;;  %2674 = vmatmul.msk.f32.vlgmr.msra.gmra.mxu2 %vm497_vm0, %v293_v13  ;;  %v297_v34 = vld [vmem:[%s5162_s1 + $0xc0] sm:$0xff]  ;;  %v278_v38 = vld [vmem:[%s5162_s1 + $0x28] sm:$0xff]  ;;  %v328_v40 = vld [vmem:[%s5163_s2 + $0xb8] sm:$0xff] }
  0x26   : > { %2686 = vmatmul.msk.f32.vlgmr.msra.gmra.mxu1 %vm497_vm0, %v273_v12  ;;  %2705 = vmatmul.msk.f32.vlgmr.msra.gmra.mxu3 %vm497_vm0, %v3125_v14  ;;  %v329_v35 = vld [vmem:[%s5163_s2 + $0xc0] sm:$0xff]  ;;  %v298_v39 = vld [vmem:[%s5162_s1 + $0xc8] sm:$0xff]  ;;  %v327_v42 = vld [vmem:[%s5163_s2 + $0xb0] sm:$0xff] }
  0x27   : > { %409 = vperm.xlu0 %2752, %v319_v15   ;;  %404 = vperm.xlu1 %2753, %v318_v16   ;;  %v310_v41 = vld [vmem:[%s5163_s2 + $0x28] sm:$0xff]  ;;  %v279_v43 = vld [vmem:[%s5162_s1 + $0x30] sm:$0xff]  ;;  %v309_v46 = vld [vmem:[%s5163_s2 + $0x20] sm:$0xff] }
  0x28   : > { %399 = vperm.xlu2 %2754, %v317_v17   ;;  %v299_v44 = vld [vmem:[%s5162_s1 + $0xd0] sm:$0xff]  ;;  %v326_v45 = vld [vmem:[%s5163_s2 + $0xa8] sm:$0xff]  ;;  %v308_v47 = vld [vmem:[%s5163_s2 + $0x18] sm:$0xff] }
  0x29   : > { %v280_v48 = vld [vmem:[%s5162_s1 + $0x38] sm:$0xff]  ;;  %v325_v50 = vld [vmem:[%s5163_s2 + $0xa0] sm:$0xff]  ;;  %v307_v51 = vld [vmem:[%s5163_s2 + $0x10] sm:$0xff] }
  0x2a   : > { %v300_v49 = vld [vmem:[%s5162_s1 + $0xd8] sm:$0xff]  ;;  %v281_v53 = vld [vmem:[%s5162_s1 + $0x40] sm:$0xff]  ;;  %v306_v55 = vld [vmem:[%s5163_s2 + $0x8] sm:$0xff] }
  0x2b   : > { %v324_v52 = vld [vmem:[%s5163_s2 + $0x98] sm:$0xff]  ;;  %v301_v54 = vld [vmem:[%s5162_s1 + $0xe0] sm:$0xff]  ;;  %v323_v56 = vld [vmem:[%s5163_s2 + $0x90] sm:$0xff] }
  0x2c   : > { %v305_v57 = vld [vmem:[%s5163_s2] sm:$0xff]  ;;  %v282_v58 = vld [vmem:[%s5162_s1 + $0x48] sm:$0xff]  ;;  %v283_v62 = vld [vmem:[%s5162_s1 + $0x50] sm:$0xff] }
  0x2d   : > { %2655 = vmatmul.msk.f32.gmra.mxu0 %vm497_vm0, %v274_v18  ;;  %2675 = vmatmul.msk.f32.gmra.mxu2 %vm497_vm0, %v294_v19  ;;  %v302_v59 = vld [vmem:[%s5162_s1 + $0xe8] sm:$0xff]  ;;  %v321_v61 = vld [vmem:[%s5163_s2 + $0x80] sm:$0xff]  ;;  %v303_v63 = vld [vmem:[%s5162_s1 + $0xf0] sm:$0xff] }
  0x2e   : > { %2687 = vmatmul.msk.f32.gmra.mxu1 %vm497_vm0, %v274_v18  ;;  %2706 = vmatmul.msk.f32.gmra.mxu3 %vm497_vm0, %v293_v13  ;;  %v322_v60 = vld [vmem:[%s5163_s2 + $0x88] sm:$0xff]  ;;  %v284_v1 = vld [vmem:[%s5162_s1 + $0x58] sm:$0xff]  ;;  %v2493_v3 = vld [vmem:[%s5165_s4] sm:$0x1f] }
  0x2f   : > { %484 = vperm.xlu0 %2752, %v334_v20   ;;  %394 = vperm.xlu1 %2753, %v316_v21   ;;  %v304_v2 = vld [vmem:[%s5162_s1 + $0xf8] sm:$0xff]  ;;  %v285_v5 = vld [vmem:[%s5162_s1 + $0x60] sm:$0xff]  ;;  %v286_v7 = vld [vmem:[%s5162_s1 + $0x68] sm:$0xff] }
  0x30   : > { %479 = vperm.xlu2 %2754, %v333_v22   ;;  %v287_v11 = vld [vmem:[%s5162_s1 + $0x70] sm:$0xff]  ;;  %v288_v16 = vld [vmem:[%s5162_s1 + $0x78] sm:$0xff]  ;;  %v289_v21 = vld [vmem:[%s5162_s1 + $0x80] sm:$0xff] }
  0x35   : > { %2656 = vmatmul.msk.f32.gmra.mxu0 %vm497_vm0, %v275_v23  ;;  %2676 = vmatmul.msk.f32.gmra.mxu2 %vm497_vm0, %v295_v24 }
  0x36   : > { %2688 = vmatmul.msk.f32.gmra.mxu1 %vm497_vm0, %v275_v23  ;;  %2707 = vmatmul.msk.f32.gmra.mxu3 %vm497_vm0, %v294_v19  ;;  %v3038_v23 = vmov 1.4142135  }
  0x37   : > { %474 = vperm.xlu1 %2753, %v332_v25   ;;  %389 = vperm.xlu0 %2752, %v315_v26   ;;  %2755 = vrcp.f32 %v3038_v23 }
  0x38   : > { %384 = vperm.xlu2 %2754, %v314_v27  }
  0x3d   : > { %2657 = vmatmul.msk.f32.gmra.mxu0 %vm497_vm0, %v276_v28  ;;  %2677 = vmatmul.msk.f32.gmra.mxu2 %vm497_vm0, %v296_v29  ;;  %v2756_v27 = vpop.eup %2755 }
  0x3e   : > { %2689 = vmatmul.msk.f32.gmra.mxu1 %vm497_vm0, %v276_v28  ;;  %2708 = vmatmul.msk.f32.gmra.mxu3 %vm497_vm0, %v295_v24  ;;  %vm889_vm1 = vweird.f32 %v2756_v27 }
  0x3f   : > { %469 = vperm.xlu0 %2752, %v331_v30   ;;  %379 = vperm.xlu1 %2753, %v313_v31   ;;  %v290_v30 = vld [vmem:[%s5162_s1 + $0x88] sm:$0xff] }
  0x40   : > { %464 = vperm.xlu2 %2754, %v330_v32  }
  0x45   : > { %2658 = vmatmul.msk.f32.gmra.mxu0 %vm497_vm0, %v277_v33  ;;  %2678 = vmatmul.msk.f32.gmra.mxu2 %vm497_vm0, %v297_v34 }
  0x46   : > { %2690 = vmatmul.msk.f32.gmra.mxu1 %vm497_vm0, %v277_v33  ;;  %2709 = vmatmul.msk.f32.gmra.mxu3 %vm497_vm0, %v296_v29  ;;  %v885_v33 = vmul.f32 1.4142135, %v2756_v27 }
  0x47   : > { %459 = vperm.xlu1 %2753, %v329_v35   ;;  %374 = vperm.xlu0 %2752, %v312_v36  }
  0x48   : > { %369 = vperm.xlu2 %2754, %v311_v37   ;;  %v886_v36 = vsub.f32 1.0, %v885_v33 }
  0x4d   : > { %2659 = vmatmul.msk.f32.gmra.mxu0 %vm497_vm0, %v278_v38  ;;  %2679 = vmatmul.msk.f32.gmra.mxu2 %vm497_vm0, %v298_v39 }
  0x4e   : > { %2691 = vmatmul.msk.f32.gmra.mxu1 %vm497_vm0, %v278_v38  ;;  %2710 = vmatmul.msk.f32.gmra.mxu3 %vm497_vm0, %v297_v34 }
  0x4f   : > { %454 = vperm.xlu0 %2752, %v328_v40   ;;  %364 = vperm.xlu1 %2753, %v310_v41  }
  0x50   : > { %449 = vperm.xlu2 %2754, %v327_v42  }
  0x55   : > { %2660 = vmatmul.msk.f32.gmra.mxu0 %vm497_vm0, %v279_v43  ;;  %2680 = vmatmul.msk.f32.gmra.mxu2 %vm497_vm0, %v299_v44 }
  0x56   : > { %2692 = vmatmul.msk.f32.gmra.mxu1 %vm497_vm0, %v279_v43  ;;  %2711 = vmatmul.msk.f32.gmra.mxu3 %vm497_vm0, %v298_v39  ;;  %v291_v39 = vld [vmem:[%s5162_s1 + $0x90] sm:$0xff]  ;;  %v887_v43 = vmul.f32 %v2756_v27, %v886_v36 }
  0x57   : > { %444 = vperm.xlu1 %2753, %v326_v45   ;;  %359 = vperm.xlu0 %2752, %v309_v46  }
  0x58   : > { %354 = vperm.xlu2 %2754, %v308_v47  }
  0x5d   : > { %2661 = vmatmul.msk.f32.gmra.mxu0 %vm497_vm0, %v280_v48  ;;  %2681 = vmatmul.msk.f32.gmra.mxu2 %vm497_vm0, %v300_v49 }
  0x5e   : > { %2693 = vmatmul.msk.f32.gmra.mxu1 %vm497_vm0, %v280_v48  ;;  %2712 = vmatmul.msk.f32.gmra.mxu3 %vm497_vm0, %v299_v44  ;;  %v888_v44 = vadd.f32 %v2756_v27, %v887_v43 }
  0x5f   : > { %439 = vperm.xlu0 %2752, %v325_v50   ;;  %349 = vperm.xlu1 %2753, %v307_v51  }
  0x60   : > { %434 = vperm.xlu2 %2754, %v324_v52   ;;  %v3420_v52 = vsel %vm889_vm1, %v2756_v27, %v888_v44 }
  0x65   : > { %2662 = vmatmul.msk.f32.gmra.mxu0 %vm497_vm0, %v281_v53  ;;  %2682 = vmatmul.msk.f32.gmra.mxu2 %vm497_vm0, %v301_v54 }
  0x66   : > { %2694 = vmatmul.msk.f32.gmra.mxu1 %vm497_vm0, %v281_v53  ;;  %2713 = vmatmul.msk.f32.gmra.mxu3 %vm497_vm0, %v300_v49 }
  0x67   : > { %344 = vperm.xlu0 %2752, %v306_v55   ;;  %429 = vperm.xlu1 %2753, %v323_v56  }
  0x68   : > { %339 = vperm.xlu2 %2754, %v305_v57  }
  0x6d   : > { %2663 = vmatmul.msk.f32.gmra.mxu0 %vm497_vm0, %v282_v58  ;;  %2683 = vmatmul.msk.f32.gmra.mxu2 %vm497_vm0, %v302_v59 }
  0x6e   : > { %2695 = vmatmul.msk.f32.gmra.mxu1 %vm497_vm0, %v282_v58  ;;  %2714 = vmatmul.msk.f32.gmra.mxu3 %vm497_vm0, %v301_v54 }
  0x6f   : > { %424 = vperm.xlu0 %2752, %v322_v60   ;;  %419 = vperm.xlu1 %2753, %v321_v61  }
  0x70   : > { %2496 = vperm.xlu2 %2754, %v2493_v3  }
  0x75   : > { %2664 = vmatmul.msk.f32.gmra.mxu0 %vm497_vm0, %v283_v62  ;;  %2684 = vmatmul.msk.f32.gmra.mxu2 %vm497_vm0, %v303_v63 }
  0x76   : > { %2696 = vmatmul.msk.f32.gmra.mxu1 %vm497_vm0, %v283_v62  ;;  %2715 = vmatmul.msk.f32.gmra.mxu3 %vm497_vm0, %v302_v59 }
  0x78   : > { %v3319_v0 = vpop.permute.xlu2 %489 }
  0x7d   : > { %2665 = vmatmul.msk.f32.gmra.mxu0 %vm497_vm0, %v284_v1  ;;  %2685 = vmatmul.msk.f32.gmra.mxu2 %vm497_vm0, %v304_v2 }
  0x7e   : > { %2697 = vmatmul.msk.f32.gmra.mxu1 %vm497_vm0, %v284_v1  ;;  %2716 = vmatmul.msk.f32.gmra.mxu3 %vm497_vm0, %v303_v63 }
  0x82   : > { %v3334_v4 = vpop.permute.xlu2 %399 }
  0x85   : > { %2666 = vmatmul.msk.f32.gmra.mxu0 %vm497_vm0, %v285_v5 }
  0x86   : > { %2698 = vmatmul.msk.f32.gmra.mxu1 %vm497_vm0, %v285_v5  ;;  %2717 = vmatmul.msk.f32.gmra.mxu3 %vm497_vm0, %v304_v2 }
  0x8a   : > { %v3342_v6 = vpop.permute.xlu2 %479 }
  0x8d   : > { %2667 = vmatmul.msk.f32.gmra.mxu0 %vm497_vm0, %v286_v7 }
  0x8e   : > { %2699 = vmatmul.msk.f32.gmra.mxu1 %vm497_vm0, %v286_v7 }
  0x8f   : > { %v3349_v8 = vpop.permute.xlu1 %494 }
  0x90   : > { %v3351_v9 = vpop.permute.xlu0 %414 }
  0x92   : > { %v3353_v10 = vpop.permute.xlu2 %384 }
  0x95   : > { %2668 = vmatmul.msk.f32.gmra.mxu0 %vm497_vm0, %v287_v11 }
  0x96   : > { %2700 = vmatmul.msk.f32.gmra.mxu1 %vm497_vm0, %v287_v11 }
  0x99   : > { %v3360_v12 = vpop.permute.xlu0 %409  ;;  %v3362_v13 = vpop.permute.xlu1 %404 }
  0x9a   : > { %v3364_v15 = vpop.permute.xlu2 %464 }
  0x9d   : > { %2669 = vmatmul.msk.f32.gmra.mxu0 %vm497_vm0, %v288_v16 }
  0x9e   : > { %2701 = vmatmul.msk.f32.gmra.mxu1 %vm497_vm0, %v288_v16 }
  0xa1   : > { %v3371_v17 = vpop.permute.xlu0 %484  ;;  %v3373_v18 = vpop.permute.xlu1 %394 }
  0xa2   : > { %v3375_v19 = vpop.permute.xlu2 %369  ;;  %v611_v20 = vpop.f32.mrf.mxu0 }
  0xa3   : > { %v724_v22 = vpop.f32.mrf.mxu1 }
  0xa5   : > { %2670 = vmatmul.msk.f32.gmra.mxu0 %vm497_vm0, %v289_v21 }
  0xa6   : > { %2702 = vmatmul.msk.f32.gmra.mxu1 %vm497_vm0, %v289_v21 }
  0xa8   : > { %v3382_v24 = vpop.f32.mrf.mxu2 }
  0xa9   : > { %v3384_v25 = vpop.permute.xlu1 %474  ;;  %v3386_v26 = vpop.permute.xlu0 %389 }
  0xaa   : > { %v450_v28 = vpop.permute.xlu2 %449  ;;  %v781_v29 = vpop.f32.mrf.mxu3 }
  0xab   : > { %v3391_v31 = vpop.f32.mrf.mxu0  ;;  %v3393_v32 = vpop.f32.mrf.mxu1 }
  0xad   : > { %2671 = vmatmul.msk.f32.gmra.mxu0 %vm497_vm0, %v290_v30 }
  0xae   : > { %2703 = vmatmul.msk.f32.gmra.mxu1 %vm497_vm0, %v290_v30 }
  0xb0   : > { %v3397_v34 = vpop.f32.mrf.mxu2 }
  0xb1   : > { %v3399_v35 = vpop.permute.xlu1 %379  ;;  %v3410_v42 = vpop.permute.xlu0 %469 }
  0xb2   : > { %v355_v37 = vpop.permute.xlu2 %354  ;;  %v3401_v38 = vpop.f32.mrf.mxu3 }
  0xb3   : > { %v3406_v40 = vpop.f32.mrf.mxu0  ;;  %v3408_v41 = vpop.f32.mrf.mxu1 }
  0xb5   : > { %2672 = vmatmul.msk.f32.gmra.mxu0 %vm497_vm0, %v291_v39 }
  0xb6   : > { %2704 = vmatmul.msk.f32.gmra.mxu1 %vm497_vm0, %v291_v39 }
  0xb8   : > { %v677_v45 = vpop.f32.mrf.mxu2 }
  0xb9   : > { %v3416_v47 = vpop.permute.xlu1 %459  ;;  %v678_v49 = vadd.f32 %v677_v45, %v450_v28  ;;  %v3424_v54 = vpop.permute.xlu0 %374 }
  0xba   : > { %v3414_v46 = vpop.permute.xlu2 %434  ;;  %v787_v53 = vpop.f32.mrf.mxu3 }
  0xbb   : > { %v733_v48 = vpop.f32.mrf.mxu1  ;;  %v620_v50 = vpop.f32.mrf.mxu0  ;;  %v3427_v55 = vadd.f32 %v781_v29, %v3414_v46  ;;  %v3430_v57 = vmul.f32 %v3420_v52, %v678_v49 }
  0xbc   : > { %v3418_v51 = vadd.f32 %v733_v48, %v355_v37  ;;  %v621_v56 = vadd.f32 %v620_v50, %v355_v37 }
  0xbd   : > { %2673 = vmatmul.msk.f32.gmra.mxu0 %vm497_vm0, %v3125_v14  ;;  %5271 = vst [vmem:[#allocation3_spill] sm:$0xff] %v3427_v55  ;;  %v3434_v58 = vmul.f32 %v3420_v52, %v3427_v55  ;;  %v1127_v61 = vand.u32 2147483647, %v3430_v57 }
  0xbe   : > { %v3437_v59 = vmul.f32 %v3420_v52, %v621_v56  ;;  %v898_v21 = vmul.f32 %v3420_v52, %v3418_v51 }
  0xbf   : > { %5272 = vst [vmem:[#allocation4_spill] sm:$0xff] %v3434_v58  ;;  %v1122_v62 = vand.u32 2147483647, %v3434_v58  ;;  %v1959_v1 = vsub.f32 0.0, %v1127_v61  ;;  %v1191_v7 = vmul.f32 0.3275911, %v1127_v61 }
  0xc0   : > { %5273 = vst [vmem:[#allocation5_spill] sm:$0xff] %v3437_v59  ;;  %v1089_v2 = vand.u32 2147483647, %v3437_v59  ;;  %v680_v29 = vpop.f32.mrf.mxu2  ;;  %v1090_v43 = vand.u32 2147483647, %v898_v21  ;;  %v3462_v58 = vmul.f32 0.5, %v678_v49 }
  0xc1   : > { %v3440_v14 = vpop.permute.xlu1 %364  ;;  %v1954_v5 = vsub.f32 0.0, %v1122_v62  ;;  %v3446_v11 = vpop.permute.xlu0 %454  ;;  %v1186_v27 = vmul.f32 0.3275911, %v1122_v62  ;;  %v2023_v30 = vmul.f32 %v1959_v1, %v1127_v61  ;;  %v1255_v37 = vadd.f32 1.0, %v1191_v7 }
  0xc2   : > { %v340_v60 = vpop.permute.xlu2 %339  ;;  %v790_v3 = vpop.f32.mrf.mxu3  ;;  %v1921_v33 = vsub.f32 0.0, %v1089_v2  ;;  %v1153_v39 = vmul.f32 0.3275911, %v1089_v2  ;;  %v681_v44 = vadd.f32 %v680_v29, %v3446_v11  ;;  %5277 = vst [vmem:[#allocation9_spill] sm:$0xff] %v3462_v58  ;;  %v3473_v49 = vmul.f32 0.5, %v621_v56 }
  0xc3   : > { %v3443_v63 = vadd.f32 %v611_v20, %v340_v60  ;;  %v3448_v16 = vadd.f32 %v790_v3, %v450_v28  ;;  %v3452_v23 = vadd.f32 %v724_v22, %v340_v60  ;;  %v2018_v36 = vmul.f32 %v1954_v5, %v1122_v62  ;;  %v736_v29 = vpop.f32.mrf.mxu1 }
  0xc4   : > { %v1250_v45 = vadd.f32 1.0, %v1186_v27  ;;  %v2131_v48 = vmul.f32 1.442695, %v2023_v30  ;;  %v1985_v50 = vmul.f32 %v1921_v33, %v1089_v2  ;;  %v1922_v60 = vsub.f32 0.0, %v1090_v43  ;;  %5278 = vst [vmem:[#allocation10_spill] sm:$0xff] %v3473_v49 }
  0xc5   : > { %5274 = vst [vmem:[#allocation6_spill] sm:$0xff] %v3443_v63  ;;  %v3456_v20 = vmul.f32 %v3420_v52, %v3443_v63  ;;  %v892_v28 = vmul.f32 %v3420_v52, %v3452_v23  ;;  %v2121_v55 = vmul.f32 1.442695, %v2018_v36  ;;  %2757 = vrcp.f32 %v1255_v37  ;;  %v623_v63 = vpop.f32.mrf.mxu0 }
  0xc6   : > { %5275 = vst [vmem:[#allocation7_spill] sm:$0xff] %v3452_v23  ;;  %v1217_v61 = vadd.f32 1.0, %v1153_v39  ;;  %v1154_v62 = vmul.f32 0.3275911, %v1090_v43  ;;  %v3465_v5 = vmul.f32 %v3420_v52, %v681_v44  ;;  %2759 = vrcp.f32 %v1250_v45 }
  0xc7   : > { %5276 = vst [vmem:[#allocation8_spill] sm:$0xff] %v3456_v20  ;;  %v1083_v22 = vand.u32 2147483647, %v3456_v20  ;;  %v1084_v1 = vand.u32 2147483647, %v892_v28  ;;  %v3469_v27 = vmul.f32 %v3420_v52, %v3448_v16  ;;  %2761 = vpow2.f32 %v2131_v48 }
  0xc8   : > { %v2055_v33 = vmul.f32 1.442695, %v1985_v50  ;;  %v1986_v36 = vmul.f32 %v1922_v60, %v1090_v43  ;;  %2763 = vpow2.f32 %v2121_v55  ;;  %vm962_vm2 = vcmp.ge.f32.partialorder %v898_v21, 0.0 }
  0xc9   : > { %v445_v3 = vpop.permute.xlu1 %444  ;;  %v1915_v7 = vsub.f32 0.0, %v1083_v22  ;;  %v360_v30 = vpop.permute.xlu0 %359  ;;  %v1147_v37 = vmul.f32 0.3275911, %v1083_v22  ;;  %v1916_v39 = vsub.f32 0.0, %v1084_v1  ;;  %v1148_v23 = vmul.f32 0.3275911, %v1084_v1 }
  0xca   : > { %v3471_v2 = vadd.f32 %v787_v53, %v445_v3  ;;  %v1129_v45 = vand.u32 2147483647, %v3465_v5  ;;  %v3477_v20 = vadd.f32 %v3397_v34, %v445_v3  ;;  %v3479_v59 = vadd.f32 %v736_v29, %v360_v30 }
  0xcb   : > { %v3481_v53 = vpop.eup %2757  ;;  %2765 = vrcp.f32 %v1217_v61  ;;  %v1218_v56 = vadd.f32 1.0, %v1154_v62  ;;  %v1979_v48 = vmul.f32 %v1915_v7, %v1083_v22  ;;  %v1128_v43 = vand.u32 2147483647, %v3469_v27 }
  0xcc   : > { %5279 = vst [vmem:[#allocation11_spill] sm:$0xff] %v3477_v20  ;;  %2767 = vpow2.f32 %v2055_v33  ;;  %v3485_v55 = vmul.f32 0.5, %v3418_v51  ;;  %v5176_v50 = vmov -1.0   ;;  %v2057_v34 = vmul.f32 1.442695, %v1986_v36  ;;  %v3491_v3 = vpop.eup %2759 }
  0xcd   : > { %5280 = vst [vmem:[#allocation12_spill] sm:$0xff] %v3481_v53  ;;  %v3489_v60 = vsel %vm962_vm2, 1.0, %v5176_v50  ;;  %vm956_vm3 = vcmp.ge.f32.partialorder %v892_v28, 0.0  ;;  %v1211_v29 = vadd.f32 1.0, %v1147_v37  ;;  %v1980_v49 = vmul.f32 %v1916_v39, %v1084_v1  ;;  %v3493_v62 = vpop.eup %2761 }
  0xce   : > { %5281 = vst [vmem:[#allocation13_spill] sm:$0xff] %v3485_v55  ;;  %v1961_v61 = vsub.f32 0.0, %v1129_v45  ;;  %v1212_v22 = vadd.f32 1.0, %v1148_v23  ;;  %v1193_v7 = vmul.f32 0.3275911, %v1129_v45  ;;  %v3497_v51 = vmul.f32 %v3420_v52, %v3477_v20  ;;  %v3501_v21 = vpop.eup %2763 }
  0xcf   : > { %5282 = vst [vmem:[#allocation14_spill] sm:$0xff] %v3489_v60  ;;  %v3499_v33 = vadd.f32 %v623_v63, %v360_v30  ;;  %2769 = vrcp.f32 %v1218_v56  ;;  %v2043_v36 = vmul.f32 1.442695, %v1979_v48  ;;  %v1192_v50 = vmul.f32 0.3275911, %v1128_v43  ;;  %v739_v56 = vpop.f32.mrf.mxu1 }
  0xd0   : > { %5283 = vst [vmem:[#allocation15_spill] sm:$0xff] %v3491_v3  ;;  %v3505_v28 = vmul.f32 %v3420_v52, %v3471_v2  ;;  %2771 = vpow2.f32 %v2057_v34  ;;  %v5288_v1 = vmov -1.0   ;;  %v3510_v23 = vmul.f32 0.5, %v681_v44  ;;  %v793_v3 = vpop.f32.mrf.mxu3 }
  0xd1   : > { %5284 = vst [vmem:[#allocation16_spill] sm:$0xff] %v3493_v62  ;;  %v3508_v37 = vsel %vm956_vm3, 1.0, %v5288_v1  ;;  %v1960_v39 = vsub.f32 0.0, %v1128_v43  ;;  %v3512_v55 = vpop.eup %2765  ;;  %2773 = vrcp.f32 %v1211_v29  ;;  %v2045_v63 = vmul.f32 1.442695, %v1980_v49 }
  0xd2   : > { %5285 = vst [vmem:[#allocation17_spill] sm:$0xff] %v3497_v51  ;;  %v2025_v30 = vmul.f32 %v1961_v61, %v1129_v45  ;;  %vm1000_vm4 = vcmp.ge.f32.partialorder %v3469_v27, 0.0  ;;  %v3515_v48 = vpop.eup %2767  ;;  %2775 = vrcp.f32 %v1212_v22  ;;  %v1125_v34 = vand.u32 2147483647, %v3497_v51 }
  0xd3   : > { %5286 = vst [vmem:[#allocation18_spill] sm:$0xff] %v3499_v33  ;;  %v3520_v44 = vmul.f32 %v3420_v52, %v3499_v33  ;;  %2777 = vpow2.f32 %v2043_v36  ;;  %v1256_v60 = vadd.f32 1.0, %v1192_v50  ;;  %v1126_v29 = vand.u32 2147483647, %v3505_v28 }
  0xd4   : > { %5287 = vst [vmem:[#allocation19_spill] sm:$0xff] %v3501_v21  ;;  %v1257_v21 = vadd.f32 1.0, %v1193_v7  ;;  %v3524_v49 = vadd.f32 %v793_v3, %v3446_v11  ;;  %v2024_v45 = vmul.f32 %v1960_v39, %v1128_v43  ;;  %v1957_v61 = vsub.f32 0.0, %v1125_v34  ;;  %v626_v7 = vpop.f32.mrf.mxu0 }
  0xd5   : > { %5289 = vst [vmem:[#allocation20_spill] sm:$0xff] %v3508_v37  ;;  %v683_v37 = vpop.f32.mrf.mxu2  ;;  %v900_v22 = vmul.f32 %v3420_v52, %v3479_v59  ;;  %2779 = vpow2.f32 %v2045_v63  ;;  %v2135_v33 = vmul.f32 1.442695, %v2025_v30  ;;  %v1958_v36 = vsub.f32 0.0, %v1126_v29 }
  0xd6   : > { %5290 = vst [vmem:[#allocation21_spill] sm:$0xff] %v3510_v23  ;;  %v3534_v50 = vadd.f32 %v683_v37, %v3416_v47  ;;  %2781 = vrcp.f32 %v1257_v21  ;;  %v3539_v11 = vmul.f32 0.5, %v3448_v16  ;;  %v1189_v43 = vmul.f32 0.3275911, %v1125_v34 }
  0xd7   : > { %5291 = vst [vmem:[#allocation22_spill] sm:$0xff] %v3512_v55  ;;  %v3531_v55 = vpop.eup %2769  ;;  %v1091_v3 = vand.u32 2147483647, %v3520_v44  ;;  %v3547_v63 = vsel %vm1000_vm4, 1.0, %v5288_v1  ;;  %2783 = vrcp.f32 %v1256_v60  ;;  %v1190_v30 = vmul.f32 0.3275911, %v1126_v29 }
  0xd8   : > { %5292 = vst [vmem:[#allocation23_spill] sm:$0xff] %v3515_v48  ;;  %v3529_v48 = vadd.f32 %v739_v56, %v3440_v14  ;;  %v3536_v58 = vpop.eup %2771  ;;  %v3550_v37 = vadd.f32 %v626_v7, %v3440_v14  ;;  %v2133_v21 = vmul.f32 1.442695, %v2024_v45  ;;  %v3555_v16 = vmul.f32 0.5, %v3471_v2 }
  0xd9   : > { %5293 = vst [vmem:[#allocation24_spill] sm:$0xff] %v3520_v44  ;;  %v3542_v39 = vpop.eup %2773  ;;  %2785 = vpow2.f32 %v2135_v33  ;;  %vm998_vm5 = vcmp.ge.f32.partialorder %v3505_v28, 0.0  ;;  %v2022_v27 = vmul.f32 %v1958_v36, %v1126_v29  ;;  %v3562_v60 = vmul.f32 %v3420_v52, %v3534_v50 }
  0xda   : > { %5294 = vst [vmem:[#allocation25_spill] sm:$0xff] %v3531_v55  ;;  %v3552_v56 = vpop.eup %2775  ;;  %v440_v55 = vpop.permute.xlu0 %439  ;;  %v1253_v14 = vadd.f32 1.0, %v1189_v43  ;;  %v1155_v7 = vmul.f32 0.3275911, %v1091_v3  ;;  %v1254_v2 = vadd.f32 1.0, %v1190_v30  ;;  %v3572_v33 = vmul.f32 %v3420_v52, %v3550_v37 }
  0xdb   : > { %5295 = vst [vmem:[#allocation26_spill] sm:$0xff] %v3536_v58  ;;  %v1092_v58 = vand.u32 2147483647, %v900_v22  ;;  %v3575_v28 = vadd.f32 %v3401_v38, %v440_v55  ;;  %2787 = vpow2.f32 %v2133_v21  ;;  %vm964_vm6 = vcmp.ge.f32.partialorder %v900_v22, 0.0 }
  0xdc   : > { %5296 = vst [vmem:[#allocation27_spill] sm:$0xff] %v3539_v11  ;;  %v2021_v11 = vmul.f32 %v1957_v61, %v1125_v34  ;;  %v3568_v34 = vmul.f32 %v3420_v52, %v3524_v49  ;;  %v3580_v61 = vsel %vm998_vm5, 1.0, %v5288_v1  ;;  %v2129_v30 = vmul.f32 1.442695, %v2022_v27 }
  0xdd   : > { %5297 = vst [vmem:[#allocation28_spill] sm:$0xff] %v3542_v39  ;;  %v3557_v39 = vpop.eup %2777  ;;  %v1924_v45 = vsub.f32 0.0, %v1092_v58  ;;  %2789 = vrcp.f32 %v1253_v14  ;;  %v1219_v38 = vadd.f32 1.0, %v1155_v7  ;;  %v3594_v27 = vmul.f32 %v3420_v52, %v3529_v48 }
  0xde   : > { %5298 = vst [vmem:[#allocation29_spill] sm:$0xff] %v3547_v63  ;;  %v1923_v63 = vsub.f32 0.0, %v1091_v3  ;;  %v2127_v36 = vmul.f32 1.442695, %v2021_v11  ;;  %2791 = vrcp.f32 %v1254_v2  ;;  %v1130_v21 = vand.u32 2147483647, %v3568_v34 }
  0xdf   : > { %5299 = vst [vmem:[#allocation30_spill] sm:$0xff] %v3552_v56  ;;  %v3564_v56 = vpop.eup %2779  ;;  %v1988_v23 = vmul.f32 %v1924_v45, %v1092_v58  ;;  %v1093_v11 = vand.u32 2147483647, %v3572_v33  ;;  %v1094_v22 = vand.u32 2147483647, %v3594_v27  ;;  %vm1002_vm7 = vcmp.ge.f32.partialorder %v3568_v34, 0.0 }
  0xe0   : > { %5300 = vst [vmem:[#allocation31_spill] sm:$0xff] %v3555_v16  ;;  %v3577_v29 = vpop.eup %2781  ;;  %v1156_v16 = vmul.f32 0.3275911, %v1092_v58  ;;  %v1987_v44 = vmul.f32 %v1923_v63, %v1091_v3  ;;  %2793 = vpow2.f32 %v2127_v36  ;;  %v1962_v63 = vsub.f32 0.0, %v1130_v21 }
  0xe1   : > { %5301 = vst [vmem:[#allocation32_spill] sm:$0xff] %v3557_v39  ;;  %v3582_v43 = vpop.eup %2783  ;;  %v3586_v39 = vadd.f32 %v3382_v24, %v440_v55  ;;  %v3601_v24 = vsel %vm964_vm6, 1.0, %v5288_v1  ;;  %v350_v55 = vpop.permute.xlu1 %349  ;;  %2795 = vpow2.f32 %v2129_v30  ;;  %v1194_v36 = vmul.f32 0.3275911, %v1130_v21 }
  0xe2   : > { %5302 = vst [vmem:[#allocation33_spill] sm:$0xff] %v3564_v56  ;;  %v1131_v56 = vand.u32 2147483647, %v3562_v60  ;;  %v3588_v62 = vpop.eup %2785  ;;  %v1220_v45 = vadd.f32 1.0, %v1156_v16  ;;  %2797 = vrcp.f32 %v1219_v38  ;;  %v2059_v2 = vmul.f32 1.442695, %v1987_v44 }
  0xe3   : > { %5303 = vst [vmem:[#allocation34_spill] sm:$0xff] %v3572_v33  ;;  %v3605_v14 = vmul.f32 %v3420_v52, %v3586_v39  ;;  %v3607_v7 = vpop.eup %2787  ;;  %v3623_v44 = vadd.f32 %v3408_v41, %v350_v55  ;;  %v2026_v38 = vmul.f32 %v1962_v63, %v1130_v21  ;;  %v1258_v41 = vadd.f32 1.0, %v1194_v36 }
  0xe4   : > { %5304 = vst [vmem:[#allocation35_spill] sm:$0xff] %v3575_v28  ;;  %v1963_v58 = vsub.f32 0.0, %v1131_v56  ;;  %v1195_v3 = vmul.f32 0.3275911, %v1131_v56  ;;  %v3613_v30 = vpop.eup %2789  ;;  %2799 = vrcp.f32 %v1220_v45  ;;  %v1158_v45 = vmul.f32 0.3275911, %v1094_v22 }
  0xe5   : > { %5305 = vst [vmem:[#allocation36_spill] sm:$0xff] %v3577_v29  ;;  %2801 = vpow2.f32 %v2059_v2  ;;  %vm966_vm8 = vcmp.ge.f32.partialorder %v3594_v27, 0.0 }
  0xe6   : > { %5306 = vst [vmem:[#allocation37_spill] sm:$0xff] %v3580_v61  ;;  %v3597_v61 = vmul.f32 0.5, %v3479_v59  ;;  %v2061_v59 = vmul.f32 1.442695, %v1988_v23  ;;  %v2027_v33 = vmul.f32 %v1963_v58, %v1131_v56  ;;  %v3625_v23 = vpop.eup %2791  ;;  %v1259_v16 = vadd.f32 1.0, %v1195_v3 }
  0xe7   : > { %5307 = vst [vmem:[#allocation38_spill] sm:$0xff] %v3582_v43  ;;  %v3616_v43 = vmul.f32 0.5, %v3534_v50  ;;  %v3631_v50 = vmul.f32 0.5, %v3524_v49  ;;  %v3634_v56 = vmul.f32 0.5, %v3550_v37  ;;  %v1157_v58 = vmul.f32 0.3275911, %v1093_v11 }
  0xe8   : > { %5308 = vst [vmem:[#allocation39_spill] sm:$0xff] %v3586_v39  ;;  %v3628_v39 = vpop.eup %2793  ;;  %2803 = vpow2.f32 %v2061_v59  ;;  %v2139_v63 = vmul.f32 1.442695, %v2027_v33  ;;  %v2137_v37 = vmul.f32 1.442695, %v2026_v38 }
  0xe9   : > { %5309 = vst [vmem:[#allocation40_spill] sm:$0xff] %v3588_v62  ;;  %v1926_v62 = vsub.f32 0.0, %v1094_v22  ;;  %2805 = vrcp.f32 %v1259_v16  ;;  %v629_v16 = vpop.f32.mrf.mxu0 }
  0xea   : > { %5310 = vst [vmem:[#allocation41_spill] sm:$0xff] %v3597_v61  ;;  %v1925_v61 = vsub.f32 0.0, %v1093_v11  ;;  %2807 = vrcp.f32 %v1258_v41 }
  0xeb   : > { %5311 = vst [vmem:[#allocation42_spill] sm:$0xff] %v3601_v24  ;;  %v3611_v24 = vadd.f32 %v3406_v40, %v350_v55  ;;  %v1123_v40 = vand.u32 2147483647, %v3605_v14  ;;  %2809 = vpow2.f32 %v2139_v63  ;;  %v3662_v63 = vmul.f32 0.5, %v3529_v48 }
  0xec   : > { %5312 = vst [vmem:[#allocation43_spill] sm:$0xff] %v3605_v14  ;;  %v1989_v55 = vmul.f32 %v1925_v61, %v1093_v11  ;;  %v896_v61 = vmul.f32 %v3420_v52, %v3623_v44  ;;  %v686_v11 = vpop.f32.mrf.mxu2  ;;  %2811 = vpow2.f32 %v2137_v37 }
  0xed   : > { %5313 = vst [vmem:[#allocation44_spill] sm:$0xff] %v3607_v7  ;;  %v3620_v7 = vmul.f32 %v3420_v52, %v3575_v28  ;;  %v3636_v28 = vpop.eup %2795  ;;  %v3640_v21 = vmul.f32 %v3420_v52, %v3611_v24  ;;  %v1187_v2 = vmul.f32 0.3275911, %v1123_v40  ;;  %v687_v41 = vadd.f32 %v686_v11, %v3364_v15 }
  0xee   : > { %5314 = vst [vmem:[#allocation45_spill] sm:$0xff] %v3611_v24  ;;  %v3642_v3 = vpop.eup %2797  ;;  %v2063_v24 = vmul.f32 1.442695, %v1989_v55  ;;  %vm960_vm9 = vcmp.ge.f32.partialorder %v896_v61, 0.0 }
  0xef   : > { %5315 = vst [vmem:[#allocation46_spill] sm:$0xff] %v3613_v30  ;;  %v1124_v49 = vand.u32 2147483647, %v3620_v7  ;;  %v1087_v59 = vand.u32 2147483647, %v3640_v21  ;;  %v3708_v27 = vsel %vm960_vm9, 1.0, %v5288_v1 }
  0xf0   : > { %5316 = vst [vmem:[#allocation47_spill] sm:$0xff] %v3616_v43 }
  0xf1   : > { %5317 = vst [vmem:[#allocation48_spill] sm:$0xff] %v3620_v7  ;;  %v1956_v36 = vsub.f32 0.0, %v1124_v49  ;;  %v3651_v7 = vpop.eup %2799 }
  0xf2   : > { %5318 = vst [vmem:[#allocation49_spill] sm:$0xff] %v3625_v23  ;;  %v1990_v23 = vmul.f32 %v1926_v62, %v1094_v22  ;;  %v1222_v62 = vadd.f32 1.0, %v1158_v45  ;;  %v1188_v22 = vmul.f32 0.3275911, %v1124_v49  ;;  %v3654_v38 = vpop.eup %2801  ;;  %v1151_v45 = vmul.f32 0.3275911, %v1087_v59 }
  0xf3   : > { %5319 = vst [vmem:[#allocation50_spill] sm:$0xff] %v3628_v39  ;;  %v3657_v55 = vpop.eup %2803 }
  0xf4   : > { %5320 = vst [vmem:[#allocation51_spill] sm:$0xff] %v3631_v50  ;;  %v796_v50 = vpop.f32.mrf.mxu3 }
  0xf5   : > { %5321 = vst [vmem:[#allocation52_spill] sm:$0xff] %v3634_v56  ;;  %v1955_v56 = vsub.f32 0.0, %v1123_v40  ;;  %v3649_v33 = vadd.f32 %v796_v50, %v3416_v47  ;;  %v1251_v47 = vadd.f32 1.0, %v1187_v2  ;;  %v2020_v50 = vmul.f32 %v1956_v36, %v1124_v49 }
  0xf6   : > { %5322 = vst [vmem:[#allocation53_spill] sm:$0xff] %v3636_v28  ;;  %v1221_v28 = vadd.f32 1.0, %v1157_v58  ;;  %v2065_v58 = vmul.f32 1.442695, %v1990_v23  ;;  %v1252_v23 = vadd.f32 1.0, %v1188_v22  ;;  %v1215_v22 = vadd.f32 1.0, %v1151_v45 }
  0xf7   : > { %5323 = vst [vmem:[#allocation54_spill] sm:$0xff] %v3640_v21  ;;  %v1088_v21 = vand.u32 2147483647, %v896_v61  ;;  %v2125_v2 = vmul.f32 1.442695, %v2020_v50  ;;  %v3677_v11 = vmul.f32 %v3420_v52, %v3649_v33  ;;  %v3696_v50 = vsel %vm966_vm8, 1.0, %v5288_v1 }
  0xf8   : > { %5324 = vst [vmem:[#allocation55_spill] sm:$0xff] %v3642_v3  ;;  %v2019_v3 = vmul.f32 %v1955_v56, %v1123_v40  ;;  %2813 = vrcp.f32 %v1221_v28  ;;  %v1919_v40 = vsub.f32 0.0, %v1087_v59  ;;  %v742_v56 = vpop.f32.mrf.mxu1 }
  0xf9   : > { %5325 = vst [vmem:[#allocation56_spill] sm:$0xff] %v3651_v7  ;;  %v3659_v7 = vpop.eup %2805  ;;  %2815 = vpow2.f32 %v2063_v24  ;;  %v1920_v37 = vsub.f32 0.0, %v1088_v21  ;;  %v3671_v24 = vmul.f32 %v3420_v52, %v687_v41  ;;  %v1152_v36 = vmul.f32 0.3275911, %v1088_v21 }
  0xfa   : > { %5326 = vst [vmem:[#allocation57_spill] sm:$0xff] %v3654_v38  ;;  %v3665_v38 = vadd.f32 %v629_v16, %v3375_v19  ;;  %2817 = vrcp.f32 %v1222_v62  ;;  %v3668_v28 = vpop.eup %2807  ;;  %v2123_v49 = vmul.f32 1.442695, %v2019_v3  ;;  %v743_v16 = vadd.f32 %v742_v56, %v3375_v19 }
  0xfb   : > { %5327 = vst [vmem:[#allocation58_spill] sm:$0xff] %v3657_v55  ;;  %2819 = vpow2.f32 %v2065_v58  ;;  %v3673_v48 = vpop.eup %2809  ;;  %v1983_v45 = vmul.f32 %v1919_v40, %v1087_v59  ;;  %v3701_v55 = vmul.f32 0.5, %v3623_v44  ;;  %v1984_v19 = vmul.f32 %v1920_v37, %v1088_v21 }
  0xfc   : > { %5328 = vst [vmem:[#allocation59_spill] sm:$0xff] %v3659_v7  ;;  %2821 = vrcp.f32 %v1251_v47  ;;  %v3679_v62 = vpop.eup %2811  ;;  %v3683_v3 = vmul.f32 %v3420_v52, %v3665_v38  ;;  %v3691_v47 = vsel %vm1002_vm7, 1.0, %v5288_v1  ;;  %v1133_v56 = vand.u32 2147483647, %v3671_v24 }
  0xfd   : > { %5329 = vst [vmem:[#allocation60_spill] sm:$0xff] %v3662_v63  ;;  %2823 = vrcp.f32 %v1252_v23  ;;  %v345_v63 = vpop.permute.xlu0 %344  ;;  %v1132_v59 = vand.u32 2147483647, %v3677_v11  ;;  %v3715_v21 = vmul.f32 %v3420_v52, %v743_v16  ;;  %vm1004_vm10 = vcmp.ge.f32.partialorder %v3677_v11, 0.0 }
  0xfe   : > { %5330 = vst [vmem:[#allocation61_spill] sm:$0xff] %v3668_v28  ;;  %v3686_v58 = vpop.eup %2813  ;;  %2825 = vpow2.f32 %v2123_v49  ;;  %v1965_v40 = vsub.f32 0.0, %v1133_v56  ;;  %v1095_v44 = vand.u32 2147483647, %v3683_v3  ;;  %v689_v49 = vpop.f32.mrf.mxu2  ;;  %v3720_v61 = vadd.f32 %v3391_v31, %v345_v63 }
  0xff   : > { %5331 = vst [vmem:[#allocation62_spill] sm:$0xff] %v3673_v48  ;;  %2827 = vpow2.f32 %v2125_v2  ;;  %v2051_v2 = vmul.f32 1.442695, %v1983_v45  ;;  %v3728_v28 = vmul.f32 0.5, %v3649_v33  ;;  %vm968_vm11 = vcmp.ge.f32.partialorder %v3715_v21, 0.0 }
 0x100   : > { %5332 = vst [vmem:[#allocation63_spill] sm:$0xff] %v3679_v62  ;;  %v3698_v62 = vpop.eup %2815  ;;  %2829 = vrcp.f32 %v1215_v22  ;;  %v1197_v22 = vmul.f32 0.3275911, %v1133_v56  ;;  %v3734_v45 = vmul.f32 %v3420_v52, %v3720_v61  ;;  %v1927_v33 = vsub.f32 0.0, %v1095_v44 }
 0x101   : > { %5333 = vst [vmem:[#allocation64_spill] sm:$0xff] %v3683_v3  ;;  %v3704_v34 = vpop.eup %2817 }
 0x102   : > { %5334 = vst [vmem:[#allocation65_spill] sm:$0xff] %v3686_v58  ;;  %v3711_v23 = vpop.eup %2819  ;;  %v632_v58 = vpop.f32.mrf.mxu0  ;;  %v1261_v3 = vadd.f32 1.0, %v1197_v22 }
 0x103   : > { %5335 = vst [vmem:[#allocation66_spill] sm:$0xff] %v3691_v47  ;;  %v1216_v47 = vadd.f32 1.0, %v1152_v36  ;;  %v3717_v37 = vpop.eup %2821  ;;  %v3723_v36 = vadd.f32 %v3393_v32, %v345_v63  ;;  %v3741_v32 = vadd.f32 %v689_v49, %v3410_v42  ;;  %v2029_v63 = vmul.f32 %v1965_v40, %v1133_v56 }
 0x104   : > { %5336 = vst [vmem:[#allocation67_spill] sm:$0xff] %v3696_v50  ;;  %v3725_v50 = vmul.f32 0.5, %v687_v41  ;;  %v1085_v56 = vand.u32 2147483647, %v3734_v45 }
 0x105   : > { %5337 = vst [vmem:[#allocation68_spill] sm:$0xff] %v3698_v62  ;;  %v3738_v31 = vmul.f32 %v3420_v52, %v3723_v36  ;;  %2831 = vrcp.f32 %v1216_v47  ;;  %v3750_v62 = vmul.f32 0.5, %v3665_v38  ;;  %v3758_v11 = vmul.f32 %v3420_v52, %v3741_v32 }
 0x106   : > { %5338 = vst [vmem:[#allocation69_spill] sm:$0xff] %v3701_v55  ;;  %v1964_v55 = vsub.f32 0.0, %v1132_v59  ;;  %2833 = vpow2.f32 %v2051_v2  ;;  %v3761_v38 = vsel %vm1004_vm10, 1.0, %v5288_v1 }
 0x107   : > { %5339 = vst [vmem:[#allocation70_spill] sm:$0xff] %v3704_v34  ;;  %v1196_v34 = vmul.f32 0.3275911, %v1132_v59  ;;  %vm958_vm12 = vcmp.ge.f32.partialorder %v3738_v31, 0.0 }
 0x108   : > { %5340 = vst [vmem:[#allocation71_spill] sm:$0xff] %v3708_v27  ;;  %v2053_v27 = vmul.f32 1.442695, %v1984_v19  ;;  %v1096_v19 = vand.u32 2147483647, %v3715_v21 }
 0x109   : > { %5341 = vst [vmem:[#allocation72_spill] sm:$0xff] %v3711_v23  ;;  %v3730_v23 = vpop.eup %2823  ;;  %v1260_v40 = vadd.f32 1.0, %v1196_v34  ;;  %v3769_v34 = vadd.f32 %v632_v58, %v3424_v54 }
 0x10a   : > { %5342 = vst [vmem:[#allocation73_spill] sm:$0xff] %v3717_v37  ;;  %v3743_v41 = vpop.eup %2825  ;;  %v1928_v47 = vsub.f32 0.0, %v1096_v19  ;;  %2835 = vpow2.f32 %v2053_v27 }
 0x10b   : > { %5343 = vst [vmem:[#allocation74_spill] sm:$0xff] %v3720_v61  ;;  %v799_v61 = vpop.f32.mrf.mxu3  ;;  %2837 = vrcp.f32 %v1261_v3 }
 0x10c   : > { %5344 = vst [vmem:[#allocation75_spill] sm:$0xff] %v3725_v50  ;;  %v3764_v2 = vadd.f32 %v799_v61, %v3364_v15  ;;  %v1992_v39 = vmul.f32 %v1928_v47, %v1096_v19  ;;  %2839 = vrcp.f32 %v1260_v40  ;;  %v1135_v15 = vand.u32 2147483647, %v3758_v11 }
 0x10d   : > { %5345 = vst [vmem:[#allocation76_spill] sm:$0xff] %v3728_v28  ;;  %v2028_v28 = vmul.f32 %v1964_v55, %v1132_v59  ;;  %v2143_v55 = vmul.f32 1.442695, %v2029_v63  ;;  %v1991_v59 = vmul.f32 %v1927_v33, %v1095_v44  ;;  %v1917_v63 = vsub.f32 0.0, %v1085_v56 }
 0x10e   : > { %5346 = vst [vmem:[#allocation77_spill] sm:$0xff] %v3730_v23  ;;  %v3746_v23 = vpop.eup %2827  ;;  %v3778_v58 = vmul.f32 %v3420_v52, %v3764_v2  ;;  %v1967_v40 = vsub.f32 0.0, %v1135_v15 }
 0x10f   : > { %5347 = vst [vmem:[#allocation78_spill] sm:$0xff] %v3734_v45  ;;  %v3752_v49 = vpop.eup %2829  ;;  %v2141_v22 = vmul.f32 1.442695, %v2028_v28  ;;  %v745_v28 = vpop.f32.mrf.mxu1  ;;  %2841 = vpow2.f32 %v2143_v55  ;;  %v1981_v47 = vmul.f32 %v1917_v63, %v1085_v56 }
 0x110   : > { %5348 = vst [vmem:[#allocation79_spill] sm:$0xff] %v3743_v41  ;;  %v1159_v41 = vmul.f32 0.3275911, %v1095_v44  ;;  %v3771_v27 = vpop.eup %2831  ;;  %v1149_v44 = vmul.f32 0.3275911, %v1085_v56  ;;  %v692_v55 = vpop.f32.mrf.mxu2  ;;  %vm1006_vm13 = vcmp.ge.f32.partialorder %v3778_v58, 0.0 }
 0x111   : > { %5349 = vst [vmem:[#allocation80_spill] sm:$0xff] %v3746_v23  ;;  %v1086_v23 = vand.u32 2147483647, %v3738_v31  ;;  %v3773_v43 = vpop.eup %2833  ;;  %2843 = vpow2.f32 %v2141_v22  ;;  %v1134_v50 = vand.u32 2147483647, %v3778_v58  ;;  %v3871_v58 = vsel %vm1006_vm13, 1.0, %v5288_v1 }
 0x112   : > { %5350 = vst [vmem:[#allocation81_spill] sm:$0xff] %v3750_v62  ;;  %v3766_v62 = vmul.f32 0.5, %v743_v16  ;;  %v1223_v45 = vadd.f32 1.0, %v1159_v41  ;;  %v2067_v16 = vmul.f32 1.442695, %v1991_v59  ;;  %v3785_v41 = vmul.f32 %v3420_v52, %v3769_v34 }
 0x113   : > { %5351 = vst [vmem:[#allocation82_spill] sm:$0xff] %v3752_v49  ;;  %v1160_v49 = vmul.f32 0.3275911, %v1096_v19  ;;  %v1918_v33 = vsub.f32 0.0, %v1086_v23  ;;  %v1150_v61 = vmul.f32 0.3275911, %v1086_v23 }
 0x114   : > { %5352 = vst [vmem:[#allocation83_spill] sm:$0xff] %v3761_v38  ;;  %v3780_v38 = vpop.eup %2835  ;;  %2845 = vrcp.f32 %v1223_v45  ;;  %v2069_v19 = vmul.f32 1.442695, %v1992_v39  ;;  %v1213_v59 = vadd.f32 1.0, %v1149_v44  ;;  %v1097_v48 = vand.u32 2147483647, %v3785_v41 }
 0x115   : > { %5353 = vst [vmem:[#allocation84_spill] sm:$0xff] %v3766_v62  ;;  %v1224_v3 = vadd.f32 1.0, %v1160_v49  ;;  %v1199_v62 = vmul.f32 0.3275911, %v1135_v15  ;;  %v3790_v22 = vpop.eup %2837  ;;  %2847 = vpow2.f32 %v2067_v16  ;;  %v1214_v49 = vadd.f32 1.0, %v1150_v61 }
 0x116   : > { %5354 = vst [vmem:[#allocation85_spill] sm:$0xff] %v3771_v27  ;;  %v1982_v27 = vmul.f32 %v1918_v33, %v1086_v23  ;;  %v3794_v45 = vpop.eup %2839  ;;  %v3799_v39 = vsel %vm968_vm11, 1.0, %v5288_v1  ;;  %v3805_v23 = vadd.f32 %v692_v55, %v3384_v25  ;;  %v2047_v63 = vmul.f32 1.442695, %v1981_v47 }
 0x117   : > { %5355 = vst [vmem:[#allocation86_spill] sm:$0xff] %v3773_v43  ;;  %v3788_v43 = vadd.f32 %v745_v28, %v3424_v54  ;;  %2849 = vrcp.f32 %v1224_v3  ;;  %v3802_v54 = vmul.f32 0.5, %v3723_v36  ;;  %v3807_v56 = vpop.eup %2841  ;;  %v2031_v44 = vmul.f32 %v1967_v40, %v1135_v15  ;;  %v802_v28 = vpop.f32.mrf.mxu3 }
 0x118   : > { %5356 = vst [vmem:[#allocation87_spill] sm:$0xff] %v3780_v38  ;;  %v635_v38 = vpop.f32.mrf.mxu0  ;;  %2851 = vpow2.f32 %v2069_v19  ;;  %v1966_v33 = vsub.f32 0.0, %v1134_v50  ;;  %v3809_v16 = vpop.eup %2843  ;;  %v2049_v21 = vmul.f32 1.442695, %v1982_v27  ;;  %v3817_v3 = vmul.f32 0.5, %v3741_v32 }
 0x119   : > { %5357 = vst [vmem:[#allocation88_spill] sm:$0xff] %v3785_v41  ;;  %2853 = vrcp.f32 %v1213_v59  ;;  %v906_v36 = vmul.f32 %v3420_v52, %v3788_v43  ;;  %v1263_v19 = vadd.f32 1.0, %v1199_v62  ;;  %v1929_v47 = vsub.f32 0.0, %v1097_v48  ;;  %v748_v55 = vpop.f32.mrf.mxu1 }
 0x11a   : > { %5358 = vst [vmem:[#allocation89_spill] sm:$0xff] %v3794_v45  ;;  %v3814_v61 = vpop.eup %2845  ;;  %2855 = vrcp.f32 %v1214_v49  ;;  %v1198_v15 = vmul.f32 0.3275911, %v1134_v50  ;;  %v3821_v40 = vmul.f32 %v3420_v52, %v3805_v23  ;;  %v3824_v31 = vadd.f32 %v802_v28, %v3410_v42 }
 0x11b   : > { %5359 = vst [vmem:[#allocation90_spill] sm:$0xff] %v3799_v39  ;;  %v3827_v27 = vadd.f32 %v635_v38, %v3399_v35  ;;  %v3829_v59 = vpop.eup %2847  ;;  %v3832_v49 = vsel %vm958_vm12, 1.0, %v5288_v1  ;;  %2857 = vpow2.f32 %v2047_v63  ;;  %v2147_v62 = vmul.f32 1.442695, %v2031_v44 }
 0x11c   : > { %5360 = vst [vmem:[#allocation91_spill] sm:$0xff] %v3802_v54  ;;  %v2030_v32 = vmul.f32 %v1966_v33, %v1134_v50  ;;  %2859 = vpow2.f32 %v2049_v21  ;;  %v1161_v42 = vmul.f32 0.3275911, %v1097_v48  ;;  %v1098_v28 = vand.u32 2147483647, %v906_v36 }
 0x11d   : > { %5361 = vst [vmem:[#allocation92_spill] sm:$0xff] %v3807_v56  ;;  %v3834_v54 = vpop.eup %2849  ;;  %2861 = vrcp.f32 %v1263_v19  ;;  %v3842_v38 = vmul.f32 0.5, %v3769_v34  ;;  %v1993_v45 = vmul.f32 %v1929_v47, %v1097_v48  ;;  %v3846_v63 = vmul.f32 %v3420_v52, %v3824_v31  ;;  %v695_v19 = vpop.f32.mrf.mxu2 }
 0x11e   : > { %5362 = vst [vmem:[#allocation93_spill] sm:$0xff] %v3809_v16  ;;  %v3837_v16 = vmul.f32 0.5, %v3764_v2  ;;  %v3839_v39 = vpop.eup %2851  ;;  %v1262_v44 = vadd.f32 1.0, %v1198_v15  ;;  %v1137_v33 = vand.u32 2147483647, %v3821_v40  ;;  %v3853_v2 = vmul.f32 %v3420_v52, %v3827_v27 }
 0x11f   : > { %5363 = vst [vmem:[#allocation94_spill] sm:$0xff] %v3814_v61  ;;  %v3848_v50 = vpop.eup %2853  ;;  %v3856_v21 = vadd.f32 %v748_v55, %v3399_v35  ;;  %2863 = vpow2.f32 %v2147_v62  ;;  %v2145_v48 = vmul.f32 1.442695, %v2030_v32  ;;  %v1930_v47 = vsub.f32 0.0, %v1098_v28 }
 0x120   : > { %5364 = vst [vmem:[#allocation95_spill] sm:$0xff] %v3817_v3  ;;  %v638_v34 = vpop.f32.mrf.mxu0  ;;  %vm970_vm14 = vcmp.ge.f32.partialorder %v906_v36, 0.0  ;;  %v1162_v15 = vmul.f32 0.3275911, %v1098_v28  ;;  %v1099_v35 = vand.u32 2147483647, %v3853_v2  ;;  %v3866_v55 = vadd.f32 %v695_v19, %v3342_v6 }
 0x121   : > { %5365 = vst [vmem:[#allocation96_spill] sm:$0xff] %v3829_v59  ;;  %2865 = vrcp.f32 %v1262_v44  ;;  %v3874_v62 = vmul.f32 0.5, %v3788_v43  ;;  %v3878_v32 = vmul.f32 %v3420_v52, %v3856_v21  ;;  %v3883_v19 = vmul.f32 0.5, %v3805_v23 }
 0x122   : > { %5366 = vst [vmem:[#allocation97_spill] sm:$0xff] %v3832_v49  ;;  %v3858_v49 = vpop.eup %2855  ;;  %2867 = vpow2.f32 %v2145_v48  ;;  %v3887_v44 = vsel %vm970_vm14, 1.0, %v5288_v1  ;;  %v1201_v43 = vmul.f32 0.3275911, %v1137_v33  ;;  %v1226_v61 = vadd.f32 1.0, %v1162_v15 }
 0x123   : > { %5367 = vst [vmem:[#allocation98_spill] sm:$0xff] %v3834_v54  ;;  %v3861_v54 = vpop.eup %2857  ;;  %v1931_v41 = vsub.f32 0.0, %v1099_v35  ;;  %v1100_v48 = vand.u32 2147483647, %v3878_v32  ;;  %v3900_v36 = vadd.f32 %v638_v34, %v3353_v10  ;;  %vm1008_vm15 = vcmp.ge.f32.partialorder %v3846_v63, 0.0 }
 0x124   : > { %5368 = vst [vmem:[#allocation99_spill] sm:$0xff] %v3837_v16  ;;  %v1225_v16 = vadd.f32 1.0, %v1161_v42  ;;  %v1994_v42 = vmul.f32 %v1930_v47, %v1098_v28  ;;  %v3893_v28 = vmul.f32 %v3420_v52, %v3866_v55  ;;  %v3906_v47 = vmul.f32 0.5, %v3827_v27 }
 0x125   : > { %5369 = vst [vmem:[#allocation100_spill] sm:$0xff] %v3839_v39  ;;  %v1969_v39 = vsub.f32 0.0, %v1137_v33  ;;  %v1163_v37 = vmul.f32 0.3275911, %v1099_v35  ;;  %v1995_v34 = vmul.f32 %v1931_v41, %v1099_v35  ;;  %v1932_v56 = vsub.f32 0.0, %v1100_v48 }
 0x126   : > { %5370 = vst [vmem:[#allocation101_spill] sm:$0xff] %v3842_v38  ;;  %v1136_v38 = vand.u32 2147483647, %v3846_v63  ;;  %2869 = vrcp.f32 %v1225_v16  ;;  %v3929_v41 = vsel %vm1008_vm15, 1.0, %v5288_v1  ;;  %v3939_v63 = vmul.f32 0.5, %v3856_v21 }
 0x127   : > { %5371 = vst [vmem:[#allocation102_spill] sm:$0xff] %v3848_v50  ;;  %v2071_v50 = vmul.f32 1.442695, %v1993_v45  ;;  %vm972_vm0 = vcmp.ge.f32.partialorder %v3878_v32, 0.0 }
 0x128   : > { %5372 = vst [vmem:[#allocation103_spill] sm:$0xff] %v3853_v2  ;;  %v1200_v23 = vmul.f32 0.3275911, %v1136_v38 }
 0x129   : > { %5373 = vst [vmem:[#allocation104_spill] sm:$0xff] %v3858_v49  ;;  %v3868_v49 = vpop.eup %2859  ;;  %2871 = vpow2.f32 %v2071_v50 }
 0x12a   : > { %5374 = vst [vmem:[#allocation105_spill] sm:$0xff] %v3861_v54  ;;  %v3880_v45 = vpop.eup %2861  ;;  %v1968_v54 = vsub.f32 0.0, %v1136_v38  ;;  %2873 = vrcp.f32 %v1226_v61  ;;  %v1264_v27 = vadd.f32 1.0, %v1200_v23 }
 0x12b   : > { %5375 = vst [vmem:[#allocation106_spill] sm:$0xff] %v3868_v49  ;;  %v805_v49 = vpop.f32.mrf.mxu3  ;;  %v3889_v59 = vpop.eup %2863 }
 0x12c   : > { %5376 = vst [vmem:[#allocation107_spill] sm:$0xff] %v3871_v58  ;;  %v2033_v58 = vmul.f32 %v1969_v39, %v1137_v33  ;;  %v3897_v16 = vadd.f32 %v805_v49, %v3384_v25  ;;  %v2073_v39 = vmul.f32 1.442695, %v1994_v42  ;;  %v3903_v33 = vmul.f32 0.5, %v3824_v31  ;;  %v3908_v15 = vpop.eup %2865  ;;  %v641_v25 = vpop.f32.mrf.mxu0 }
 0x12d   : > { %5377 = vst [vmem:[#allocation108_spill] sm:$0xff] %v3874_v62  ;;  %v751_v62 = vpop.f32.mrf.mxu1  ;;  %v2032_v50 = vmul.f32 %v1968_v54, %v1136_v38  ;;  %v3911_v49 = vpop.eup %2867  ;;  %v1139_v42 = vand.u32 2147483647, %v3893_v28  ;;  %v3916_v54 = vmul.f32 %v3420_v52, %v3900_v36  ;;  %v1164_v38 = vmul.f32 0.3275911, %v1100_v48 }
 0x12e   : > { %5378 = vst [vmem:[#allocation109_spill] sm:$0xff] %v3883_v19  ;;  %v2151_v2 = vmul.f32 1.442695, %v2033_v58  ;;  %v3918_v31 = vpop.eup %2869  ;;  %v3922_v58 = vmul.f32 %v3420_v52, %v3897_v16  ;;  %2875 = vpow2.f32 %v2073_v39  ;;  %v3933_v23 = vadd.f32 %v751_v62, %v3353_v10 }
 0x12f   : > { %5379 = vst [vmem:[#allocation110_spill] sm:$0xff] %v3887_v44  ;;  %v1265_v44 = vadd.f32 1.0, %v1201_v43  ;;  %v698_v43 = vpop.f32.mrf.mxu2  ;;  %v2149_v35 = vmul.f32 1.442695, %v2032_v50  ;;  %v1101_v61 = vand.u32 2147483647, %v3916_v54 }
 0x130   : > { %5380 = vst [vmem:[#allocation111_spill] sm:$0xff] %v3889_v59  ;;  %v1228_v39 = vadd.f32 1.0, %v1164_v38  ;;  %v1138_v50 = vand.u32 2147483647, %v3922_v58  ;;  %v1203_v10 = vmul.f32 0.3275911, %v1139_v42 }
 0x131   : > { %5381 = vst [vmem:[#allocation112_spill] sm:$0xff] %v3903_v33  ;;  %v3924_v33 = vpop.eup %2871  ;;  %2877 = vrcp.f32 %v1265_v44  ;;  %vm1010_vm1 = vcmp.ge.f32.partialorder %v3922_v58, 0.0 }
 0x132   : > { %5382 = vst [vmem:[#allocation113_spill] sm:$0xff] %v3906_v47  ;;  %2879 = vpow2.f32 %v2151_v2  ;;  %v2075_v47 = vmul.f32 1.442695, %v1995_v34  ;;  %v3943_v2 = vpop.eup %2873  ;;  %v910_v34 = vmul.f32 %v3420_v52, %v3933_v23 }
 0x133   : > { %5383 = vst [vmem:[#allocation114_spill] sm:$0xff] %v3908_v15  ;;  %v1227_v15 = vadd.f32 1.0, %v1163_v37  ;;  %2881 = vrcp.f32 %v1264_v27  ;;  %v808_v44 = vpop.f32.mrf.mxu3 }
 0x134   : > { %5384 = vst [vmem:[#allocation115_spill] sm:$0xff] %v3911_v49  ;;  %v1971_v49 = vsub.f32 0.0, %v1139_v42  ;;  %2883 = vpow2.f32 %v2149_v35  ;;  %v3947_v21 = vpop.eup %2875  ;;  %v809_v32 = vadd.f32 %v808_v44, %v3342_v6  ;;  %v3962_v35 = vpop.f32.mrf.mxu0  ;;  %vm974_vm2 = vcmp.ge.f32.partialorder %v910_v34, 0.0 }
 0x135   : > { %5385 = vst [vmem:[#allocation116_spill] sm:$0xff] %v3916_v54  ;;  %v754_v37 = vpop.f32.mrf.mxu1  ;;  %2885 = vrcp.f32 %v1227_v15  ;;  %v3960_v15 = vmul.f32 0.5, %v3866_v55  ;;  %v3973_v55 = vmul.f32 0.5, %v3897_v16  ;;  %v3992_v16 = vsel %vm1010_vm1, 1.0, %v5288_v1 }
 0x136   : > { %5386 = vst [vmem:[#allocation117_spill] sm:$0xff] %v3918_v31  ;;  %v1996_v31 = vmul.f32 %v1932_v56, %v1100_v48  ;;  %v2035_v62 = vmul.f32 %v1971_v49, %v1139_v42  ;;  %v1970_v56 = vsub.f32 0.0, %v1138_v50  ;;  %v1933_v48 = vsub.f32 0.0, %v1101_v61 }
 0x137   : > { %5387 = vst [vmem:[#allocation118_spill] sm:$0xff] %v3924_v33  ;;  %v3936_v33 = vadd.f32 %v698_v43, %v3371_v17  ;;  %2887 = vpow2.f32 %v2075_v47  ;;  %v3954_v43 = vpop.eup %2877  ;;  %v3957_v49 = vsel %vm972_vm0, 1.0, %v5288_v1  ;;  %v1202_v42 = vmul.f32 0.3275911, %v1138_v50 }
 0x138   : > { %5388 = vst [vmem:[#allocation119_spill] sm:$0xff] %v3929_v41  ;;  %v2077_v27 = vmul.f32 1.442695, %v1996_v31  ;;  %2889 = vrcp.f32 %v1228_v39  ;;  %v3964_v47 = vpop.eup %2879  ;;  %v1267_v31 = vadd.f32 1.0, %v1203_v10  ;;  %v2155_v41 = vmul.f32 1.442695, %v2035_v62 }
 0x139   : > { %5389 = vst [vmem:[#allocation120_spill] sm:$0xff] %v3939_v63  ;;  %v3951_v38 = vmul.f32 %v3420_v52, %v3936_v33  ;;  %v1165_v63 = vmul.f32 0.3275911, %v1101_v61  ;;  %v3967_v6 = vpop.eup %2881  ;;  %v2034_v44 = vmul.f32 %v1970_v56, %v1138_v50  ;;  %v642_v39 = vadd.f32 %v641_v25, %v3386_v26 }
 0x13a   : > { %5390 = vst [vmem:[#allocation121_spill] sm:$0xff] %v3943_v2  ;;  %v1102_v2 = vand.u32 2147483647, %v910_v34  ;;  %2891 = vpow2.f32 %v2077_v27  ;;  %v3977_v10 = vmul.f32 %v3420_v52, %v809_v32  ;;  %v1266_v3 = vadd.f32 1.0, %v1202_v42 }
 0x13b   : > { %5391 = vst [vmem:[#allocation122_spill] sm:$0xff] %v3947_v21  ;;  %v1997_v21 = vmul.f32 %v1933_v48, %v1101_v61  ;;  %v1141_v54 = vand.u32 2147483647, %v3951_v38  ;;  %v3982_v61 = vmul.f32 %v3420_v52, %v642_v39  ;;  %v3985_v25 = vadd.f32 %v754_v37, %v3386_v26  ;;  %v701_v26 = vpop.f32.mrf.mxu2 }
 0x13c   : > { %5392 = vst [vmem:[#allocation123_spill] sm:$0xff] %v3957_v49  ;;  %v3970_v49 = vpop.eup %2883  ;;  %2893 = vrcp.f32 %v1267_v31  ;;  %v3995_v56 = vmul.f32 0.5, %v3900_v36  ;;  %v1229_v48 = vadd.f32 1.0, %v1165_v63  ;;  %v2153_v42 = vmul.f32 1.442695, %v2034_v44 }
 0x13d   : > { %5393 = vst [vmem:[#allocation124_spill] sm:$0xff] %v3960_v15  ;;  %v3979_v62 = vpop.eup %2885  ;;  %2895 = vpow2.f32 %v2155_v41  ;;  %v757_v37 = vpop.f32.mrf.mxu1  ;;  %v1140_v31 = vand.u32 2147483647, %v3977_v10  ;;  %v1103_v58 = vand.u32 2147483647, %v3982_v61  ;;  %v4006_v63 = vmul.f32 %v3420_v52, %v3985_v25 }
 0x13e   : > { %5394 = vst [vmem:[#allocation125_spill] sm:$0xff] %v3964_v47  ;;  %v3987_v50 = vpop.eup %2887  ;;  %2897 = vrcp.f32 %v1266_v3  ;;  %v811_v41 = vpop.f32.mrf.mxu3  ;;  %v4011_v34 = vmul.f32 0.5, %v3936_v33  ;;  %v4017_v3 = vsel %vm974_vm2, 1.0, %v5288_v1  ;;  %vm1012_vm3 = vcmp.ge.f32.partialorder %v3977_v10, 0.0 }
 0x13f   : > { %5395 = vst [vmem:[#allocation126_spill] sm:$0xff] %v3967_v6  ;;  %v1934_v6 = vsub.f32 0.0, %v1102_v2  ;;  %v3997_v27 = vpop.eup %2889  ;;  %2899 = vrcp.f32 %v1229_v48  ;;  %v1972_v44 = vsub.f32 0.0, %v1140_v31  ;;  %v1935_v33 = vsub.f32 0.0, %v1103_v58 }
 0x140   : > { %5396 = vst [vmem:[#allocation127_spill] sm:$0xff] %v3970_v49  ;;  %v1166_v49 = vmul.f32 0.3275911, %v1102_v2  ;;  %2901 = vpow2.f32 %v2153_v42  ;;  %v1104_v42 = vand.u32 2147483647, %v4006_v63  ;;  %vm976_vm4 = vcmp.ge.f32.partialorder %v4006_v63, 0.0 }
 0x141   : > { %5397 = vst [vmem:[#allocation128_spill] sm:$0xff] %v3973_v55  ;;  %v2079_v55 = vmul.f32 1.442695, %v1997_v21  ;;  %v1998_v36 = vmul.f32 %v1934_v6, %v1102_v2  ;;  %v4008_v21 = vpop.eup %2891  ;;  %v4019_v2 = vmul.f32 0.5, %v809_v32  ;;  %v4021_v6 = vpop.f32.mrf.mxu0  ;;  %v2036_v32 = vmul.f32 %v1972_v44, %v1140_v31 }
 0x142   : > { %5398 = vst [vmem:[#allocation129_spill] sm:$0xff] %v3979_v62  ;;  %v1230_v48 = vadd.f32 1.0, %v1166_v49  ;;  %v645_v49 = vadd.f32 %v3962_v35, %v3373_v18  ;;  %v1999_v15 = vmul.f32 %v1935_v33, %v1103_v58  ;;  %v4051_v35 = vsel %vm1012_vm3, 1.0, %v5288_v1 }
 0x143   : > { %5399 = vst [vmem:[#allocation130_spill] sm:$0xff] %v3982_v61  ;;  %2903 = vpow2.f32 %v2079_v55  ;;  %v2081_v62 = vmul.f32 1.442695, %v1998_v36  ;;  %v1167_v36 = vmul.f32 0.3275911, %v1103_v58  ;;  %v4062_v33 = vadd.f32 %v757_v37, %v3373_v18 }
 0x144   : > { %5400 = vst [vmem:[#allocation131_spill] sm:$0xff] %v3987_v50  ;;  %v1973_v50 = vsub.f32 0.0, %v1141_v54  ;;  %2905 = vrcp.f32 %v1230_v48  ;;  %v2157_v48 = vmul.f32 1.442695, %v2036_v32  ;;  %v704_v32 = vpop.f32.mrf.mxu2  ;;  %v4104_v20 = vmul.f32 0.5, %v645_v49 }
 0x145   : > { %5401 = vst [vmem:[#allocation132_spill] sm:$0xff] %v3992_v16  ;;  %v4002_v16 = vmul.f32 0.5, %v3933_v23  ;;  %v1205_v23 = vmul.f32 0.3275911, %v1141_v54  ;;  %2907 = vpow2.f32 %v2081_v62  ;;  %v4053_v44 = vpop.f32.mrf.mxu1  ;;  %v1231_v62 = vadd.f32 1.0, %v1167_v36 }
 0x146   : > { %5402 = vst [vmem:[#allocation133_spill] sm:$0xff] %v3995_v56  ;;  %vm1013_vm14 = vcmp.ge.f32.partialorder %v3951_v38, 0.0  ;;  %vm1011_vm0 = vcmp.ge.f32.partialorder %v3893_v28, 0.0  ;;  %vm1009_vm1 = vcmp.ge.f32.partialorder %v3821_v40, 0.0  ;;  %vm1007_vm2 = vcmp.ge.f32.partialorder %v3758_v11, 0.0 }
 0x147   : > { %5403 = vst [vmem:[#allocation134_spill] sm:$0xff] %v3997_v27  ;;  %v4014_v27 = vadd.f32 %v701_v26, %v3319_v0  ;;  %v1204_v26 = vmul.f32 0.3275911, %v1140_v31  ;;  %v1269_v55 = vadd.f32 1.0, %v1205_v23  ;;  %vm1005_vm3 = vcmp.ge.f32.partialorder %v3671_v24, 0.0 }
 0x148   : > { %5404 = vst [vmem:[#allocation135_spill] sm:$0xff] %v4002_v16  ;;  %v4023_v16 = vpop.eup %2893 }
 0x149   : > { %5405 = vst [vmem:[#allocation136_spill] sm:$0xff] %v4008_v21  ;;  %v2037_v21 = vmul.f32 %v1973_v50, %v1141_v54  ;;  %v4025_v56 = vpop.eup %2895  ;;  %v4038_v50 = vmul.f32 0.5, %v642_v39  ;;  %v1268_v39 = vadd.f32 1.0, %v1204_v26  ;;  %2909 = vrcp.f32 %v1269_v55  ;;  %v814_v26 = vpop.f32.mrf.mxu3 }
 0x14a   : > { %5406 = vst [vmem:[#allocation137_spill] sm:$0xff] %v4011_v34  ;;  %v4036_v54 = vpop.eup %2897  ;;  %v4070_v18 = vpop.f32.mrf.mxu0  ;;  %v4075_v55 = vmul.f32 0.5, %v3985_v25  ;;  %v4089_v25 = vmul.f32 0.5, %v4014_v27 }
 0x14b   : > { %5407 = vst [vmem:[#allocation138_spill] sm:$0xff] %v4017_v3  ;;  %v4030_v3 = vmul.f32 %v3420_v52, %v4014_v27  ;;  %v4041_v30 = vpop.eup %2899  ;;  %v2159_v19 = vmul.f32 1.442695, %v2037_v21  ;;  %v4059_v21 = vmul.f32 %v3420_v52, %v645_v49 }
 0x14c   : > { %5408 = vst [vmem:[#allocation139_spill] sm:$0xff] %v4019_v2  ;;  %v812_v2 = vadd.f32 %v811_v41, %v3371_v17  ;;  %v4046_v17 = vpop.eup %2901  ;;  %v1936_v41 = vsub.f32 0.0, %v1104_v42 }
 0x14d   : > { %5409 = vst [vmem:[#allocation140_spill] sm:$0xff] %v4025_v56  ;;  %v1143_v61 = vand.u32 2147483647, %v4030_v3  ;;  %v4055_v23 = vpop.eup %2903  ;;  %2911 = vpow2.f32 %v2159_v19  ;;  %v4080_v19 = vsel %vm976_vm4, 1.0, %v5288_v1  ;;  %vm1015_vm15 = vcmp.ge.f32.partialorder %v4030_v3, 0.0 }
 0x14e   : > { %5410 = vst [vmem:[#allocation141_spill] sm:$0xff] %v4036_v54  ;;  %v4044_v31 = vmul.f32 %v3420_v52, %v812_v2  ;;  %v1105_v54 = vand.u32 2147483647, %v4059_v21  ;;  %2913 = vrcp.f32 %v1268_v39  ;;  %v4072_v37 = vpop.eup %2905  ;;  %vm1003_vm4 = vcmp.ge.f32.partialorder %v3562_v60, 0.0 }
 0x14f   : > { %5411 = vst [vmem:[#allocation142_spill] sm:$0xff] %v4038_v50  ;;  %v1975_v10 = vsub.f32 0.0, %v1143_v61  ;;  %v2000_v50 = vmul.f32 %v1936_v41, %v1104_v42  ;;  %2915 = vpow2.f32 %v2157_v48  ;;  %v4086_v41 = vadd.f32 %v704_v32, %v3349_v8 }
 0x150   : > { %5412 = vst [vmem:[#allocation143_spill] sm:$0xff] %v4041_v30  ;;  %v1142_v58 = vand.u32 2147483647, %v4044_v31  ;;  %v4068_v30 = vmul.f32 %v3420_v52, %v4062_v33  ;;  %2917 = vrcp.f32 %v1231_v62  ;;  %vm1014_vm5 = vcmp.ge.f32.partialorder %v4044_v31, 0.0 }
 0x151   : > { %5413 = vst [vmem:[#allocation144_spill] sm:$0xff] %v4046_v17  ;;  %v2083_v17 = vmul.f32 1.442695, %v1999_v15  ;;  %v2039_v36 = vmul.f32 %v1975_v10, %v1143_v61  ;;  %v2085_v63 = vmul.f32 1.442695, %v2000_v50  ;;  %v4099_v32 = vmul.f32 %v3420_v52, %v4086_v41 }
 0x152   : > { %5414 = vst [vmem:[#allocation145_spill] sm:$0xff] %v4051_v35  ;;  %v1168_v35 = vmul.f32 0.3275911, %v1104_v42  ;;  %v1974_v15 = vsub.f32 0.0, %v1142_v58  ;;  %v4082_v42 = vpop.eup %2907  ;;  %v1106_v39 = vand.u32 2147483647, %v4068_v30 }
 0x153   : > { %5415 = vst [vmem:[#allocation146_spill] sm:$0xff] %v4055_v23  ;;  %v1207_v23 = vmul.f32 0.3275911, %v1143_v61  ;;  %2919 = vpow2.f32 %v2083_v17  ;;  %v815_v17 = vadd.f32 %v814_v26, %v3319_v0  ;;  %v1169_v50 = vmul.f32 0.3275911, %v1105_v54 }
 0x154   : > { %5416 = vst [vmem:[#allocation147_spill] sm:$0xff] %v4059_v21  ;;  %v1232_v48 = vadd.f32 1.0, %v1168_v35  ;;  %v4093_v21 = vmul.f32 0.5, %v812_v2  ;;  %v2038_v61 = vmul.f32 %v1974_v15, %v1142_v58  ;;  %v1938_v10 = vsub.f32 0.0, %v1106_v39 }
 0x155   : > { %5417 = vst [vmem:[#allocation148_spill] sm:$0xff] %v4072_v37  ;;  %v4091_v37 = vpop.eup %2909  ;;  %v2163_v35 = vmul.f32 1.442695, %v2039_v36  ;;  %v648_v2 = vadd.f32 %v4021_v6, %v3334_v4  ;;  %v1145_v15 = vand.u32 2147483647, %v4099_v32  ;;  %v952_v36 = vmul.f32 %v3420_v52, %v815_v17 }
 0x156   : > { %5418 = vst [vmem:[#allocation149_spill] sm:$0xff] %v4075_v55  ;;  %v1937_v55 = vsub.f32 0.0, %v1105_v54  ;;  %v4095_v62 = vpop.eup %2911  ;;  %2921 = vrcp.f32 %v1232_v48  ;;  %v1170_v49 = vmul.f32 0.3275911, %v1106_v39  ;;  %v2161_v6 = vmul.f32 1.442695, %v2038_v61 }
 0x157   : > { %5419 = vst [vmem:[#allocation150_spill] sm:$0xff] %v4080_v19  ;;  %v1271_v19 = vadd.f32 1.0, %v1207_v23  ;;  %v4102_v27 = vpop.eup %2913  ;;  %v4108_v23 = vpop.f32.mrf.mxu1  ;;  %2923 = vpow2.f32 %v2085_v63  ;;  %v2002_v53 = vmul.f32 %v1938_v10, %v1106_v39  ;;  %v761_v48 = vadd.f32 %v4053_v44, %v3334_v4 }
 0x158   : > { %5420 = vst [vmem:[#allocation151_spill] sm:$0xff] %v4082_v42  ;;  %v1206_v42 = vmul.f32 0.3275911, %v1142_v58  ;;  %v2001_v58 = vmul.f32 %v1937_v55, %v1105_v54  ;;  %v1233_v54 = vadd.f32 1.0, %v1169_v50  ;;  %v1977_v55 = vsub.f32 0.0, %v1145_v15  ;;  %v4124_v63 = vpop.f32.mrf.mxu0 }
 0x159   : > { %5421 = vst [vmem:[#allocation152_spill] sm:$0xff] %v4093_v21  ;;  %v4110_v21 = vpop.eup %2915  ;;  %2925 = vrcp.f32 %v1271_v19  ;;  %vm978_vm6 = vcmp.ge.f32.partialorder %v4068_v30, 0.0  ;;  %v4131_v19 = vsel %vm1014_vm5, 1.0, %v5288_v1  ;;  %v1234_v4 = vadd.f32 1.0, %v1170_v49 }
 0x15a   : > { %5422 = vst [vmem:[#allocation153_spill] sm:$0xff] %v4102_v27  ;;  %v4114_v0 = vpop.eup %2917  ;;  %v1270_v26 = vadd.f32 1.0, %v1206_v42  ;;  %v817_v27 = vpop.f32.mrf.mxu3  ;;  %2927 = vpow2.f32 %v2163_v35  ;;  %v2087_v42 = vmul.f32 1.442695, %v2001_v58  ;;  %v1144_v44 = vand.u32 2147483647, %v952_v36 }
 0x15b   : > { %5423 = vst [vmem:[#allocation154_spill] sm:$0xff] %v4104_v20  ;;  %v4117_v20 = vpop.eup %2919  ;;  %v4136_v61 = vmul.f32 0.5, %v4062_v33  ;;  %v2089_v10 = vmul.f32 1.442695, %v2002_v53  ;;  %v4139_v30 = vmul.f32 %v3420_v52, %v761_v48  ;;  %v2041_v31 = vmul.f32 %v1977_v55, %v1145_v15 }
 0x15c   : > { %5424 = vst [vmem:[#allocation155_spill] sm:$0xff] %v4110_v21  ;;  %v4122_v21 = vmul.f32 %v3420_v52, %v648_v2  ;;  %2929 = vrcp.f32 %v1270_v26  ;;  %v4133_v39 = vpop.eup %2921  ;;  %vm1016_vm7 = vcmp.ge.f32.partialorder %v952_v36, 0.0  ;;  %v4155_v26 = vmul.f32 0.5, %v4086_v41 }
 0x15d   : > { %5425 = vst [vmem:[#allocation156_spill] sm:$0xff] %v4114_v0  ;;  %v1209_v0 = vmul.f32 0.3275911, %v1145_v15  ;;  %2931 = vpow2.f32 %v2161_v6  ;;  %v4141_v35 = vpop.eup %2923  ;;  %v1976_v49 = vsub.f32 0.0, %v1144_v44  ;;  %v1108_v6 = vand.u32 2147483647, %v4139_v30 }
 0x15e   : > { %5426 = vst [vmem:[#allocation157_spill] sm:$0xff] %v4117_v20  ;;  %v818_v20 = vadd.f32 %v817_v27, %v3349_v8  ;;  %2933 = vrcp.f32 %v1233_v54  ;;  %v4144_v8 = vsel %vm978_vm6, 1.0, %v5288_v1  ;;  %v1107_v27 = vand.u32 2147483647, %v4122_v21 }
 0x15f   : > { %5427 = vst [vmem:[#allocation158_spill] sm:$0xff] %v4122_v21  ;;  %v4147_v50 = vpop.eup %2925  ;;  %2935 = vpow2.f32 %v2087_v42  ;;  %v1273_v58 = vadd.f32 1.0, %v1209_v0  ;;  %v766_v15 = vpop.f32.mrf.mxu1  ;;  %v4158_v54 = vmul.f32 0.5, %v815_v17  ;;  %v1208_v55 = vmul.f32 0.3275911, %v1144_v44 }
 0x160   : > { %5428 = vst [vmem:[#allocation159_spill] sm:$0xff] %v4131_v19  ;;  %v4150_v33 = vmul.f32 %v3420_v52, %v818_v20  ;;  %v4152_v53 = vpop.eup %2927  ;;  %2937 = vrcp.f32 %v1234_v4  ;;  %v4160_v42 = vmul.f32 0.5, %v648_v2  ;;  %v2167_v36 = vmul.f32 1.442695, %v2041_v31 }
 0x161   : > { %5429 = vst [vmem:[#allocation160_spill] sm:$0xff] %v4133_v39  ;;  %2939 = vpow2.f32 %v2089_v10  ;;  %v4165_v19 = vsel %vm1016_vm7, 1.0, %v5288_v1  ;;  %v1939_v4 = vsub.f32 0.0, %v1107_v27  ;;  %v4172_v10 = vmul.f32 0.5, %v818_v20 }
 0x162   : > { %5430 = vst [vmem:[#allocation161_spill] sm:$0xff] %v4136_v61  ;;  %v4162_v0 = vpop.eup %2929  ;;  %v1146_v41 = vand.u32 2147483647, %v4150_v33  ;;  %2941 = vrcp.f32 %v1273_v58  ;;  %v4176_v17 = vadd.f32 %v4070_v18, %v3362_v13  ;;  %v2040_v31 = vmul.f32 %v1976_v49, %v1144_v44 }
 0x163   : > { %5431 = vst [vmem:[#allocation162_spill] sm:$0xff] %v4141_v35  ;;  %v4168_v61 = vpop.eup %2931  ;;  %v1171_v58 = vmul.f32 0.3275911, %v1107_v27  ;;  %2943 = vpow2.f32 %v2167_v36  ;;  %v2003_v44 = vmul.f32 %v1939_v4, %v1107_v27  ;;  %vm980_vm8 = vcmp.ge.f32.partialorder %v4139_v30, 0.0  ;;  %v4205_v27 = vpop.permute.xlu1 %429 }
 0x164   : > { %5432 = vst [vmem:[#allocation163_spill] sm:$0xff] %v4144_v8  ;;  %v4170_v8 = vmul.f32 0.5, %v761_v48  ;;  %v4178_v2 = vpop.eup %2933  ;;  %v1210_v35 = vmul.f32 0.3275911, %v1146_v41  ;;  %v1272_v48 = vadd.f32 1.0, %v1208_v55  ;;  %v1978_v20 = vsub.f32 0.0, %v1146_v41 }
 0x165   : > { %5433 = vst [vmem:[#allocation164_spill] sm:$0xff] %v4158_v54  ;;  %v1940_v54 = vsub.f32 0.0, %v1108_v6  ;;  %v1235_v4 = vadd.f32 1.0, %v1171_v58  ;;  %v4210_v21 = vsel %vm980_vm8, 1.0, %v5288_v1  ;;  %vm1018_vm9 = vcmp.ge.f32.partialorder %v4150_v33, 0.0 }
 0x166   : > { %5434 = vst [vmem:[#allocation165_spill] sm:$0xff] %v4160_v42  ;;  %v1274_v49 = vadd.f32 1.0, %v1210_v35  ;;  %v4202_v42 = vadd.f32 %v4124_v63, %v3360_v12  ;;  %vm1017_vm12 = vcmp.ge.f32.partialorder %v4099_v32, 0.0  ;;  %vm1001_vm5 = vcmp.ge.f32.partialorder %v3465_v5, 0.0 }
 0x167   : > { %5435 = vst [vmem:[#allocation166_spill] sm:$0xff] %v4162_v0  ;;  %v656_v0 = vpop.f32.mrf.mxu0  ;;  %vm999_vm6 = vcmp.ge.f32.partialorder %v3430_v57, 0.0 }
 0x168   : > { %5436 = vst [vmem:[#allocation167_spill] sm:$0xff] %v4165_v19  ;;  %v4182_v19 = vadd.f32 %v4108_v23, %v3362_v13  ;;  %v1172_v23 = vmul.f32 0.3275911, %v1108_v6  ;;  %2945 = vrcp.f32 %v1274_v49  ;;  %v4214_v63 = vmul.f32 %v3420_v52, %v4202_v42 }
 0x169   : > { %5437 = vst [vmem:[#allocation168_spill] sm:$0xff] %v4168_v61  ;;  %v4184_v61 = vpop.eup %2935  ;;  %2947 = vrcp.f32 %v1272_v48  ;;  %v4218_v49 = vadd.f32 %v766_v15, %v3360_v12  ;;  %v4230_v15 = vadd.f32 %v656_v0, %v3351_v9  ;;  %v4242_v0 = vmul.f32 0.5, %v4176_v17 }
 0x16a   : > { %5438 = vst [vmem:[#allocation169_spill] sm:$0xff] %v4170_v8  ;;  %v4188_v8 = vmul.f32 %v3420_v52, %v4176_v17  ;;  %v4190_v18 = vpop.eup %2937  ;;  %v4194_v39 = vmul.f32 %v3420_v52, %v4182_v19 }
 0x16b   : > { %5439 = vst [vmem:[#allocation170_spill] sm:$0xff] %v4178_v2  ;;  %v4196_v13 = vpop.eup %2939  ;;  %v2091_v2 = vmul.f32 1.442695, %v2003_v44  ;;  %v4225_v34 = vmul.f32 %v3420_v52, %v4218_v49 }
 0x16c   : > { %5440 = vst [vmem:[#allocation171_spill] sm:$0xff] %v4184_v61  ;;  %v1109_v55 = vand.u32 2147483647, %v4188_v8  ;;  %v2165_v61 = vmul.f32 1.442695, %v2040_v31  ;;  %v4207_v36 = vpop.eup %2941  ;;  %vm982_vm10 = vcmp.ge.f32.partialorder %v4194_v39, 0.0 }
 0x16d   : > { %5441 = vst [vmem:[#allocation172_spill] sm:$0xff] %v4188_v8  ;;  %v1110_v35 = vand.u32 2147483647, %v4194_v39  ;;  %v4220_v48 = vpop.eup %2943  ;;  %vm984_vm11 = vcmp.ge.f32.partialorder %v4225_v34, 0.0 }
 0x16e   : > { %5442 = vst [vmem:[#allocation173_spill] sm:$0xff] %v4190_v18  ;;  %v2004_v18 = vmul.f32 %v1940_v54, %v1108_v6  ;;  %v1941_v30 = vsub.f32 0.0, %v1109_v55  ;;  %v1173_v8 = vmul.f32 0.3275911, %v1109_v55  ;;  %v769_v6 = vpop.f32.mrf.mxu1  ;;  %v1236_v54 = vadd.f32 1.0, %v1172_v23  ;;  %v4227_v23 = vpop.eup %2945 }
 0x16f   : > { %5443 = vst [vmem:[#allocation174_spill] sm:$0xff] %v4196_v13  ;;  %v2042_v13 = vmul.f32 %v1978_v20, %v1146_v41  ;;  %v1942_v31 = vsub.f32 0.0, %v1110_v35  ;;  %2949 = vpow2.f32 %v2165_v61  ;;  %v1174_v58 = vmul.f32 0.3275911, %v1110_v35  ;;  %v659_v61 = vpop.f32.mrf.mxu0 }
 0x170   : > { %5444 = vst [vmem:[#allocation175_spill] sm:$0xff] %v4210_v21  ;;  %v2093_v41 = vmul.f32 1.442695, %v2004_v18  ;;  %v1111_v20 = vand.u32 2147483647, %v4214_v63  ;;  %2951 = vrcp.f32 %v1235_v4  ;;  %v2005_v21 = vmul.f32 %v1941_v30, %v1109_v55  ;;  %v4232_v18 = vpop.eup %2947 }
 0x171   : > { %5445 = vst [vmem:[#allocation176_spill] sm:$0xff] %v4214_v63  ;;  %v2169_v44 = vmul.f32 1.442695, %v2042_v13  ;;  %2953 = vpow2.f32 %v2091_v2  ;;  %v1237_v29 = vadd.f32 1.0, %v1173_v8  ;;  %v1402_v4 = vmul.f32 1.0614054, %v4227_v23 }
 0x172   : > { %v1943_v12 = vsub.f32 0.0, %v1111_v20  ;;  %5446 = vst [vmem:[#allocation177_spill] sm:$0xff] %v4232_v18  ;;  %2955 = vrcp.f32 %v1236_v54  ;;  %v2006_v13 = vmul.f32 %v1942_v31, %v1110_v35  ;;  %v1112_v55 = vand.u32 2147483647, %v4225_v34  ;;  %v420_v31 = vpop.permute.xlu1 %419 }
 0x173   : > { %2957 = vpow2.f32 %v2093_v41  ;;  %v4239_v30 = vsel %vm1018_vm9, 1.0, %v5288_v1  ;;  %v1238_v8 = vadd.f32 1.0, %v1174_v58  ;;  %v1175_v2 = vmul.f32 0.3275911, %v1111_v20  ;;  %5447 = vst [vmem:[#allocation178_spill] sm:$0xff] %v4242_v0 }
 0x174   : > { %v1466_v63 = vadd.f32 -1.4531521, %v1402_v4  ;;  %2959 = vpow2.f32 %v2169_v44  ;;  %v2095_v18 = vmul.f32 1.442695, %v2005_v21  ;;  %v2007_v35 = vmul.f32 %v1943_v12, %v1111_v20 }
 0x175   : > { %v4244_v54 = vpop.eup %2949  ;;  %2961 = vrcp.f32 %v1237_v29  ;;  %v4248_v41 = vmul.f32 %v3420_v52, %v4230_v15  ;;  %v4251_v33 = vadd.f32 %v769_v6, %v3351_v9  ;;  %v2097_v4 = vmul.f32 1.442695, %v2006_v13 }
 0x176   : > { %5448 = vst [vmem:[#allocation179_spill] sm:$0xff] %v4244_v54  ;;  %v4253_v58 = vpop.eup %2951  ;;  %v1530_v44 = vmul.f32 %v4227_v23, %v1466_v63  ;;  %v1944_v17 = vsub.f32 0.0, %v1112_v55  ;;  %v4256_v0 = vadd.f32 %v659_v61, %v420_v31  ;;  %v4261_v29 = vmul.f32 0.5, %v4182_v19  ;;  %v772_v54 = vpop.f32.mrf.mxu1 }
 0x177   : > { %5449 = vst [vmem:[#allocation180_spill] sm:$0xff] %v4248_v41  ;;  %v4258_v21 = vpop.eup %2953  ;;  %2963 = vrcp.f32 %v1238_v8  ;;  %v1239_v20 = vadd.f32 1.0, %v1175_v2  ;;  %v1113_v12 = vand.u32 2147483647, %v4248_v41  ;;  %v4269_v63 = vmul.f32 %v3420_v52, %v4251_v33 }
 0x178   : > { %5450 = vst [vmem:[#allocation181_spill] sm:$0xff] %v4253_v58  ;;  %v4264_v9 = vpop.eup %2955  ;;  %v1594_v6 = vadd.f32 1.4214138, %v1530_v44  ;;  %2965 = vpow2.f32 %v2095_v18  ;;  %v2099_v13 = vmul.f32 1.442695, %v2007_v35  ;;  %v4275_v8 = vmul.f32 %v3420_v52, %v4256_v0  ;;  %v662_v58 = vpop.f32.mrf.mxu0  ;;  %v5485_v5 = vld [vmem:[#allocation176_spill] sm:$0xff] }
 0x179   : > { %5451 = vst [vmem:[#allocation182_spill] sm:$0xff] %v4258_v21  ;;  %v4271_v61 = vpop.eup %2957  ;;  %v1176_v19 = vmul.f32 0.3275911, %v1112_v55  ;;  %2967 = vpow2.f32 %v2097_v4  ;;  %v2008_v18 = vmul.f32 %v1944_v17, %v1112_v55  ;;  %v1114_v39 = vand.u32 2147483647, %v4269_v63  ;;  %v425_v55 = vpop.permute.xlu0 %424 }
 0x17a   : > { %5452 = vst [vmem:[#allocation183_spill] sm:$0xff] %v4261_v29  ;;  %v1945_v29 = vsub.f32 0.0, %v1113_v12  ;;  %v2960_v2 = vpop.eup %2959  ;;  %v4282_v21 = vsel %vm982_vm10, 1.0, %v5288_v1  ;;  %v4285_v35 = vmul.f32 0.5, %v4202_v42  ;;  %2969 = vrcp.f32 %v1239_v20 }
 0x17b   : > { %5453 = vst [vmem:[#allocation184_spill] sm:$0xff] %v4264_v9  ;;  %v1658_v9 = vmul.f32 %v4227_v23, %v1594_v6  ;;  %v4279_v44 = vpop.eup %2961  ;;  %v1178_v47 = vmul.f32 0.3275911, %v1114_v39  ;;  %v1946_v41 = vsub.f32 0.0, %v1114_v39  ;;  %v4287_v14 = vadd.f32 %v772_v54, %v420_v31 }
 0x17c   : > { %5454 = vst [vmem:[#allocation185_spill] sm:$0xff] %v4271_v61  ;;  %v1177_v61 = vmul.f32 0.3275911, %v1113_v12  ;;  %2971 = vpow2.f32 %v2099_v13  ;;  %v1240_v17 = vadd.f32 1.0, %v1176_v19  ;;  %v2009_v6 = vmul.f32 %v1945_v29, %v1113_v12 }
 0x17d   : > { %5455 = vst [vmem:[#allocation186_spill] sm:$0xff] %v4279_v44  ;;  %v1722_v59 = vadd.f32 -0.28449672, %v1658_v9  ;;  %v4289_v4 = vpop.eup %2963  ;;  %v1115_v44 = vand.u32 2147483647, %v4275_v8  ;;  %v663_v56 = vadd.f32 %v662_v58, %v425_v55  ;;  %v2010_v7 = vmul.f32 %v1946_v41, %v1114_v39 }
 0x17e   : > { %5456 = vst [vmem:[#allocation187_spill] sm:$0xff] %v4282_v21  ;;  %v4292_v21 = vpop.eup %2965  ;;  %v2101_v20 = vmul.f32 1.442695, %v2008_v18  ;;  %v1241_v9 = vadd.f32 1.0, %v1177_v61  ;;  %v4297_v54 = vmul.f32 %v3420_v52, %v4287_v14  ;;  %v775_v58 = vpop.f32.mrf.mxu1  ;;  %v4316_v39 = vsel %vm984_vm11, 1.0, %v5288_v1 }
 0x17f   : > { %5457 = vst [vmem:[#allocation188_spill] sm:$0xff] %v4285_v35  ;;  %v1786_v42 = vmul.f32 %v4227_v23, %v1722_v59  ;;  %v1242_v35 = vadd.f32 1.0, %v1178_v47  ;;  %v1947_v51 = vsub.f32 0.0, %v1115_v44  ;;  %v4299_v31 = vpop.eup %2967  ;;  %v1179_v29 = vmul.f32 0.3275911, %v1115_v44 }
 0x180   : > { %5458 = vst [vmem:[#allocation189_spill] sm:$0xff] %v4287_v14  ;;  %v4302_v12 = vpop.eup %2969  ;;  %v4306_v59 = vmul.f32 0.5, %v4218_v49  ;;  %v2103_v47 = vmul.f32 1.442695, %v2009_v6  ;;  %v1116_v41 = vand.u32 2147483647, %v4297_v54  ;;  %v4311_v34 = vmul.f32 %v3420_v52, %v663_v56 }
 0x181   : > { %5459 = vst [vmem:[#allocation190_spill] sm:$0xff] %v4297_v54  ;;  %v1850_v13 = vadd.f32 0.2548296, %v1786_v42  ;;  %2973 = vrcp.f32 %v1242_v35  ;;  %v2011_v19 = vmul.f32 %v1947_v51, %v1115_v44  ;;  %v4319_v49 = vmul.f32 0.5, %v4230_v15 }
 0x182   : > { %5460 = vst [vmem:[#allocation191_spill] sm:$0xff] %v4299_v31  ;;  %2975 = vrcp.f32 %v1240_v17  ;;  %v4313_v18 = vpop.eup %2971  ;;  %v2105_v35 = vmul.f32 1.442695, %v2010_v7  ;;  %v1243_v6 = vadd.f32 1.0, %v1179_v29  ;;  %v1117_v42 = vand.u32 2147483647, %v4311_v34 }
 0x183   : > { %5461 = vst [vmem:[#allocation192_spill] sm:$0xff] %v4306_v59  ;;  %v1914_v61 = vmul.f32 %v4227_v23, %v1850_v13  ;;  %2977 = vpow2.f32 %v2101_v20  ;;  %v4322_v23 = vadd.f32 %v775_v58, %v425_v55  ;;  %v4325_v51 = vmul.f32 0.5, %v4251_v33 }
 0x184   : > { %5462 = vst [vmem:[#allocation193_spill] sm:$0xff] %v4316_v39  ;;  %2979 = vrcp.f32 %v1241_v9  ;;  %vm986_vm13 = vcmp.ge.f32.partialorder %v4269_v63, 0.0  ;;  %v1180_v44 = vmul.f32 0.3275911, %v1116_v41  ;;  %v2107_v15 = vmul.f32 1.442695, %v2011_v19 }
 0x185   : > { %v2234_v17 = vmul.f32 %v2960_v2, %v1914_v61  ;;  %5463 = vst [vmem:[#allocation194_spill] sm:$0xff] %v4322_v23  ;;  %2981 = vpow2.f32 %v2103_v47  ;;  %v1948_v14 = vsub.f32 0.0, %v1116_v41  ;;  %v1949_v9 = vsub.f32 0.0, %v1117_v42 }
 0x186   : > { %2983 = vpow2.f32 %v2105_v35  ;;  %v1181_v33 = vmul.f32 0.3275911, %v1117_v42  ;;  %v4337_v55 = vmul.f32 %v3420_v52, %v4322_v23  ;;  %v4343_v58 = vmul.f32 0.5, %v4256_v0 }
 0x187   : > { %v4328_v20 = vpop.eup %2973  ;;  %v2298_v13 = vsub.f32 1.0, %v2234_v17  ;;  %2985 = vrcp.f32 %v1243_v6  ;;  %v1401_v61 = vmul.f32 1.0614054, %v4207_v36  ;;  %v1244_v54 = vadd.f32 1.0, %v1180_v44  ;;  %v665_v44 = vpop.f32.mrf.mxu0 }
 0x188   : > { %v4330_v7 = vpop.eup %2975  ;;  %v1370_v2 = vmul.f32 1.0614054, %v4328_v20  ;;  %5464 = vst [vmem:[#allocation195_spill] sm:$0xff] %v4337_v55  ;;  %v2013_v35 = vmul.f32 %v1949_v9, %v1117_v42  ;;  %v1118_v31 = vand.u32 2147483647, %v4337_v55  ;;  %v4352_v23 = vsel %vm986_vm13, 1.0, %v5288_v1  ;;  %v778_v42 = vpop.f32.mrf.mxu1 }
 0x189   : > { %v4339_v29 = vpop.eup %2977  ;;  %v2362_v47 = vmul.f32 %v2298_v13, %v4239_v30  ;;  %5466 = vst [vmem:[#allocation197_spill] sm:$0xff] %v4343_v58  ;;  %2987 = vpow2.f32 %v2107_v15  ;;  %v2012_v30 = vmul.f32 %v1948_v14, %v1116_v41  ;;  %v4354_v13 = vmul.f32 0.5, %v663_v56 }
 0x18a   : > { %5465 = vst [vmem:[#allocation196_spill] sm:$0xff] %v4339_v29  ;;  %v4346_v19 = vpop.eup %2979  ;;  %v1434_v17 = vadd.f32 -1.4531521, %v1370_v2  ;;  %v1245_v58 = vadd.f32 1.0, %v1181_v33  ;;  %v1182_v59 = vmul.f32 0.3275911, %v1118_v31  ;;  %2989 = vrcp.f32 %v1244_v54 }
 0x18b   : > { %5467 = vst [vmem:[#allocation198_spill] sm:$0xff] %v4354_v13  ;;  %v4356_v0 = vpop.eup %2981  ;;  %v1465_v2 = vadd.f32 -1.4531521, %v1401_v61  ;;  %v2426_v9 = vadd.f32 1.0, %v2362_v47  ;;  %v1950_v55 = vsub.f32 0.0, %v1118_v31  ;;  %v4362_v63 = vsel %vm1017_vm12, 1.0, %v5288_v1 }
 0x18c   : > { %v1498_v6 = vmul.f32 %v4328_v20, %v1434_v17  ;;  %v1399_v14 = vmul.f32 1.0614054, %v4147_v50  ;;  %v2984_v56 = vpop.eup %2983  ;;  %v2111_v15 = vmul.f32 1.442695, %v2013_v35  ;;  %v4369_v61 = vmul.f32 1.442695, %v2012_v30 }
 0x18d   : > { %v1529_v17 = vmul.f32 %v4207_v36, %v1465_v2  ;;  %v4366_v33 = vpop.eup %2985  ;;  %v666_v13 = vadd.f32 %v665_v44, %v4205_v27  ;;  %v4373_v32 = vadd.f32 %v778_v42, %v4205_v27  ;;  %2991 = vrcp.f32 %v1245_v58 }
 0x18e   : > { %v1562_v41 = vadd.f32 1.4214138, %v1498_v6  ;;  %5468 = vst [vmem:[#allocation199_spill] sm:$0xff] %v4366_v33  ;;  %v1463_v47 = vadd.f32 -1.4531521, %v1399_v14  ;;  %v1246_v6 = vadd.f32 1.0, %v1182_v59  ;;  %v4379_v2 = vmul.f32 %v2426_v9, %v4172_v10 }
 0x18f   : > { %5469 = vst [vmem:[#allocation200_spill] sm:$0xff] %v4369_v61  ;;  %v1593_v54 = vadd.f32 1.4214138, %v1529_v17  ;;  %v4376_v35 = vpop.eup %2987  ;;  %v2014_v33 = vmul.f32 %v1950_v55, %v1118_v31  ;;  %v4383_v14 = vmul.f32 %v3420_v52, %v666_v13  ;;  %2993 = vpow2.f32 %v2111_v15 }
 0x190   : > { %5470 = vst [vmem:[#allocation201_spill] sm:$0xff] %v4373_v32  ;;  %v1626_v39 = vmul.f32 %v4328_v20, %v1562_v41  ;;  %v1527_v30 = vmul.f32 %v4147_v50, %v1463_v47  ;;  %v4388_v58 = vmul.f32 %v3420_v52, %v4373_v32  ;;  %v4394_v10 = vsel %vm1015_vm15, 1.0, %v5288_v1  ;;  %v4402_v55 = vpop.eup %2989 }
 0x191   : > { %5471 = vst [vmem:[#allocation202_spill] sm:$0xff] %v4376_v35  ;;  %v1657_v27 = vmul.f32 %v4207_v36, %v1593_v54  ;;  %v1119_v59 = vand.u32 2147483647, %v4383_v14  ;;  %2995 = vrcp.f32 %v1246_v6  ;;  %v4406_v15 = vmul.f32 1.442695, %v2014_v33 }
 0x192   : > { %5472 = vst [vmem:[#allocation203_spill] sm:$0xff] %v4379_v2  ;;  %v1690_v44 = vadd.f32 -0.28449672, %v1626_v39  ;;  %v1591_v31 = vadd.f32 1.4214138, %v1527_v30  ;;  %v4400_v39 = vsel %vm1013_vm14, 1.0, %v5288_v1 }
 0x193   : > { %5473 = vst [vmem:[#allocation204_spill] sm:$0xff] %v4388_v58  ;;  %v1721_v9 = vadd.f32 -0.28449672, %v1657_v27  ;;  %v1120_v41 = vand.u32 2147483647, %v4388_v58  ;;  %v1951_v47 = vsub.f32 0.0, %v1119_v59  ;;  %v4409_v54 = vpop.eup %2991 }
 0x194   : > { %5474 = vst [vmem:[#allocation205_spill] sm:$0xff] %v4402_v55  ;;  %v1754_v42 = vmul.f32 %v4328_v20, %v1690_v44  ;;  %v1655_v3 = vmul.f32 %v4147_v50, %v1591_v31  ;;  %v1183_v17 = vmul.f32 0.3275911, %v1119_v59  ;;  %v1397_v58 = vmul.f32 1.0614054, %v4091_v37 }
 0x195   : > { %5475 = vst [vmem:[#allocation206_spill] sm:$0xff] %v4406_v15  ;;  %v1785_v38 = vmul.f32 %v4207_v36, %v1721_v9  ;;  %v1184_v32 = vmul.f32 0.3275911, %v1120_v41  ;;  %v1952_v61 = vsub.f32 0.0, %v1120_v41  ;;  %v2015_v27 = vmul.f32 %v1951_v47, %v1119_v59  ;;  %v4414_v33 = vpop.eup %2993  ;;  %v668_v47 = vpop.f32.mrf.mxu0 }
 0x196   : > { %5476 = vst [vmem:[#allocation207_spill] sm:$0xff] %v4409_v54  ;;  %v1818_v30 = vadd.f32 0.2548296, %v1754_v42  ;;  %v1719_v44 = vadd.f32 -0.28449672, %v1655_v3  ;;  %v1247_v6 = vadd.f32 1.0, %v1183_v17 }
 0x197   : > { %v1849_v15 = vadd.f32 0.2548296, %v1785_v38  ;;  %v1248_v55 = vadd.f32 1.0, %v1184_v32  ;;  %v2016_v2 = vmul.f32 %v1952_v61, %v1120_v41  ;;  %v4418_v35 = vmul.f32 0.5, %v666_v13  ;;  %v4420_v54 = vpop.eup %2995 }
 0x198   : > { %v1882_v31 = vmul.f32 %v4328_v20, %v1818_v30  ;;  %v1783_v42 = vmul.f32 %v4147_v50, %v1719_v44  ;;  %v2115_v9 = vmul.f32 1.442695, %v2015_v27  ;;  %v1461_v29 = vadd.f32 -1.4531521, %v1397_v58 }
 0x199   : > { %v1913_v59 = vmul.f32 %v4207_v36, %v1849_v15  ;;  %2997 = vrcp.f32 %v1247_v6  ;;  %v4426_v17 = vsel %vm1011_vm0, 1.0, %v5288_v1  ;;  %v1395_v61 = vmul.f32 1.0614054, %v4023_v16 }
 0x19a   : > { %v2202_v3 = vmul.f32 %v2984_v56, %v1882_v31  ;;  %v1847_v20 = vadd.f32 0.2548296, %v1783_v42  ;;  %2999 = vrcp.f32 %v1248_v55  ;;  %v1525_v13 = vmul.f32 %v4091_v37, %v1461_v29 }
 0x19b   : > { %v2233_v58 = vmul.f32 %v4220_v48, %v1913_v59  ;;  %3001 = vpow2.f32 %v2115_v9  ;;  %v4432_v56 = vmul.f32 1.442695, %v2016_v2  ;;  %v1459_v41 = vadd.f32 -1.4531521, %v1395_v61 }
 0x19c   : > { %v2266_v32 = vsub.f32 1.0, %v2202_v3  ;;  %v1911_v28 = vmul.f32 %v4147_v50, %v1847_v20  ;;  %v1589_v36 = vadd.f32 1.4214138, %v1525_v13  ;;  %v1393_v15 = vmul.f32 1.0614054, %v3954_v43 }
 0x19d   : > { %v2297_v29 = vsub.f32 1.0, %v2233_v58  ;;  %v4441_v30 = vsel %vm1009_vm1, 1.0, %v5288_v1  ;;  %v1391_v48 = vmul.f32 1.0614054, %v3880_v45  ;;  %v1523_v50 = vmul.f32 %v4023_v16, %v1459_v41 }
 0x19e   : > { %v2330_v55 = vmul.f32 %v2266_v32, %v4352_v23  ;;  %v2231_v2 = vmul.f32 %v4152_v53, %v1911_v28  ;;  %v1653_v38 = vmul.f32 %v4091_v37, %v1589_v36  ;;  %v1457_v44 = vadd.f32 -1.4531521, %v1393_v15 }
 0x19f   : > { %v4447_v6 = vpop.eup %2997  ;;  %v2361_v23 = vmul.f32 %v2297_v29, %v4362_v63  ;;  %v1455_v31 = vadd.f32 -1.4531521, %v1391_v48  ;;  %v669_v42 = vadd.f32 %v668_v47, %v3414_v46  ;;  %v1587_v59 = vadd.f32 1.4214138, %v1523_v50 }
 0x1a0   : > { %v2394_v27 = vadd.f32 1.0, %v2330_v55  ;;  %v4451_v40 = vpop.eup %2999  ;;  %v2295_v9 = vsub.f32 1.0, %v2231_v2  ;;  %v1717_v3 = vadd.f32 -0.28449672, %v1653_v38  ;;  %v1521_v53 = vmul.f32 %v3954_v43, %v1457_v44 }
 0x1a1   : > { %v4454_v20 = vpop.eup %3001  ;;  %v2425_v61 = vadd.f32 1.0, %v2361_v23  ;;  %v4462_v63 = vsel %vm1007_vm2, 1.0, %v5288_v1  ;;  %v1519_v46 = vmul.f32 %v3880_v45, %v1455_v31  ;;  %v1651_v28 = vmul.f32 %v4023_v16, %v1587_v59 }
 0x1a2   : > { %v4457_v13 = vmul.f32 %v2394_v27, %v4325_v51  ;;  %v2359_v32 = vmul.f32 %v2295_v9, %v4394_v10  ;;  %v1781_v58 = vmul.f32 %v4091_v37, %v1717_v3  ;;  %v1585_v36 = vadd.f32 1.4214138, %v1521_v53  ;;  %v5477_v53 = vld [vmem:[#allocation17_spill] sm:$0xff] }
 0x1a3   : > { %v2489_v51 = vmul.f32 %v2425_v61, %v4155_v26  ;;  %v1583_v41 = vadd.f32 1.4214138, %v1519_v46  ;;  %v4470_v15 = vmul.f32 0.5, %v669_v42  ;;  %v4473_v11 = vmul.f32 %v3420_v52, %v669_v42 }
 0x1a4   : > { %v2423_v47 = vadd.f32 1.0, %v2359_v32  ;;  %v1845_v55 = vadd.f32 0.2548296, %v1781_v58  ;;  %v1715_v29 = vadd.f32 -0.28449672, %v1651_v28  ;;  %v1649_v10 = vmul.f32 %v3954_v43, %v1585_v36  ;;  %v5478_v32 = vld [vmem:[#allocation59_spill] sm:$0xff] }
 0x1a5   : > { %2519 = vmatpush.msrb.mxu3 %v2489_v51  ;;  %v1647_v48 = vmul.f32 %v3880_v45, %v1583_v41  ;;  %v1121_v2 = vand.u32 2147483647, %v4473_v11  ;;  %v4482_v26 = vsel %vm1005_vm3, 1.0, %v5288_v1  ;;  %v1389_v52 = vmul.f32 1.0614054, %v3790_v22 }
 0x1a6   : > { %v2487_v38 = vmul.f32 %v2423_v47, %v4089_v25  ;;  %v1909_v50 = vmul.f32 %v4091_v37, %v1845_v55  ;;  %v1779_v44 = vmul.f32 %v4023_v16, %v1715_v29  ;;  %v1713_v27 = vadd.f32 -0.28449672, %v1649_v10  ;;  %v5479_v29 = vld [vmem:[#allocation140_spill] sm:$0xff] }
 0x1a7   : > { %v1711_v23 = vadd.f32 -0.28449672, %v1647_v48  ;;  %v1185_v31 = vmul.f32 0.3275911, %v1121_v2  ;;  %v1953_v42 = vsub.f32 0.0, %v1121_v2  ;;  %v4491_v9 = vsel %vm1003_vm4, 1.0, %v5288_v1 }
 0x1a8   : > { %2520 = vmatpush.msrb.mxu3 %v2487_v38  ;;  %v2229_v24 = vmul.f32 %v4095_v62, %v1909_v50  ;;  %v1843_v3 = vadd.f32 0.2548296, %v1779_v44  ;;  %v1777_v59 = vmul.f32 %v3954_v43, %v1713_v27  ;;  %v1453_v25 = vadd.f32 -1.4531521, %v1389_v52  ;;  %v5481_v44 = vld [vmem:[#allocation180_spill] sm:$0xff] }
 0x1a9   : > { %vm997_vm7 = vcmp.ge.f32.partialorder %v5477_v53, 0.0  ;;  %v1775_v37 = vmul.f32 %v3880_v45, %v1711_v23  ;;  %v1249_v61 = vadd.f32 1.0, %v1185_v31  ;;  %v2017_v46 = vmul.f32 %v1953_v42, %v1121_v2  ;;  %v5480_v2 = vld [vmem:[#allocation43_spill] sm:$0xff]  ;;  %v5482_v23 = vld [vmem:[#allocation125_spill] sm:$0xff] }
 0x1aa   : > { %v1387_v58 = vmul.f32 1.0614054, %v5478_v32  ;;  %v2293_v28 = vsub.f32 1.0, %v2229_v24  ;;  %v1907_v60 = vmul.f32 %v4023_v16, %v1843_v3  ;;  %v1841_v36 = vadd.f32 0.2548296, %v1777_v59  ;;  %v5483_v42 = vld [vmem:[#allocation111_spill] sm:$0xff] }
 0x1ab   : > { %v1517_v51 = vmul.f32 %v3790_v22, %v1453_v25  ;;  %v1839_v41 = vadd.f32 0.2548296, %v1775_v37  ;;  %3003 = vrcp.f32 %v1249_v61  ;;  %v2119_v62 = vmul.f32 1.442695, %v2017_v46  ;;  %v5486_v37 = vld [vmem:[#allocation137_spill] sm:$0xff]  ;;  %v5494_v53 = vld [vmem:[#allocation95_spill] sm:$0xff] }
 0x1ac   : > { %v1451_v47 = vadd.f32 -1.4531521, %v1387_v58  ;;  %v2357_v55 = vmul.f32 %v2293_v28, %v4400_v39  ;;  %v2227_v10 = vmul.f32 %v5479_v29, %v1907_v60  ;;  %v1905_v48 = vmul.f32 %v3954_v43, %v1841_v36 }
 0x1ad   : > { %v1581_v52 = vadd.f32 1.4214138, %v1517_v51  ;;  %vm995_vm8 = vcmp.ge.f32.partialorder %v5480_v2, 0.0  ;;  %v1903_v38 = vmul.f32 %v3880_v45, %v1839_v41  ;;  %3005 = vpow2.f32 %v2119_v62  ;;  %v5484_v45 = vld [vmem:[#allocation36_spill] sm:$0xff] }
 0x1ae   : > { %v1515_v16 = vmul.f32 %v5478_v32, %v1451_v47  ;;  %v4509_v50 = vsel %vm1001_vm5, 1.0, %v5288_v1  ;;  %vm985_vm9 = vcmp.ge.f32.partialorder %v5481_v44, 0.0  ;;  %v2421_v39 = vadd.f32 1.0, %v2357_v55  ;;  %v5487_v62 = vld [vmem:[#allocation12_spill] sm:$0xff] }
 0x1af   : > { %v2291_v27 = vsub.f32 1.0, %v2227_v10  ;;  %v2225_v31 = vmul.f32 %v5482_v23, %v1905_v48  ;;  %v1645_v43 = vmul.f32 %v3790_v22, %v1581_v52  ;;  %v2223_v24 = vmul.f32 %v5483_v42, %v1903_v38  ;;  %v5488_v10 = vld [vmem:[#allocation11_spill] sm:$0xff] }
 0x1b0   : > { %v1579_v3 = vadd.f32 1.4214138, %v1515_v16  ;;  %v1385_v59 = vmul.f32 1.0614054, %v5484_v45  ;;  %v4519_v25 = vsel %vm999_vm6, 1.0, %v5288_v1  ;;  %vm983_vm10 = vcmp.ge.f32.partialorder %v5485_v5, 0.0 }
 0x1b1   : > { %v2485_v61 = vmul.f32 %v2421_v39, %v5486_v37  ;;  %v2355_v46 = vmul.f32 %v2291_v27, %v4426_v17  ;;  %v2289_v58 = vsub.f32 1.0, %v2225_v31  ;;  %v1709_v28 = vadd.f32 -0.28449672, %v1645_v43  ;;  %v4524_v60 = vpop.eup %3003  ;;  %v5489_v27 = vld [vmem:[#allocation124_spill] sm:$0xff] }
 0x1b2   : > { %v2287_v36 = vsub.f32 1.0, %v2223_v24  ;;  %v1643_v51 = vmul.f32 %v5478_v32, %v1579_v3  ;;  %v1449_v41 = vadd.f32 -1.4531521, %v1385_v59  ;;  %v1383_v47 = vmul.f32 1.0614054, %v5487_v62 }
 0x1b3   : > { %2521 = vmatpush.msrb.mxu3 %v2485_v61  ;;  %v2419_v57 = vadd.f32 1.0, %v2355_v46  ;;  %v2353_v55 = vmul.f32 %v2289_v58, %v4441_v30  ;;  %v1773_v29 = vmul.f32 %v3790_v22, %v1709_v28  ;;  %v4531_v48 = vmul.f32 0.5, %v5488_v10  ;;  %v4533_v17 = vpop.eup %3005  ;;  %v5491_v46 = vld [vmem:[#allocation46_spill] sm:$0xff]  ;;  %v5492_v28 = vld [vmem:[#allocation39_spill] sm:$0xff] }
 0x1b4   : > { %v2351_v52 = vmul.f32 %v2287_v36, %v4462_v63  ;;  %v1707_v38 = vadd.f32 -0.28449672, %v1643_v51  ;;  %v1513_v16 = vmul.f32 %v5484_v45, %v1449_v41  ;;  %v1447_v39 = vadd.f32 -1.4531521, %v1383_v47  ;;  %v5490_v63 = vld [vmem:[#allocation109_spill] sm:$0xff]  ;;  %v5493_v51 = vld [vmem:[#allocation172_spill] sm:$0xff] }
 0x1b5   : > { %v2483_v23 = vmul.f32 %v2419_v57, %v5489_v27  ;;  %v2417_v31 = vadd.f32 1.0, %v2353_v55  ;;  %v1837_v43 = vadd.f32 0.2548296, %v1773_v29  ;;  %v4541_v30 = vsel %vm997_vm7, 1.0, %v5288_v1  ;;  %v5495_v29 = vld [vmem:[#allocation92_spill] sm:$0xff] }
 0x1b6   : > { %v2415_v42 = vadd.f32 1.0, %v2351_v52  ;;  %v1771_v24 = vmul.f32 %v5478_v32, %v1707_v38  ;;  %v1577_v3 = vadd.f32 1.4214138, %v1513_v16  ;;  %v1511_v59 = vmul.f32 %v5487_v62, %v1447_v39  ;;  %v5496_v38 = vld [vmem:[#allocation73_spill] sm:$0xff] }
 0x1b7   : > { %2522 = vmatpush.msrb.mxu3 %v2483_v23  ;;  %v2481_v37 = vmul.f32 %v2417_v31, %v5490_v63  ;;  %v1901_v61 = vmul.f32 %v3790_v22, %v1837_v43  ;;  %v1381_v58 = vmul.f32 1.0614054, %v5491_v46  ;;  %v4549_v36 = vmul.f32 0.5, %v5492_v28  ;;  %v5497_v43 = vld [vmem:[#allocation158_spill] sm:$0xff] }
 0x1b8   : > { %vm981_vm11 = vcmp.ge.f32.partialorder %v5493_v51, 0.0  ;;  %v2479_v41 = vmul.f32 %v2415_v42, %v5494_v53  ;;  %v1835_v47 = vadd.f32 0.2548296, %v1771_v24  ;;  %v1641_v57 = vmul.f32 %v5484_v45, %v1577_v3 }
 0x1b9   : > { %v1575_v55 = vadd.f32 1.4214138, %v1511_v59  ;;  %2523 = vmatpush.msrb.mxu3 %v2481_v37  ;;  %v2221_v10 = vmul.f32 %v5495_v29, %v1901_v61  ;;  %v1445_v52 = vadd.f32 -1.4531521, %v1381_v58  ;;  %v4558_v22 = vsel %vm995_vm8, 1.0, %v5288_v1  ;;  %v5498_v59 = vld [vmem:[#allocation62_spill] sm:$0xff] }
 0x1ba   : > { %v1379_v16 = vmul.f32 1.0614054, %v5496_v38  ;;  %v1899_v39 = vmul.f32 %v5478_v32, %v1835_v47  ;;  %v1705_v27 = vadd.f32 -0.28449672, %v1641_v57  ;;  %v4566_v31 = vsel %vm985_vm9, 1.0, %v5288_v1 }
 0x1bb   : > { %v1639_v23 = vmul.f32 %v5487_v62, %v1575_v55  ;;  %vm979_vm12 = vcmp.ge.f32.partialorder %v5497_v43, 0.0  ;;  %2524 = vmatpush.msrb.mxu3 %v2479_v41  ;;  %v2285_v42 = vsub.f32 1.0, %v2221_v10  ;;  %v1509_v2 = vmul.f32 %v5491_v46, %v1445_v52 }
 0x1bc   : > { %v1443_v24 = vadd.f32 -1.4531521, %v1379_v16  ;;  %v1369_v3 = vmul.f32 1.0614054, %v4346_v19  ;;  %v2219_v63 = vmul.f32 %v5498_v59, %v1899_v39  ;;  %v1769_v32 = vmul.f32 %v5484_v45, %v1705_v27 }
 0x1bd   : > { %v1703_v37 = vadd.f32 -0.28449672, %v1639_v23  ;;  %v4576_v44 = vsel %vm983_vm10, 1.0, %v5288_v1  ;;  %v2349_v61 = vmul.f32 %v2285_v42, %v4482_v26  ;;  %v1573_v58 = vadd.f32 1.4214138, %v1509_v2  ;;  %v5499_v23 = vld [vmem:[#allocation147_spill] sm:$0xff] }
 0x1be   : > { %v1507_v28 = vmul.f32 %v5496_v38, %v1443_v24  ;;  %v1433_v53 = vadd.f32 -1.4531521, %v1369_v3  ;;  %v2283_v41 = vsub.f32 1.0, %v2219_v63  ;;  %v1833_v47 = vadd.f32 0.2548296, %v1769_v32  ;;  %v5500_v42 = vld [vmem:[#allocation75_spill] sm:$0xff] }
 0x1bf   : > { %v1767_v57 = vmul.f32 %v5487_v62, %v1703_v37  ;;  %v1367_v55 = vmul.f32 1.0614054, %v4302_v12  ;;  %v2413_v29 = vadd.f32 1.0, %v2349_v61  ;;  %v1637_v10 = vmul.f32 %v5491_v46, %v1573_v58  ;;  %v5501_v32 = vld [vmem:[#allocation40_spill] sm:$0xff] }
 0x1c0   : > { %v1571_v52 = vadd.f32 1.4214138, %v1507_v28  ;;  %v1497_v5 = vmul.f32 %v4346_v19, %v1433_v53  ;;  %v2347_v16 = vmul.f32 %v2283_v41, %v4491_v9  ;;  %v1897_v26 = vmul.f32 %v5484_v45, %v1833_v47  ;;  %v5502_v9 = vld [vmem:[#allocation130_spill] sm:$0xff]  ;;  %v5503_v47 = vld [vmem:[#allocation47_spill] sm:$0xff] }
 0x1c1   : > { %v1831_v39 = vadd.f32 0.2548296, %v1767_v57  ;;  %v1431_v27 = vadd.f32 -1.4531521, %v1367_v55  ;;  %vm977_vm13 = vcmp.ge.f32.partialorder %v5499_v23, 0.0  ;;  %v2477_v2 = vmul.f32 %v2413_v29, %v5500_v42  ;;  %v5504_v29 = vld [vmem:[#allocation16_spill] sm:$0xff] }
 0x1c2   : > { %v1701_v24 = vadd.f32 -0.28449672, %v1637_v10  ;;  %v1635_v3 = vmul.f32 %v5496_v38, %v1571_v52  ;;  %v1561_v59 = vadd.f32 1.4214138, %v1497_v5  ;;  %v2411_v63 = vadd.f32 1.0, %v2347_v16  ;;  %v5515_v23 = vld [vmem:[#allocation64_spill] sm:$0xff] }
 0x1c3   : > { %v2217_v37 = vmul.f32 %v5501_v32, %v1897_v26  ;;  %v1895_v61 = vmul.f32 %v5487_v62, %v1831_v39  ;;  %v1495_v58 = vmul.f32 %v4302_v12, %v1431_v27  ;;  %vm975_vm14 = vcmp.ge.f32.partialorder %v5502_v9, 0.0  ;;  %2525 = vmatpush.msrb.mxu3 %v2477_v2  ;;  %v5505_v26 = vld [vmem:[#allocation186_spill] sm:$0xff]  ;;  %v5506_v32 = vld [vmem:[#allocation116_spill] sm:$0xff] }
 0x1c4   : > { %v1765_v45 = vmul.f32 %v5491_v46, %v1701_v24  ;;  %v1699_v28 = vadd.f32 -0.28449672, %v1635_v3  ;;  %v1625_v53 = vmul.f32 %v4346_v19, %v1561_v59  ;;  %v4598_v41 = vsel %vm981_vm11, 1.0, %v5288_v1 }
 0x1c5   : > { %v2475_v57 = vmul.f32 %v2411_v63, %v5503_v47  ;;  %v2281_v55 = vsub.f32 1.0, %v2217_v37  ;;  %v2215_v62 = vmul.f32 %v5504_v29, %v1895_v61  ;;  %v1559_v10 = vadd.f32 1.4214138, %v1495_v58  ;;  %v5507_v58 = vld [vmem:[#allocation181_spill] sm:$0xff] }
 0x1c6   : > { %v1829_v52 = vadd.f32 0.2548296, %v1765_v45  ;;  %v1763_v5 = vmul.f32 %v5496_v38, %v1699_v28  ;;  %v1689_v16 = vadd.f32 -0.28449672, %v1625_v53  ;;  %v1365_v39 = vmul.f32 1.0614054, %v5505_v26 }
 0x1c7   : > { %2526 = vmatpush.msrb.mxu3 %v2475_v57  ;;  %v2345_v27 = vmul.f32 %v2281_v55, %v4509_v50  ;;  %v2279_v42 = vsub.f32 1.0, %v2215_v62  ;;  %v1623_v51 = vmul.f32 %v4302_v12, %v1559_v10  ;;  %v4609_v2 = vsel %vm979_vm12, 1.0, %v5288_v1  ;;  %v5508_v28 = vld [vmem:[#allocation50_spill] sm:$0xff]  ;;  %v5510_v55 = vld [vmem:[#allocation21_spill] sm:$0xff] }
 0x1c8   : > { %v1893_v24 = vmul.f32 %v5491_v46, %v1829_v52  ;;  %v1827_v3 = vadd.f32 0.2548296, %v1763_v5  ;;  %v1753_v59 = vmul.f32 %v4346_v19, %v1689_v16  ;;  %v1429_v63 = vadd.f32 -1.4531521, %v1365_v39  ;;  %v5509_v46 = vld [vmem:[#allocation103_spill] sm:$0xff] }
 0x1c9   : > { %vm973_vm15 = vcmp.ge.f32.partialorder %v5506_v32, 0.0  ;;  %v2409_v37 = vadd.f32 1.0, %v2345_v27  ;;  %v2343_v61 = vmul.f32 %v2279_v42, %v4519_v25  ;;  %v1687_v50 = vadd.f32 -0.28449672, %v1623_v51  ;;  %v5511_v25 = vld [vmem:[#allocation79_spill] sm:$0xff]  ;;  %v5512_v42 = vld [vmem:[#allocation88_spill] sm:$0xff] }
 0x1ca   : > { %v1363_v45 = vmul.f32 1.0614054, %v5507_v58  ;;  %v2213_v53 = vmul.f32 %v5508_v28, %v1893_v24  ;;  %v1891_v43 = vmul.f32 %v5496_v38, %v1827_v3  ;;  %v1817_v47 = vadd.f32 0.2548296, %v1753_v59  ;;  %v5513_v38 = vld [vmem:[#allocation9_spill] sm:$0xff]  ;;  %v5514_v28 = vld [vmem:[#allocation170_spill] sm:$0xff] }
 0x1cb   : > { %v1493_v57 = vmul.f32 %v5505_v26, %v1429_v63  ;;  %vm971_vm0 = vcmp.ge.f32.partialorder %v5509_v46, 0.0  ;;  %v2473_v29 = vmul.f32 %v2409_v37, %v5510_v55  ;;  %v2407_v62 = vadd.f32 1.0, %v2343_v61  ;;  %v5520_v46 = vld [vmem:[#allocation188_spill] sm:$0xff] }
 0x1cc   : > { %v1751_v10 = vmul.f32 %v4302_v12, %v1687_v50  ;;  %v1427_v52 = vadd.f32 -1.4531521, %v1363_v45  ;;  %v2277_v5 = vsub.f32 1.0, %v2213_v53  ;;  %v2211_v16 = vmul.f32 %v5511_v25, %v1891_v43 }
 0x1cd   : > { %v1881_v39 = vmul.f32 %v4346_v19, %v1817_v47  ;;  %v1557_v27 = vadd.f32 1.4214138, %v1493_v57  ;;  %vm969_vm1 = vcmp.ge.f32.partialorder %v5512_v42, 0.0  ;;  %2527 = vmatpush.msrb.mxu3 %v2473_v29  ;;  %v2471_v51 = vmul.f32 %v2407_v62, %v5513_v38  ;;  %v5516_v62 = vld [vmem:[#allocation156_spill] sm:$0xff] }
 0x1ce   : > { %v1815_v24 = vadd.f32 0.2548296, %v1751_v10  ;;  %v1491_v3 = vmul.f32 %v5507_v58, %v1427_v52  ;;  %v4630_v59 = vsel %vm977_vm13, 1.0, %v5288_v1  ;;  %v2341_v63 = vmul.f32 %v2277_v5, %v4541_v30 }
 0x1cf   : > { %v2275_v37 = vsub.f32 1.0, %v2211_v16  ;;  %v2201_v61 = vmul.f32 %v4356_v0, %v1881_v39  ;;  %v1621_v19 = vmul.f32 %v5505_v26, %v1557_v27  ;;  %2528 = vmatpush.msrb.mxu3 %v2471_v51  ;;  %v1361_v53 = vmul.f32 1.0614054, %v5514_v28 }
 0x1d0   : > { %v1879_v50 = vmul.f32 %v4302_v12, %v1815_v24  ;;  %v1555_v45 = vadd.f32 1.4214138, %v1491_v3  ;;  %v4640_v43 = vsel %vm975_vm14, 1.0, %v5288_v1  ;;  %vm967_vm2 = vcmp.ge.f32.partialorder %v5515_v23, 0.0 }
 0x1d1   : > { %v2405_v47 = vadd.f32 1.0, %v2341_v63  ;;  %v2339_v30 = vmul.f32 %v2275_v37, %v4558_v22  ;;  %v2265_v57 = vsub.f32 1.0, %v2201_v61  ;;  %v1685_v0 = vadd.f32 -0.28449672, %v1621_v19 }
 0x1d2   : > { %v2199_v55 = vmul.f32 %v4313_v18, %v1879_v50  ;;  %v1619_v29 = vmul.f32 %v5507_v58, %v1555_v45  ;;  %v1425_v12 = vadd.f32 -1.4531521, %v1361_v53  ;;  %v1359_v10 = vmul.f32 1.0614054, %v5516_v62  ;;  %v5518_v50 = vld [vmem:[#allocation34_spill] sm:$0xff] }
 0x1d3   : > { %v2469_v52 = vmul.f32 %v2405_v47, %v4531_v48  ;;  %v2403_v5 = vadd.f32 1.0, %v2339_v30  ;;  %v2329_v9 = vmul.f32 %v2265_v57, %v4566_v31  ;;  %v1749_v25 = vmul.f32 %v5505_v26, %v1685_v0  ;;  %v5519_v57 = vld [vmem:[#allocation129_spill] sm:$0xff] }
 0x1d4   : > { %v2263_v16 = vsub.f32 1.0, %v2199_v55  ;;  %v1683_v39 = vadd.f32 -0.28449672, %v1619_v29  ;;  %v1489_v22 = vmul.f32 %v5514_v28, %v1425_v12  ;;  %v1423_v27 = vadd.f32 -1.4531521, %v1359_v10 }
 0x1d5   : > { %2529 = vmatpush.msrb.mxu3 %v2469_v52  ;;  %v2467_v18 = vmul.f32 %v2403_v5, %v4549_v36  ;;  %v2393_v38 = vadd.f32 1.0, %v2329_v9  ;;  %v1813_v51 = vadd.f32 0.2548296, %v1749_v25  ;;  %v4655_v24 = vsel %vm973_vm15, 1.0, %v5288_v1  ;;  %v5517_v36 = vld [vmem:[#allocation143_spill] sm:$0xff] }
 0x1d6   : > { %v2327_v48 = vmul.f32 %v2263_v16, %v4576_v44  ;;  %v1747_v31 = vmul.f32 %v5507_v58, %v1683_v39  ;;  %v1553_v3 = vadd.f32 1.4214138, %v1489_v22  ;;  %v1487_v63 = vmul.f32 %v5516_v62, %v1423_v27  ;;  %v5522_v16 = vld [vmem:[#allocation182_spill] sm:$0xff] }
 0x1d7   : > { %2530 = vmatpush.msrb.mxu3 %v2467_v18  ;;  %v2457_v37 = vmul.f32 %v2393_v38, %v4319_v49  ;;  %v1877_v61 = vmul.f32 %v5505_v26, %v1813_v51  ;;  %v1357_v19 = vmul.f32 1.0614054, %v5517_v36  ;;  %v4666_v32 = vsel %vm971_vm0, 1.0, %v5288_v1 }
 0x1d8   : > { %vm965_vm3 = vcmp.ge.f32.partialorder %v5518_v50, 0.0  ;;  %v2391_v44 = vadd.f32 1.0, %v2327_v48  ;;  %v1811_v45 = vadd.f32 0.2548296, %v1747_v31  ;;  %v1617_v53 = vmul.f32 %v5514_v28, %v1553_v3 }
 0x1d9   : > { %v1551_v47 = vadd.f32 1.4214138, %v1487_v63  ;;  %2499 = vmatpush.msrb.mxu2 %v2457_v37  ;;  %v2197_v30 = vmul.f32 %v4292_v21, %v1877_v61  ;;  %v1421_v49 = vadd.f32 -1.4531521, %v1357_v19  ;;  %v1355_v26 = vmul.f32 1.0614054, %v5519_v57 }
 0x1da   : > { %v4675_v0 = vsel %vm969_vm1, 1.0, %v5288_v1  ;;  %v2455_v55 = vmul.f32 %v2391_v44, %v5520_v46  ;;  %v1875_v29 = vmul.f32 %v5507_v58, %v1811_v45  ;;  %v1681_v12 = vadd.f32 -0.28449672, %v1617_v53  ;;  %v5521_v21 = vld [vmem:[#allocation117_spill] sm:$0xff]  ;;  %v5523_v58 = vld [vmem:[#allocation24_spill] sm:$0xff]  ;;  %v5524_v37 = vld [vmem:[#allocation94_spill] sm:$0xff] }
 0x1db   : > { %v1615_v10 = vmul.f32 %v5516_v62, %v1551_v47  ;;  %v2261_v52 = vsub.f32 1.0, %v2197_v30  ;;  %v1485_v5 = vmul.f32 %v5517_v36, %v1421_v49  ;;  %v1419_v9 = vadd.f32 -1.4531521, %v1355_v26  ;;  %v5525_v49 = vld [vmem:[#allocation5_spill] sm:$0xff]  ;;  %v5526_v26 = vld [vmem:[#allocation178_spill] sm:$0xff] }
 0x1dc   : > { %v1353_v25 = vmul.f32 1.0614054, %v5521_v21  ;;  %2500 = vmatpush.msrb.mxu2 %v2455_v55  ;;  %v2195_v39 = vmul.f32 %v5522_v16, %v1875_v29  ;;  %v1745_v42 = vmul.f32 %v5514_v28, %v1681_v12  ;;  %v4687_v27 = vsel %vm967_vm2, 1.0, %v5288_v1 }
 0x1dd   : > { %v1679_v22 = vadd.f32 -0.28449672, %v1615_v10  ;;  %vm963_vm4 = vcmp.ge.f32.partialorder %v5523_v58, 0.0  ;;  %v2325_v18 = vmul.f32 %v2261_v52, %v4598_v41  ;;  %v1549_v38 = vadd.f32 1.4214138, %v1485_v5  ;;  %v5527_v52 = vld [vmem:[#allocation171_spill] sm:$0xff] }
 0x1de   : > { %v1483_v51 = vmul.f32 %v5519_v57, %v1419_v9  ;;  %v1417_v48 = vadd.f32 -1.4531521, %v1353_v25  ;;  %v2259_v31 = vsub.f32 1.0, %v2195_v39  ;;  %v1809_v3 = vadd.f32 0.2548296, %v1745_v42  ;;  %v5528_v42 = vld [vmem:[#allocation165_spill] sm:$0xff] }
 0x1df   : > { %v1743_v63 = vmul.f32 %v5516_v62, %v1679_v22  ;;  %v1351_v61 = vmul.f32 1.0614054, %v5524_v37  ;;  %v2389_v19 = vadd.f32 1.0, %v2325_v18  ;;  %v1613_v44 = vmul.f32 %v5517_v36, %v1549_v38  ;;  %v5529_v38 = vld [vmem:[#allocation157_spill] sm:$0xff]  ;;  %v5537_v58 = vld [vmem:[#allocation131_spill] sm:$0xff] }
 0x1e0   : > { %v1547_v23 = vadd.f32 1.4214138, %v1483_v51  ;;  %v1481_v45 = vmul.f32 %v5521_v21, %v1417_v48  ;;  %v2323_v53 = vmul.f32 %v2259_v31, %v4609_v2  ;;  %v1873_v41 = vmul.f32 %v5514_v28, %v1809_v3 }
 0x1e1   : > { %v1807_v47 = vadd.f32 0.2548296, %v1743_v63  ;;  %v1415_v30 = vadd.f32 -1.4531521, %v1351_v61  ;;  %vm961_vm5 = vcmp.ge.f32.partialorder %v5525_v49, 0.0  ;;  %v2453_v46 = vmul.f32 %v2389_v19, %v5526_v26  ;;  %v5531_v61 = vld [vmem:[#allocation65_spill] sm:$0xff] }
 0x1e2   : > { %v1677_v55 = vadd.f32 -0.28449672, %v1613_v44  ;;  %v1611_v29 = vmul.f32 %v5519_v57, %v1547_v23  ;;  %v1545_v12 = vadd.f32 1.4214138, %v1481_v45  ;;  %v2387_v10 = vadd.f32 1.0, %v2323_v53  ;;  %v5532_v45 = vld [vmem:[#allocation18_spill] sm:$0xff] }
 0x1e3   : > { %v2193_v5 = vmul.f32 %v5527_v52, %v1873_v41  ;;  %v1871_v9 = vmul.f32 %v5516_v62, %v1807_v47  ;;  %v1479_v25 = vmul.f32 %v5524_v37, %v1415_v30  ;;  %2501 = vmatpush.msrb.mxu2 %v2453_v46  ;;  %v4709_v39 = vsel %vm965_vm3, 1.0, %v5288_v1  ;;  %v5530_v62 = vld [vmem:[#allocation54_spill] sm:$0xff] }
 0x1e4   : > { %v1741_v2 = vmul.f32 %v5517_v36, %v1677_v55  ;;  %v1675_v28 = vadd.f32 -0.28449672, %v1611_v29  ;;  %v1609_v16 = vmul.f32 %v5521_v21, %v1545_v12  ;;  %v2451_v22 = vmul.f32 %v2387_v10, %v5528_v42  ;;  %v5533_v12 = vld [vmem:[#allocation146_spill] sm:$0xff] }
 0x1e5   : > { %v2257_v18 = vsub.f32 1.0, %v2193_v5  ;;  %v2191_v51 = vmul.f32 %v5529_v38, %v1871_v9  ;;  %v1543_v48 = vadd.f32 1.4214138, %v1479_v25  ;;  %vm959_vm6 = vcmp.ge.f32.partialorder %v5530_v62, 0.0  ;;  %v5534_v9 = vld [vmem:[#allocation78_spill] sm:$0xff] }
 0x1e6   : > { %v1805_v31 = vadd.f32 0.2548296, %v1741_v2  ;;  %v1739_v3 = vmul.f32 %v5519_v57, %v1675_v28  ;;  %v1673_v63 = vadd.f32 -0.28449672, %v1609_v16  ;;  %v1349_v19 = vmul.f32 1.0614054, %v5531_v61  ;;  %2502 = vmatpush.msrb.mxu2 %v2451_v22 }
 0x1e7   : > { %v2321_v44 = vmul.f32 %v2257_v18, %v4630_v59  ;;  %v2255_v50 = vsub.f32 1.0, %v2191_v51  ;;  %v1607_v23 = vmul.f32 %v5524_v37, %v1543_v48  ;;  %v4719_v53 = vmul.f32 0.5, %v5532_v45  ;;  %v5535_v25 = vld [vmem:[#allocation154_spill] sm:$0xff]  ;;  %v5536_v16 = vld [vmem:[#allocation55_spill] sm:$0xff]  ;;  %v5538_v48 = vld [vmem:[#allocation8_spill] sm:$0xff] }
 0x1e8   : > { %v1869_v41 = vmul.f32 %v5517_v36, %v1805_v31  ;;  %v1803_v47 = vadd.f32 0.2548296, %v1739_v3  ;;  %v1737_v30 = vmul.f32 %v5521_v21, %v1673_v63  ;;  %v1413_v26 = vadd.f32 -1.4531521, %v1349_v19 }
 0x1e9   : > { %v2385_v46 = vadd.f32 1.0, %v2321_v44  ;;  %v2319_v55 = vmul.f32 %v2255_v50, %v4640_v43  ;;  %v1671_v29 = vadd.f32 -0.28449672, %v1607_v23  ;;  %v4727_v59 = vsel %vm963_vm4, 1.0, %v5288_v1  ;;  %v5540_v23 = vld [vmem:[#allocation118_spill] sm:$0xff] }
 0x1ea   : > { %v2189_v10 = vmul.f32 %v5533_v12, %v1869_v41  ;;  %v1867_v52 = vmul.f32 %v5519_v57, %v1803_v47  ;;  %v1801_v5 = vadd.f32 0.2548296, %v1737_v30  ;;  %v1477_v36 = vmul.f32 %v5531_v61, %v1413_v26  ;;  %v5539_v57 = vld [vmem:[#allocation142_spill] sm:$0xff] }
 0x1eb   : > { %vm957_vm7 = vcmp.ge.f32.partialorder %v5534_v9, 0.0  ;;  %v2449_v2 = vmul.f32 %v2385_v46, %v5535_v25  ;;  %v2383_v28 = vadd.f32 1.0, %v2319_v55  ;;  %v1735_v43 = vmul.f32 %v5524_v37, %v1671_v29  ;;  %v5541_v30 = vld [vmem:[#allocation22_spill] sm:$0xff]  ;;  %v5542_v46 = vld [vmem:[#allocation45_spill] sm:$0xff] }
 0x1ec   : > { %v1347_v42 = vmul.f32 1.0614054, %v5536_v16  ;;  %v2253_v22 = vsub.f32 1.0, %v2189_v10  ;;  %v2187_v18 = vmul.f32 %v5537_v58, %v1867_v52  ;;  %v1865_v38 = vmul.f32 %v5521_v21, %v1801_v5  ;;  %v5543_v10 = vld [vmem:[#allocation96_spill] sm:$0xff]  ;;  %v5544_v25 = vld [vmem:[#allocation133_spill] sm:$0xff] }
 0x1ed   : > { %v1541_v51 = vadd.f32 1.4214138, %v1477_v36  ;;  %vm955_vm8 = vcmp.ge.f32.partialorder %v5538_v48, 0.0  ;;  %2503 = vmatpush.msrb.mxu2 %v2449_v2  ;;  %v2447_v31 = vmul.f32 %v2383_v28, %v5539_v57  ;;  %v1799_v3 = vadd.f32 0.2548296, %v1735_v43 }
 0x1ee   : > { %v1411_v63 = vadd.f32 -1.4531521, %v1347_v42  ;;  %v4743_v19 = vsel %vm961_vm5, 1.0, %v5288_v1  ;;  %v2317_v44 = vmul.f32 %v2253_v22, %v4655_v24  ;;  %v2251_v50 = vsub.f32 1.0, %v2187_v18  ;;  %v5545_v18 = vld [vmem:[#allocation82_spill] sm:$0xff] }
 0x1ef   : > { %v2185_v45 = vmul.f32 %v5540_v23, %v1865_v38  ;;  %v1605_v21 = vmul.f32 %v5531_v61, %v1541_v51  ;;  %vm993_vm9 = vcmp.ge.f32.partialorder %v4473_v11, 0.0  ;;  %2504 = vmatpush.msrb.mxu2 %v2447_v31  ;;  %v1863_v41 = vmul.f32 %v5524_v37, %v1799_v3  ;;  %v5546_v51 = vld [vmem:[#allocation113_spill] sm:$0xff]  ;;  %v5547_v3 = vld [vmem:[#allocation74_spill] sm:$0xff] }
 0x1f0   : > { %v1475_v47 = vmul.f32 %v5536_v16, %v1411_v63  ;;  %v1345_v26 = vmul.f32 1.0614054, %v5541_v30  ;;  %v4753_v49 = vmul.f32 0.5, %v5542_v46  ;;  %v2381_v55 = vadd.f32 1.0, %v2317_v44 }
 0x1f1   : > { %v2315_v24 = vmul.f32 %v2251_v50, %v4666_v32  ;;  %v2249_v29 = vsub.f32 1.0, %v2185_v45  ;;  %v1669_v12 = vadd.f32 -0.28449672, %v1605_v21  ;;  %v2183_v52 = vmul.f32 %v5543_v10, %v1863_v41  ;;  %v5548_v45 = vld [vmem:[#allocation101_spill] sm:$0xff] }
 0x1f2   : > { %v1539_v5 = vadd.f32 1.4214138, %v1475_v47  ;;  %v1409_v36 = vadd.f32 -1.4531521, %v1345_v26  ;;  %v4760_v37 = vsel %vm959_vm6, 1.0, %v5288_v1  ;;  %v2445_v2 = vmul.f32 %v2381_v55, %v5544_v25  ;;  %v5549_v26 = vld [vmem:[#allocation102_spill] sm:$0xff] }
 0x1f3   : > { %v2379_v28 = vadd.f32 1.0, %v2315_v24  ;;  %v2313_v43 = vmul.f32 %v2249_v29, %v4675_v0  ;;  %v1733_v42 = vmul.f32 %v5531_v61, %v1669_v12  ;;  %v2247_v22 = vsub.f32 1.0, %v2183_v52  ;;  %v5550_v12 = vld [vmem:[#allocation68_spill] sm:$0xff]  ;;  %v5551_v52 = vld [vmem:[#allocation6_spill] sm:$0xff] }
 0x1f4   : > { %v1603_v32 = vmul.f32 %v5536_v16, %v1539_v5  ;;  %v1473_v58 = vmul.f32 %v5541_v30, %v1409_v36  ;;  %v1343_v38 = vmul.f32 1.0614054, %v5545_v18  ;;  %2505 = vmatpush.msrb.mxu2 %v2445_v2  ;;  %v4770_v63 = vmul.f32 0.5, %v5547_v3  ;;  %v5552_v36 = vld [vmem:[#allocation81_spill] sm:$0xff] }
 0x1f5   : > { %v2443_v57 = vmul.f32 %v2379_v28, %v5546_v51  ;;  %v2377_v62 = vadd.f32 1.0, %v2313_v43  ;;  %v1797_v31 = vadd.f32 0.2548296, %v1733_v42  ;;  %v2311_v44 = vmul.f32 %v2247_v22, %v4687_v27 }
 0x1f6   : > { %v1667_v0 = vadd.f32 -0.28449672, %v1603_v32  ;;  %v1537_v50 = vadd.f32 1.4214138, %v1473_v58  ;;  %v1407_v23 = vadd.f32 -1.4531521, %v1343_v38  ;;  %3007 = vpow2.f32 %v4432_v56 }
 0x1f7   : > { %2506 = vmatpush.msrb.mxu2 %v2443_v57  ;;  %v2441_v21 = vmul.f32 %v2377_v62, %v5548_v45  ;;  %v1861_v41 = vmul.f32 %v5531_v61, %v1797_v31  ;;  %v4778_v47 = vsel %vm957_vm7, 1.0, %v5288_v1  ;;  %v1341_v46 = vmul.f32 1.0614054, %v5549_v26  ;;  %v5553_v32 = vld [vmem:[#allocation28_spill] sm:$0xff] }
 0x1f8   : > { %vm991_vm10 = vcmp.ge.f32.partialorder %v4383_v14, 0.0  ;;  %v2375_v55 = vadd.f32 1.0, %v2311_v44  ;;  %v1731_v27 = vmul.f32 %v5536_v16, %v1667_v0  ;;  %v1601_v24 = vmul.f32 %v5541_v30, %v1537_v50  ;;  %v5554_v50 = vld [vmem:[#allocation57_spill] sm:$0xff]  ;;  %v5671_v56 = vld [vmem:[#allocation20_spill] sm:$0xff] }
 0x1f9   : > { %v1471_v29 = vmul.f32 %v5545_v18, %v1407_v23  ;;  %2507 = vmatpush.msrb.mxu2 %v2441_v21  ;;  %v2181_v10 = vmul.f32 %v5550_v12, %v1861_v41  ;;  %v1405_v61 = vadd.f32 -1.4531521, %v1341_v46  ;;  %v4787_v5 = vmul.f32 0.5, %v5551_v52  ;;  %v5555_v12 = vld [vmem:[#allocation52_spill] sm:$0xff] }
 0x1fa   : > { %v4792_v9 = vsel %vm955_vm8, 1.0, %v5288_v1  ;;  %v2439_v25 = vmul.f32 %v2375_v55, %v5552_v36  ;;  %v1795_v2 = vadd.f32 0.2548296, %v1731_v27  ;;  %v1665_v28 = vadd.f32 -0.28449672, %v1601_v24 }
 0x1fb   : > { %v1535_v43 = vadd.f32 1.4214138, %v1471_v29  ;;  %v2245_v42 = vsub.f32 1.0, %v2181_v10  ;;  %v1469_v22 = vmul.f32 %v5549_v26, %v1405_v61  ;;  %v1339_v58 = vmul.f32 1.0614054, %v5553_v32 }
 0x1fc   : > { %v4800_v38 = vsel %vm993_vm9, 1.0, %v5288_v1  ;;  %2508 = vmatpush.msrb.mxu2 %v2439_v25  ;;  %v1859_v48 = vmul.f32 %v5536_v16, %v1795_v2  ;;  %v1729_v51 = vmul.f32 %v5541_v30, %v1665_v28  ;;  %v1377_v62 = vmul.f32 1.0614054, %v4524_v60  ;;  %v5556_v2 = vld [vmem:[#allocation23_spill] sm:$0xff] }
 0x1fd   : > { %v1599_v57 = vmul.f32 %v5545_v18, %v1535_v43  ;;  %v2309_v31 = vmul.f32 %v2245_v42, %v4709_v39  ;;  %v1533_v3 = vadd.f32 1.4214138, %v1469_v22  ;;  %v1403_v44 = vadd.f32 -1.4531521, %v1339_v58 }
 0x1fe   : > { %v1368_v0 = vmul.f32 1.0614054, %v4330_v7  ;;  %v2179_v23 = vmul.f32 %v5554_v50, %v1859_v48  ;;  %v1793_v11 = vadd.f32 0.2548296, %v1729_v51  ;;  %v1441_v21 = vadd.f32 -1.4531521, %v1377_v62 }
 0x1ff   : > { %v1663_v45 = vadd.f32 -0.28449672, %v1599_v57  ;;  %v2373_v41 = vadd.f32 1.0, %v2309_v31  ;;  %v1597_v16 = vmul.f32 %v5549_v26, %v1533_v3  ;;  %v1467_v46 = vmul.f32 %v5553_v32, %v1403_v44 }
 0x200   : > { %v1432_v55 = vadd.f32 -1.4531521, %v1368_v0  ;;  %v2243_v27 = vsub.f32 1.0, %v2179_v23  ;;  %v1857_v24 = vmul.f32 %v5541_v30, %v1793_v11  ;;  %v1505_v29 = vmul.f32 %v4524_v60, %v1441_v21  ;;  %v5557_v11 = vld [vmem:[#allocation86_spill] sm:$0xff] }
 0x201   : > { %v1727_v39 = vmul.f32 %v5545_v18, %v1663_v45  ;;  %vm989_vm11 = vcmp.ge.f32.partialorder %v4311_v34, 0.0  ;;  %v2437_v10 = vmul.f32 %v2373_v41, %v5555_v12  ;;  %v1661_v61 = vadd.f32 -0.28449672, %v1597_v16  ;;  %v5559_v12 = vld [vmem:[#allocation10_spill] sm:$0xff]  ;;  %v5562_v34 = vld [vmem:[#allocation196_spill] sm:$0xff] }
 0x202   : > { %v1531_v52 = vadd.f32 1.4214138, %v1467_v46  ;;  %v1496_v36 = vmul.f32 %v4330_v7, %v1432_v55  ;;  %v2307_v25 = vmul.f32 %v2243_v27, %v4727_v59  ;;  %v2177_v28 = vmul.f32 %v5556_v2, %v1857_v24  ;;  %v5558_v24 = vld [vmem:[#allocation105_spill] sm:$0xff] }
 0x203   : > { %v1791_v43 = vadd.f32 0.2548296, %v1727_v39  ;;  %v1569_v42 = vadd.f32 1.4214138, %v1505_v29  ;;  %2509 = vmatpush.msrb.mxu2 %v2437_v10  ;;  %v1725_v30 = vmul.f32 %v5549_v26, %v1661_v61  ;;  %v4824_v48 = vsel %vm991_vm10, 1.0, %v5288_v1 }
 0x204   : > { %v1595_v22 = vmul.f32 %v5553_v32, %v1531_v52  ;;  %v1560_v58 = vadd.f32 1.4214138, %v1496_v36  ;;  %v2371_v51 = vadd.f32 1.0, %v2307_v25  ;;  %v2241_v57 = vsub.f32 1.0, %v2177_v28 }
 0x205   : > { %v1855_v62 = vmul.f32 %v5545_v18, %v1791_v43  ;;  %v1633_v59 = vmul.f32 %v4524_v60, %v1569_v42  ;;  %v1789_v31 = vadd.f32 0.2548296, %v1725_v30  ;;  %v1375_v0 = vmul.f32 1.0614054, %v4447_v6 }
 0x206   : > { %v1659_v3 = vadd.f32 -0.28449672, %v1595_v22  ;;  %v1624_v44 = vmul.f32 %v4330_v7, %v1560_v58  ;;  %v2435_v50 = vmul.f32 %v2371_v51, %v4719_v53  ;;  %v2305_v23 = vmul.f32 %v2241_v57, %v4743_v19  ;;  %v5560_v51 = vld [vmem:[#allocation32_spill] sm:$0xff] }
 0x207   : > { %v2175_v14 = vmul.f32 %v5557_v11, %v1855_v62  ;;  %v1697_v45 = vadd.f32 -0.28449672, %v1633_v59  ;;  %v1853_v21 = vmul.f32 %v5549_v26, %v1789_v31  ;;  %v1439_v16 = vadd.f32 -1.4531521, %v1375_v0 }
 0x208   : > { %v1723_v41 = vmul.f32 %v5553_v32, %v1659_v3  ;;  %v1688_v18 = vadd.f32 -0.28449672, %v1624_v44  ;;  %vm987_vm12 = vcmp.ge.f32.partialorder %v4275_v8, 0.0  ;;  %2510 = vmatpush.msrb.mxu2 %v2435_v50  ;;  %v2369_v46 = vadd.f32 1.0, %v2305_v23  ;;  %v5561_v3 = vld [vmem:[#allocation207_spill] sm:$0xff] }
 0x209   : > { %v2239_v55 = vsub.f32 1.0, %v2175_v14  ;;  %v1761_v27 = vmul.f32 %v4524_v60, %v1697_v45  ;;  %v1366_v53 = vmul.f32 1.0614054, %v4289_v4  ;;  %v2173_v19 = vmul.f32 %v5558_v24, %v1853_v21  ;;  %v5564_v24 = vld [vmem:[#allocation193_spill] sm:$0xff] }
 0x20a   : > { %v1787_v39 = vadd.f32 0.2548296, %v1723_v41  ;;  %v1752_v29 = vmul.f32 %v4330_v7, %v1688_v18  ;;  %v1503_v26 = vmul.f32 %v4447_v6, %v1439_v16  ;;  %v2433_v10 = vmul.f32 %v2369_v46, %v5559_v12 }
 0x20b   : > { %v2303_v61 = vmul.f32 %v2239_v55, %v4760_v37  ;;  %v1825_v52 = vadd.f32 0.2548296, %v1761_v27  ;;  %v1430_v36 = vadd.f32 -1.4531521, %v1366_v53  ;;  %v2237_v25 = vsub.f32 1.0, %v2173_v19 }
 0x20c   : > { %v1851_v2 = vmul.f32 %v5553_v32, %v1787_v39  ;;  %v1816_v28 = vadd.f32 0.2548296, %v1752_v29  ;;  %v1567_v43 = vadd.f32 1.4214138, %v1503_v26  ;;  %2511 = vmatpush.msrb.mxu2 %v2433_v10  ;;  %v4849_v58 = vsel %vm989_vm11, 1.0, %v5288_v1 }
 0x20d   : > { %v2367_v42 = vadd.f32 1.0, %v2303_v61  ;;  %v1889_v30 = vmul.f32 %v4524_v60, %v1825_v52  ;;  %v1494_v22 = vmul.f32 %v4289_v4, %v1430_v36  ;;  %v2301_v37 = vmul.f32 %v2237_v25, %v4778_v47  ;;  %v4878_v10 = vld [vmem:[%s5164_s3] sm:$0x1f] }
 0x20e   : > { %v2171_v57 = vmul.f32 %v5560_v51, %v1851_v2  ;;  %v1880_v62 = vmul.f32 %v4330_v7, %v1816_v28  ;;  %v1631_v32 = vmul.f32 %v4447_v6, %v1567_v43  ;;  %v1373_v44 = vmul.f32 1.0614054, %v5561_v3  ;;  %v5563_v7 = vld [vmem:[#allocation184_spill] sm:$0xff]  ;;  %v5565_v36 = vld [vmem:[#allocation199_spill] sm:$0xff] }
 0x20f   : > { %v2431_v59 = vmul.f32 %v2367_v42, %v4753_v49  ;;  %v2209_v31 = vmul.f32 %v4533_v17, %v1889_v30  ;;  %v1558_v60 = vadd.f32 1.4214138, %v1494_v22  ;;  %v2365_v0 = vadd.f32 1.0, %v2301_v37  ;;  %v5566_v42 = vld [vmem:[#allocation192_spill] sm:$0xff]  ;;  %v5567_v37 = vld [vmem:[#allocation173_spill] sm:$0xff] }
 0x210   : > { %v2235_v50 = vsub.f32 1.0, %v2171_v57  ;;  %v2200_v23 = vmul.f32 %v5562_v34, %v1880_v62  ;;  %v1695_v11 = vadd.f32 -0.28449672, %v1631_v32  ;;  %v1437_v45 = vadd.f32 -1.4531521, %v1373_v44  ;;  %v5568_v62 = vld [vmem:[#allocation160_spill] sm:$0xff] }
 0x211   : > { %2512 = vmatpush.msrb.mxu2 %v2431_v59  ;;  %v2273_v47 = vsub.f32 1.0, %v2209_v31  ;;  %v1622_v14 = vmul.f32 %v4289_v4, %v1558_v60  ;;  %v1364_v21 = vmul.f32 1.0614054, %v5563_v7  ;;  %v2429_v41 = vmul.f32 %v2365_v0, %v4770_v63  ;;  %v5570_v0 = vld [vmem:[#allocation191_spill] sm:$0xff] }
 0x212   : > { %v2299_v49 = vmul.f32 %v2235_v50, %v4792_v9  ;;  %v2264_v17 = vsub.f32 1.0, %v2200_v23  ;;  %v1759_v18 = vmul.f32 %v4447_v6, %v1695_v11  ;;  %v1501_v55 = vmul.f32 %v5561_v3, %v1437_v45 }
 0x213   : > { %v2337_v16 = vmul.f32 %v2273_v47, %v4800_v38  ;;  %v1686_v46 = vadd.f32 -0.28449672, %v1622_v14  ;;  %v1428_v27 = vadd.f32 -1.4531521, %v1364_v21  ;;  %2513 = vmatpush.msrb.mxu2 %v2429_v41  ;;  %v4870_v63 = vsel %vm987_vm12, 1.0, %v5288_v1 }
 0x214   : > { %v2363_v53 = vadd.f32 1.0, %v2299_v49  ;;  %v2328_v19 = vmul.f32 %v2264_v17, %v5564_v24  ;;  %v1823_v39 = vadd.f32 0.2548296, %v1759_v18  ;;  %v1565_v26 = vadd.f32 1.4214138, %v1501_v55  ;;  %v5571_v55 = vld [vmem:[#allocation187_spill] sm:$0xff] }
 0x215   : > { %v2401_v9 = vadd.f32 1.0, %v2337_v16  ;;  %v1750_v29 = vmul.f32 %v4289_v4, %v1686_v46  ;;  %v1492_v38 = vmul.f32 %v5563_v7, %v1428_v27  ;;  %v1371_v8 = vmul.f32 1.0614054, %v5565_v36 }
 0x216   : > { %v2427_v12 = vmul.f32 %v2363_v53, %v4787_v5  ;;  %v2392_v61 = vadd.f32 1.0, %v2328_v19  ;;  %v1887_v52 = vmul.f32 %v4447_v6, %v1823_v39  ;;  %v1629_v28 = vmul.f32 %v5561_v3, %v1565_v26 }
 0x217   : > { %v2465_v25 = vmul.f32 %v2401_v9, %v4470_v15  ;;  %v1814_v2 = vadd.f32 0.2548296, %v1750_v29  ;;  %v1556_v43 = vadd.f32 1.4214138, %v1492_v38  ;;  %v1435_v22 = vadd.f32 -1.4531521, %v1371_v8 }
 0x218   : > { %2514 = vmatpush.msrb.mxu2 %v2427_v12  ;;  %v2456_v30 = vmul.f32 %v2392_v61, %v5566_v42  ;;  %v2207_v5 = vmul.f32 %v4454_v20, %v1887_v52  ;;  %v1362_v51 = vmul.f32 1.0614054, %v5567_v37  ;;  %v1693_v57 = vadd.f32 -0.28449672, %v1629_v28  ;;  %v5569_v20 = vld [vmem:[#allocation177_spill] sm:$0xff] }
 0x219   : > { %2515 = vmatmul.f32.vlgmr.msrb.gmra.mxu2 %v4878_v10  ;;  %2531 = vmatpush.msrb.mxu3 %v2465_v25  ;;  %v1878_v6 = vmul.f32 %v4289_v4, %v1814_v2  ;;  %v1620_v15 = vmul.f32 %v5563_v7, %v1556_v43  ;;  %v1360_v32 = vmul.f32 1.0614054, %v5568_v62  ;;  %v1499_v31 = vmul.f32 %v5565_v36, %v1435_v22  ;;  %v5572_v25 = vld [vmem:[#allocation148_spill] sm:$0xff]  ;;  %v5574_v42 = vld [vmem:[#allocation185_spill] sm:$0xff] }
 0x21a   : > { %2539 = vmatpush.msra.mxu2 %v4457_v13  ;;  %v2271_v59 = vsub.f32 1.0, %v2207_v5  ;;  %v1426_v60 = vadd.f32 -1.4531521, %v1362_v51  ;;  %v1400_v44 = vmul.f32 1.0614054, %v5569_v20  ;;  %v1757_v34 = vmul.f32 %v5561_v3, %v1693_v57 }
 0x21b   : > { %v2198_v50 = vmul.f32 %v5570_v0, %v1878_v6  ;;  %v1684_v23 = vadd.f32 -0.28449672, %v1620_v15  ;;  %v1424_v11 = vadd.f32 -1.4531521, %v1360_v32  ;;  %v1563_v47 = vadd.f32 1.4214138, %v1499_v31 }
 0x21c   : > { %2540 = vmatpush.msra.mxu2 %v2456_v30  ;;  %v2335_v4 = vmul.f32 %v2271_v59, %v4824_v48  ;;  %v1490_v14 = vmul.f32 %v5567_v37, %v1426_v60  ;;  %v1464_v45 = vadd.f32 -1.4531521, %v1400_v44  ;;  %v1821_v21 = vadd.f32 0.2548296, %v1757_v34  ;;  %v5575_v32 = vld [vmem:[#allocation166_spill] sm:$0xff]  ;;  %v5576_v34 = vld [vmem:[#allocation175_spill] sm:$0xff] }
 0x21d   : > { %v2262_v13 = vsub.f32 1.0, %v2198_v50  ;;  %v1748_v41 = vmul.f32 %v5563_v7, %v1684_v23  ;;  %v1488_v49 = vmul.f32 %v5568_v62, %v1424_v11  ;;  %v1627_v18 = vmul.f32 %v5565_v36, %v1563_v47  ;;  %v5577_v47 = vld [vmem:[#allocation202_spill] sm:$0xff] }
 0x21e   : > { %v2399_v17 = vadd.f32 1.0, %v2335_v4  ;;  %v1554_v16 = vadd.f32 1.4214138, %v1490_v14  ;;  %v1528_v46 = vmul.f32 %v5569_v20, %v1464_v45  ;;  %v1885_v48 = vmul.f32 %v5561_v3, %v1821_v21  ;;  %v5578_v21 = vld [vmem:[#allocation198_spill] sm:$0xff] }
 0x21f   : > { %v2326_v27 = vmul.f32 %v2262_v13, %v5571_v55  ;;  %v1812_v53 = vadd.f32 0.2548296, %v1748_v41  ;;  %v1552_v24 = vadd.f32 1.4214138, %v1488_v49  ;;  %v1691_v39 = vadd.f32 -0.28449672, %v1627_v18 }
 0x220   : > { %v2463_v19 = vmul.f32 %v2399_v17, %v4418_v35  ;;  %v1618_v9 = vmul.f32 %v5567_v37, %v1554_v16  ;;  %v1592_v29 = vadd.f32 1.4214138, %v1528_v46  ;;  %v2205_v38 = vmul.f32 %v4414_v33, %v1885_v48  ;;  %v5573_v35 = vld [vmem:[#allocation183_spill] sm:$0xff]  ;;  %v5579_v16 = vld [vmem:[#allocation174_spill] sm:$0xff]  ;;  %v5580_v48 = vld [vmem:[#allocation169_spill] sm:$0xff] }
 0x221   : > { %v2390_v26 = vadd.f32 1.0, %v2326_v27  ;;  %v1876_v12 = vmul.f32 %v5563_v7, %v1812_v53  ;;  %v1616_v61 = vmul.f32 %v5568_v62, %v1552_v24  ;;  %v1755_v52 = vmul.f32 %v5565_v36, %v1691_v39  ;;  %v5582_v39 = vld [vmem:[#allocation134_spill] sm:$0xff] }
 0x222   : > { %2532 = vmatpush.msrb.mxu3 %v2463_v19  ;;  %v1682_v8 = vadd.f32 -0.28449672, %v1618_v9  ;;  %v1656_v3 = vmul.f32 %v5569_v20, %v1592_v29  ;;  %v1358_v2 = vmul.f32 1.0614054, %v5572_v25  ;;  %v2269_v43 = vsub.f32 1.0, %v2205_v38 }
 0x223   : > { %v2454_v28 = vmul.f32 %v2390_v26, %v5573_v35  ;;  %v2196_v30 = vmul.f32 %v5574_v42, %v1876_v12  ;;  %v1680_v5 = vadd.f32 -0.28449672, %v1616_v61  ;;  %v1819_v22 = vadd.f32 0.2548296, %v1755_v52  ;;  %v5583_v26 = vld [vmem:[#allocation179_spill] sm:$0xff] }
 0x224   : > { %v1746_v33 = vmul.f32 %v5567_v37, %v1682_v8  ;;  %v1720_v7 = vadd.f32 -0.28449672, %v1656_v3  ;;  %v1422_v51 = vadd.f32 -1.4531521, %v1358_v2  ;;  %v2333_v6 = vmul.f32 %v2269_v43, %v4849_v58  ;;  %v5584_v8 = vld [vmem:[#allocation153_spill] sm:$0xff]  ;;  %v5585_v35 = vld [vmem:[#allocation163_spill] sm:$0xff] }
 0x225   : > { %2541 = vmatpush.msra.mxu2 %v2454_v28  ;;  %v2260_v57 = vsub.f32 1.0, %v2196_v30  ;;  %v1744_v15 = vmul.f32 %v5568_v62, %v1680_v5  ;;  %v1398_v59 = vmul.f32 1.0614054, %v5575_v32  ;;  %v1883_v31 = vmul.f32 %v5565_v36, %v1819_v22  ;;  %v5586_v30 = vld [vmem:[#allocation150_spill] sm:$0xff] }
 0x226   : > { %v1810_v60 = vadd.f32 0.2548296, %v1746_v33  ;;  %v1784_v44 = vmul.f32 %v5569_v20, %v1720_v7  ;;  %v1486_v0 = vmul.f32 %v5572_v25, %v1422_v51  ;;  %v2397_v50 = vadd.f32 1.0, %v2333_v6  ;;  %v5587_v7 = vld [vmem:[#allocation197_spill] sm:$0xff]  ;;  %v4945_v6 = vld [vmem:[%s5164_s3 + $0x8] sm:$0x1f] }
 0x227   : > { %v2324_v23 = vmul.f32 %v2260_v57, %v5576_v34  ;;  %v1808_v11 = vadd.f32 0.2548296, %v1744_v15  ;;  %v1462_v4 = vadd.f32 -1.4531521, %v1398_v59  ;;  %v2203_v14 = vmul.f32 %v5577_v47, %v1883_v31  ;;  %v5588_v15 = vld [vmem:[#allocation167_spill] sm:$0xff]  ;;  %v5589_v34 = vld [vmem:[#allocation161_spill] sm:$0xff] }
 0x228   : > { %v1874_v58 = vmul.f32 %v5567_v37, %v1810_v60  ;;  %v1848_v45 = vadd.f32 0.2548296, %v1784_v44  ;;  %v1550_v13 = vadd.f32 1.4214138, %v1486_v0  ;;  %v2461_v41 = vmul.f32 %v2397_v50, %v5578_v21  ;;  %v5581_v37 = vld [vmem:[#allocation162_spill] sm:$0xff]  ;;  %v5590_v47 = vld [vmem:[#allocation121_spill] sm:$0xff] }
 0x229   : > { %v2388_v49 = vadd.f32 1.0, %v2324_v23  ;;  %v1872_v36 = vmul.f32 %v5568_v62, %v1808_v11  ;;  %v1526_v17 = vmul.f32 %v5575_v32, %v1462_v4  ;;  %v2267_v18 = vsub.f32 1.0, %v2203_v14 }
 0x22a   : > { %v2194_v46 = vmul.f32 %v5579_v16, %v1874_v58  ;;  %v1912_v55 = vmul.f32 %v5569_v20, %v1848_v45  ;;  %v1614_v27 = vmul.f32 %v5572_v25, %v1550_v13  ;;  %2533 = vmatpush.msrb.mxu3 %v2461_v41  ;;  %v1356_v9 = vmul.f32 1.0614054, %v5582_v39  ;;  %v5591_v58 = vld [vmem:[#allocation149_spill] sm:$0xff] }
 0x22b   : > { %v2452_v53 = vmul.f32 %v2388_v49, %v5580_v48  ;;  %v2192_v24 = vmul.f32 %v5581_v37, %v1872_v36  ;;  %v1590_v19 = vadd.f32 1.4214138, %v1526_v17  ;;  %v2331_v29 = vmul.f32 %v2267_v18, %v4870_v63  ;;  %v5592_v49 = vld [vmem:[#allocation203_spill] sm:$0xff]  ;;  %v5593_v36 = vld [vmem:[#allocation164_spill] sm:$0xff]  ;;  %v5596_v37 = vld [vmem:[#allocation98_spill] sm:$0xff] }
 0x22c   : > { %v2258_v62 = vsub.f32 1.0, %v2194_v46  ;;  %v2232_v38 = vmul.f32 %v5583_v26, %v1912_v55  ;;  %v1678_v12 = vadd.f32 -0.28449672, %v1614_v27  ;;  %v1420_v52 = vadd.f32 -1.4531521, %v1356_v9  ;;  %v5594_v18 = vld [vmem:[#allocation151_spill] sm:$0xff] }
 0x22d   : > { %2542 = vmatpush.msra.mxu2 %v2452_v53  ;;  %v2256_v61 = vsub.f32 1.0, %v2192_v24  ;;  %v1654_v20 = vmul.f32 %v5575_v32, %v1590_v19  ;;  %v1396_v3 = vmul.f32 1.0614054, %v5584_v8  ;;  %v2395_v2 = vadd.f32 1.0, %v2331_v29  ;;  %v5595_v55 = vld [vmem:[#allocation141_spill] sm:$0xff] }
 0x22e   : > { %v2322_v28 = vmul.f32 %v2258_v62, %v5585_v35  ;;  %v2296_v43 = vsub.f32 1.0, %v2232_v38  ;;  %v1742_v42 = vmul.f32 %v5572_v25, %v1678_v12  ;;  %v1484_v22 = vmul.f32 %v5582_v39, %v1420_v52  ;;  %v5597_v62 = vld [vmem:[#allocation126_spill] sm:$0xff]  ;;  %v5598_v38 = vld [vmem:[#allocation168_spill] sm:$0xff] }
 0x22f   : > { %v2320_v5 = vmul.f32 %v2256_v61, %v5586_v30  ;;  %v1718_v63 = vadd.f32 -0.28449672, %v1654_v20  ;;  %v1460_v33 = vadd.f32 -1.4531521, %v1396_v3  ;;  %v2459_v51 = vmul.f32 %v2395_v2, %v5587_v7 }
 0x230   : > { %v2386_v57 = vadd.f32 1.0, %v2322_v28  ;;  %v2360_v59 = vmul.f32 %v2296_v43, %v5588_v15  ;;  %v1806_v31 = vadd.f32 0.2548296, %v1742_v42  ;;  %v1548_v0 = vadd.f32 1.4214138, %v1484_v22 }
 0x231   : > { %v2384_v60 = vadd.f32 1.0, %v2320_v5  ;;  %v1782_v44 = vmul.f32 %v5575_v32, %v1718_v63  ;;  %v1524_v50 = vmul.f32 %v5584_v8, %v1460_v33  ;;  %2534 = vmatpush.msrb.mxu3 %v2459_v51  ;;  %v1354_v14 = vmul.f32 1.0614054, %v5590_v47  ;;  %v5600_v51 = vld [vmem:[#allocation159_spill] sm:$0xff] }
 0x232   : > { %v2450_v23 = vmul.f32 %v2386_v57, %v5589_v34  ;;  %v2424_v11 = vadd.f32 1.0, %v2360_v59  ;;  %v1870_v4 = vmul.f32 %v5572_v25, %v1806_v31  ;;  %2535 = vmatmul.f32.vlgmr.msrb.gmra.mxu3 %v4945_v6  ;;  %v1612_v21 = vmul.f32 %v5582_v39, %v1548_v0 }
 0x233   : > { %v2448_v45 = vmul.f32 %v2384_v60, %v5591_v58  ;;  %v1846_v13 = vadd.f32 0.2548296, %v1782_v44  ;;  %v1588_v41 = vadd.f32 1.4214138, %v1524_v50  ;;  %2559 = vmatpush.msra.mxu3 %v5592_v49  ;;  %v1418_v46 = vadd.f32 -1.4531521, %v1354_v14 }
 0x234   : > { %2543 = vmatpush.msra.mxu2 %v2450_v23  ;;  %v2488_v17 = vmul.f32 %v2424_v11, %v5593_v36  ;;  %v2190_v16 = vmul.f32 %v5594_v18, %v1870_v4  ;;  %v1394_v25 = vmul.f32 1.0614054, %v5595_v55  ;;  %v1676_v48 = vadd.f32 -0.28449672, %v1612_v21  ;;  %v5601_v60 = vld [vmem:[#allocation135_spill] sm:$0xff]  ;;  %v5602_v11 = vld [vmem:[#allocation136_spill] sm:$0xff] }
 0x235   : > { %v1910_v27 = vmul.f32 %v5575_v32, %v1846_v13  ;;  %v1652_v53 = vmul.f32 %v5584_v8, %v1588_v41  ;;  %v1352_v24 = vmul.f32 1.0614054, %v5596_v37  ;;  %v1482_v9 = vmul.f32 %v5590_v47, %v1418_v46  ;;  %v5599_v32 = vld [vmem:[#allocation138_spill] sm:$0xff]  ;;  %v5604_v49 = vld [vmem:[#allocation152_spill] sm:$0xff]  ;;  %v5605_v18 = vld [vmem:[#allocation155_spill] sm:$0xff] }
 0x236   : > { %2544 = vmatpush.msra.mxu2 %v2448_v45  ;;  %2560 = vmatpush.msra.mxu3 %v2488_v17  ;;  %v2254_v19 = vsub.f32 1.0, %v2190_v16  ;;  %v1458_v29 = vadd.f32 -1.4531521, %v1394_v25  ;;  %v1392_v26 = vmul.f32 1.0614054, %v5597_v62  ;;  %v1740_v61 = vmul.f32 %v5582_v39, %v1676_v48  ;;  %v5603_v21 = vld [vmem:[#allocation70_spill] sm:$0xff] }
 0x237   : > { %v2230_v12 = vmul.f32 %v5598_v38, %v1910_v27  ;;  %v1716_v20 = vadd.f32 -0.28449672, %v1652_v53  ;;  %v1416_v52 = vadd.f32 -1.4531521, %v1352_v24  ;;  %v1546_v2 = vadd.f32 1.4214138, %v1482_v9 }
 0x238   : > { %v2318_v3 = vmul.f32 %v2254_v19, %v5599_v32  ;;  %v1522_v35 = vmul.f32 %v5595_v55, %v1458_v29  ;;  %v1456_v28 = vadd.f32 -1.4531521, %v1392_v26  ;;  %v1804_v42 = vadd.f32 0.2548296, %v1740_v61  ;;  %v5606_v53 = vld [vmem:[#allocation123_spill] sm:$0xff]  ;;  %v5607_v29 = vld [vmem:[#allocation114_spill] sm:$0xff] }
 0x239   : > { %v2294_v43 = vsub.f32 1.0, %v2230_v12  ;;  %v1780_v30 = vmul.f32 %v5584_v8, %v1716_v20  ;;  %v1480_v5 = vmul.f32 %v5596_v37, %v1416_v52  ;;  %v1610_v22 = vmul.f32 %v5590_v47, %v1546_v2  ;;  %v5608_v32 = vld [vmem:[#allocation145_spill] sm:$0xff] }
 0x23a   : > { %v2382_v63 = vadd.f32 1.0, %v2318_v3  ;;  %v1586_v33 = vadd.f32 1.4214138, %v1522_v35  ;;  %v1520_v7 = vmul.f32 %v5597_v62, %v1456_v28  ;;  %v1868_v15 = vmul.f32 %v5582_v39, %v1804_v42  ;;  %v5609_v28 = vld [vmem:[#allocation122_spill] sm:$0xff] }
 0x23b   : > { %v2358_v57 = vmul.f32 %v2294_v43, %v5600_v51  ;;  %v1844_v59 = vadd.f32 0.2548296, %v1780_v30  ;;  %v1544_v31 = vadd.f32 1.4214138, %v1480_v5  ;;  %v1674_v0 = vadd.f32 -0.28449672, %v1610_v22 }
 0x23c   : > { %v2446_v44 = vmul.f32 %v2382_v63, %v5601_v60  ;;  %v1650_v50 = vmul.f32 %v5595_v55, %v1586_v33  ;;  %v1584_v34 = vadd.f32 1.4214138, %v1520_v7  ;;  %v2188_v4 = vmul.f32 %v5602_v11, %v1868_v15  ;;  %v5610_v63 = vld [vmem:[#allocation120_spill] sm:$0xff]  ;;  %v5612_v60 = vld [vmem:[#allocation139_spill] sm:$0xff]  ;;  %v5615_v11 = vld [vmem:[#allocation110_spill] sm:$0xff] }
 0x23d   : > { %v2422_v23 = vadd.f32 1.0, %v2358_v57  ;;  %v1908_v14 = vmul.f32 %v5584_v8, %v1844_v59  ;;  %v1608_v58 = vmul.f32 %v5596_v37, %v1544_v31  ;;  %v1738_v45 = vmul.f32 %v5590_v47, %v1674_v0  ;;  %v5611_v57 = vld [vmem:[#allocation144_spill] sm:$0xff] }
 0x23e   : > { %2545 = vmatpush.msra.mxu2 %v2446_v44  ;;  %v1714_v13 = vadd.f32 -0.28449672, %v1650_v50  ;;  %v1648_v39 = vmul.f32 %v5597_v62, %v1584_v34  ;;  %v1350_v41 = vmul.f32 1.0614054, %v5603_v21  ;;  %v2252_v17 = vsub.f32 1.0, %v2188_v4  ;;  %v5614_v34 = vld [vmem:[#allocation56_spill] sm:$0xff] }
 0x23f   : > { %v2486_v36 = vmul.f32 %v2422_v23, %v5604_v49  ;;  %v2228_v16 = vmul.f32 %v5605_v18, %v1908_v14  ;;  %v1672_v46 = vadd.f32 -0.28449672, %v1608_v58  ;;  %v1802_v25 = vadd.f32 0.2548296, %v1738_v45  ;;  %v5616_v14 = vld [vmem:[#allocation127_spill] sm:$0xff] }
 0x240   : > { %v1778_v27 = vmul.f32 %v5595_v55, %v1714_v13  ;;  %v1712_v8 = vadd.f32 -0.28449672, %v1648_v39  ;;  %v1414_v48 = vadd.f32 -1.4531521, %v1350_v41  ;;  %v2316_v24 = vmul.f32 %v2252_v17, %v5606_v53  ;;  %v5617_v41 = vld [vmem:[#allocation89_spill] sm:$0xff]  ;;  %v5618_v17 = vld [vmem:[#allocation132_spill] sm:$0xff] }
 0x241   : > { %2561 = vmatpush.msra.mxu3 %v2486_v36  ;;  %v2292_v19 = vsub.f32 1.0, %v2228_v16  ;;  %v1736_v9 = vmul.f32 %v5596_v37, %v1672_v46  ;;  %v1390_v26 = vmul.f32 1.0614054, %v5607_v29  ;;  %v1866_v38 = vmul.f32 %v5590_v47, %v1802_v25  ;;  %v5619_v25 = vld [vmem:[#allocation90_spill] sm:$0xff] }
 0x242   : > { %v1842_v12 = vadd.f32 0.2548296, %v1778_v27  ;;  %v1776_v61 = vmul.f32 %v5597_v62, %v1712_v8  ;;  %v1478_v20 = vmul.f32 %v5603_v21, %v1414_v48  ;;  %v2380_v52 = vadd.f32 1.0, %v2316_v24  ;;  %v5620_v24 = vld [vmem:[#allocation108_spill] sm:$0xff] }
 0x243   : > { %v2356_v3 = vmul.f32 %v2292_v19, %v5608_v32  ;;  %v1800_v2 = vadd.f32 0.2548296, %v1736_v9  ;;  %v1454_v35 = vadd.f32 -1.4531521, %v1390_v26  ;;  %v2186_v43 = vmul.f32 %v5609_v28, %v1866_v38  ;;  %v5621_v26 = vld [vmem:[#allocation119_spill] sm:$0xff] }
 0x244   : > { %v1906_v42 = vmul.f32 %v5595_v55, %v1842_v12  ;;  %v1840_v30 = vadd.f32 0.2548296, %v1776_v61  ;;  %v1542_v5 = vadd.f32 1.4214138, %v1478_v20  ;;  %v2444_v22 = vmul.f32 %v2380_v52, %v5610_v63  ;;  %v5613_v55 = vld [vmem:[#allocation100_spill] sm:$0xff] }
 0x245   : > { %v2420_v33 = vadd.f32 1.0, %v2356_v3  ;;  %v1864_v47 = vmul.f32 %v5596_v37, %v1800_v2  ;;  %v1518_v7 = vmul.f32 %v5607_v29, %v1454_v35  ;;  %v2250_v51 = vsub.f32 1.0, %v2186_v43  ;;  %v5622_v3 = vld [vmem:[#allocation128_spill] sm:$0xff]  ;;  %v5623_v43 = vld [vmem:[#allocation25_spill] sm:$0xff] }
 0x246   : > { %v2226_v15 = vmul.f32 %v5611_v57, %v1906_v42  ;;  %v1904_v59 = vmul.f32 %v5597_v62, %v1840_v30  ;;  %v1606_v31 = vmul.f32 %v5603_v21, %v1542_v5  ;;  %2546 = vmatpush.msra.mxu2 %v2444_v22  ;;  %v1348_v23 = vmul.f32 1.0614054, %v5614_v34  ;;  %v5624_v30 = vld [vmem:[#allocation84_spill] sm:$0xff] }
 0x247   : > { %v2484_v44 = vmul.f32 %v2420_v33, %v5612_v60  ;;  %v2184_v0 = vmul.f32 %v5613_v55, %v1864_v47  ;;  %v1582_v50 = vadd.f32 1.4214138, %v1518_v7  ;;  %v2314_v4 = vmul.f32 %v2250_v51, %v5615_v11  ;;  %v5625_v47 = vld [vmem:[#allocation112_spill] sm:$0xff]  ;;  %v5628_v55 = vld [vmem:[#allocation85_spill] sm:$0xff] }
 0x248   : > { %v2290_v37 = vsub.f32 1.0, %v2226_v15  ;;  %v2224_v58 = vmul.f32 %v5616_v14, %v1904_v59  ;;  %v1670_v45 = vadd.f32 -0.28449672, %v1606_v31  ;;  %v1412_v39 = vadd.f32 -1.4531521, %v1348_v23  ;;  %v5626_v51 = vld [vmem:[#allocation72_spill] sm:$0xff] }
 0x249   : > { %2562 = vmatpush.msra.mxu3 %v2484_v44  ;;  %v2248_v13 = vsub.f32 1.0, %v2184_v0  ;;  %v1646_v62 = vmul.f32 %v5607_v29, %v1582_v50  ;;  %v1388_v49 = vmul.f32 1.0614054, %v5617_v41  ;;  %v2378_v36 = vadd.f32 1.0, %v2314_v4  ;;  %v5627_v59 = vld [vmem:[#allocation61_spill] sm:$0xff]  ;;  %v5629_v4 = vld [vmem:[#allocation38_spill] sm:$0xff] }
 0x24a   : > { %v2354_v18 = vmul.f32 %v2290_v37, %v5618_v17  ;;  %v2288_v16 = vsub.f32 1.0, %v2224_v58  ;;  %v1734_v46 = vmul.f32 %v5603_v21, %v1670_v45  ;;  %v1476_v48 = vmul.f32 %v5614_v34, %v1412_v39  ;;  %v5630_v14 = vld [vmem:[#allocation115_spill] sm:$0xff] }
 0x24b   : > { %v2312_v27 = vmul.f32 %v2248_v13, %v5619_v25  ;;  %v1710_v8 = vadd.f32 -0.28449672, %v1646_v62  ;;  %v1452_v53 = vadd.f32 -1.4531521, %v1388_v49  ;;  %v2442_v19 = vmul.f32 %v2378_v36, %v5620_v24  ;;  %v5631_v39 = vld [vmem:[#allocation67_spill] sm:$0xff] }
 0x24c   : > { %v2418_v9 = vadd.f32 1.0, %v2354_v18  ;;  %v2352_v38 = vmul.f32 %v2288_v16, %v5621_v26  ;;  %v1798_v12 = vadd.f32 0.2548296, %v1734_v46  ;;  %v1540_v52 = vadd.f32 1.4214138, %v1476_v48  ;;  %v5632_v24 = vld [vmem:[#allocation107_spill] sm:$0xff] }
 0x24d   : > { %v2376_v61 = vadd.f32 1.0, %v2312_v27  ;;  %v1774_v20 = vmul.f32 %v5607_v29, %v1710_v8  ;;  %v1516_v32 = vmul.f32 %v5617_v41, %v1452_v53  ;;  %2547 = vmatpush.msra.mxu2 %v2442_v19  ;;  %v1346_v42 = vmul.f32 1.0614054, %v5623_v43 }
 0x24e   : > { %v2482_v2 = vmul.f32 %v2418_v9, %v5622_v3  ;;  %v2416_v35 = vadd.f32 1.0, %v2352_v38  ;;  %v1862_v28 = vmul.f32 %v5603_v21, %v1798_v12  ;;  %v1604_v22 = vmul.f32 %v5614_v34, %v1540_v52  ;;  %v5633_v12 = vld [vmem:[#allocation60_spill] sm:$0xff] }
 0x24f   : > { %v2440_v5 = vmul.f32 %v2376_v61, %v5624_v30  ;;  %v1838_v63 = vadd.f32 0.2548296, %v1774_v20  ;;  %v1580_v33 = vadd.f32 1.4214138, %v1516_v32  ;;  %v1410_v15 = vadd.f32 -1.4531521, %v1346_v42 }
 0x250   : > { %2563 = vmatpush.msra.mxu3 %v2482_v2  ;;  %v2480_v7 = vmul.f32 %v2416_v35, %v5625_v47  ;;  %v2182_v57 = vmul.f32 %v5626_v51, %v1862_v28  ;;  %v1386_v31 = vmul.f32 1.0614054, %v5627_v59  ;;  %v1668_v21 = vadd.f32 -0.28449672, %v1604_v22  ;;  %v5634_v2 = vld [vmem:[#allocation58_spill] sm:$0xff]  ;;  %v5637_v51 = vld [vmem:[#allocation93_spill] sm:$0xff] }
 0x251   : > { %2548 = vmatpush.msra.mxu2 %v2440_v5  ;;  %v1902_v60 = vmul.f32 %v5607_v29, %v1838_v63  ;;  %v1644_v44 = vmul.f32 %v5617_v41, %v1580_v33  ;;  %v1344_v0 = vmul.f32 1.0614054, %v5628_v55  ;;  %v1474_v23 = vmul.f32 %v5623_v43, %v1410_v15  ;;  %v5635_v63 = vld [vmem:[#allocation104_spill] sm:$0xff]  ;;  %v5636_v33 = vld [vmem:[#allocation99_spill] sm:$0xff] }
 0x252   : > { %2564 = vmatpush.msra.mxu3 %v2480_v7  ;;  %v2246_v50 = vsub.f32 1.0, %v2182_v57  ;;  %v1450_v11 = vadd.f32 -1.4531521, %v1386_v31  ;;  %v1384_v37 = vmul.f32 1.0614054, %v5629_v4  ;;  %v1732_v45 = vmul.f32 %v5614_v34, %v1668_v21 }
 0x253   : > { %v2222_v58 = vmul.f32 %v5630_v14, %v1902_v60  ;;  %v1708_v13 = vadd.f32 -0.28449672, %v1644_v44  ;;  %v1408_v62 = vadd.f32 -1.4531521, %v1344_v0  ;;  %v1538_v49 = vadd.f32 1.4214138, %v1474_v23 }
 0x254   : > { %v2310_v29 = vmul.f32 %v2246_v50, %v5631_v39  ;;  %v1514_v36 = vmul.f32 %v5627_v59, %v1450_v11  ;;  %v1448_v17 = vadd.f32 -1.4531521, %v1384_v37  ;;  %v1796_v16 = vadd.f32 0.2548296, %v1732_v45  ;;  %v5638_v44 = vld [vmem:[#allocation42_spill] sm:$0xff]  ;;  %v5639_v11 = vld [vmem:[#allocation49_spill] sm:$0xff] }
 0x255   : > { %v2286_v18 = vsub.f32 1.0, %v2222_v58  ;;  %v1772_v46 = vmul.f32 %v5617_v41, %v1708_v13  ;;  %v1472_v25 = vmul.f32 %v5628_v55, %v1408_v62  ;;  %v1602_v8 = vmul.f32 %v5623_v43, %v1538_v49  ;;  %v5640_v39 = vld [vmem:[#allocation83_spill] sm:$0xff] }
 0x256   : > { %v2374_v27 = vadd.f32 1.0, %v2310_v29  ;;  %v1578_v48 = vadd.f32 1.4214138, %v1514_v36  ;;  %v1512_v53 = vmul.f32 %v5629_v4, %v1448_v17  ;;  %v1860_v9 = vmul.f32 %v5614_v34, %v1796_v16  ;;  %v5641_v17 = vld [vmem:[#allocation26_spill] sm:$0xff] }
 0x257   : > { %v2350_v19 = vmul.f32 %v2286_v18, %v5632_v24  ;;  %v1836_v26 = vadd.f32 0.2548296, %v1772_v46  ;;  %v1536_v38 = vadd.f32 1.4214138, %v1472_v25  ;;  %v1666_v20 = vadd.f32 -0.28449672, %v1602_v8 }
 0x258   : > { %v2438_v61 = vmul.f32 %v2374_v27, %v5633_v12  ;;  %v1642_v52 = vmul.f32 %v5627_v59, %v1578_v48  ;;  %v1576_v32 = vadd.f32 1.4214138, %v1512_v53  ;;  %v2180_v35 = vmul.f32 %v5634_v2, %v1860_v9  ;;  %v5642_v27 = vld [vmem:[#allocation41_spill] sm:$0xff]  ;;  %v5644_v12 = vld [vmem:[#allocation76_spill] sm:$0xff]  ;;  %v5647_v2 = vld [vmem:[#allocation14_spill] sm:$0xff] }
 0x259   : > { %v2414_v3 = vadd.f32 1.0, %v2350_v19  ;;  %v1900_v28 = vmul.f32 %v5617_v41, %v1836_v26  ;;  %v1600_v42 = vmul.f32 %v5628_v55, %v1536_v38  ;;  %v1730_v30 = vmul.f32 %v5623_v43, %v1666_v20  ;;  %v5643_v19 = vld [vmem:[#allocation63_spill] sm:$0xff] }
 0x25a   : > { %2549 = vmatpush.msra.mxu2 %v2438_v61  ;;  %v1706_v5 = vadd.f32 -0.28449672, %v1642_v52  ;;  %v1640_v34 = vmul.f32 %v5629_v4, %v1576_v32  ;;  %v1342_v22 = vmul.f32 1.0614054, %v5635_v63  ;;  %v2244_v7 = vsub.f32 1.0, %v2180_v35  ;;  %v5646_v32 = vld [vmem:[#allocation30_spill] sm:$0xff] }
 0x25b   : > { %v2478_v47 = vmul.f32 %v2414_v3, %v5636_v33  ;;  %v2220_v57 = vmul.f32 %v5637_v51, %v1900_v28  ;;  %v1664_v15 = vadd.f32 -0.28449672, %v1600_v42  ;;  %v1794_v31 = vadd.f32 0.2548296, %v1730_v30  ;;  %v5648_v28 = vld [vmem:[#allocation44_spill] sm:$0xff] }
 0x25c   : > { %v1770_v60 = vmul.f32 %v5627_v59, %v1706_v5  ;;  %v1704_v41 = vadd.f32 -0.28449672, %v1640_v34  ;;  %v1406_v21 = vadd.f32 -1.4531521, %v1342_v22  ;;  %v2308_v0 = vmul.f32 %v2244_v7, %v5638_v44  ;;  %v5649_v22 = vld [vmem:[#allocation77_spill] sm:$0xff]  ;;  %v5650_v7 = vld [vmem:[#allocation66_spill] sm:$0xff] }
 0x25d   : > { %2565 = vmatpush.msra.mxu3 %v2478_v47  ;;  %v2284_v50 = vsub.f32 1.0, %v2220_v57  ;;  %v1728_v23 = vmul.f32 %v5628_v55, %v1664_v15  ;;  %v1382_v37 = vmul.f32 1.0614054, %v5639_v11  ;;  %v1858_v14 = vmul.f32 %v5623_v43, %v1794_v31  ;;  %v5651_v31 = vld [vmem:[#allocation71_spill] sm:$0xff] }
 0x25e   : > { %v1834_v58 = vadd.f32 0.2548296, %v1770_v60  ;;  %v1768_v45 = vmul.f32 %v5629_v4, %v1704_v41  ;;  %v1470_v13 = vmul.f32 %v5635_v63, %v1406_v21  ;;  %v2372_v62 = vadd.f32 1.0, %v2308_v0  ;;  %v5652_v0 = vld [vmem:[#allocation13_spill] sm:$0xff] }
 0x25f   : > { %v2348_v29 = vmul.f32 %v2284_v50, %v5640_v39  ;;  %v1792_v49 = vadd.f32 0.2548296, %v1728_v23  ;;  %v1446_v36 = vadd.f32 -1.4531521, %v1382_v37  ;;  %v2178_v18 = vmul.f32 %v5641_v17, %v1858_v14  ;;  %v5653_v37 = vld [vmem:[#allocation29_spill] sm:$0xff] }
 0x260   : > { %v1898_v16 = vmul.f32 %v5627_v59, %v1834_v58  ;;  %v1832_v46 = vadd.f32 0.2548296, %v1768_v45  ;;  %v1534_v25 = vadd.f32 1.4214138, %v1470_v13  ;;  %v2436_v8 = vmul.f32 %v2372_v62, %v5642_v27  ;;  %v5645_v59 = vld [vmem:[#allocation87_spill] sm:$0xff] }
 0x261   : > { %v2412_v48 = vadd.f32 1.0, %v2348_v29  ;;  %v1856_v43 = vmul.f32 %v5628_v55, %v1792_v49  ;;  %v1510_v53 = vmul.f32 %v5639_v11, %v1446_v36  ;;  %v2242_v24 = vsub.f32 1.0, %v2178_v18  ;;  %v5654_v29 = vld [vmem:[#allocation51_spill] sm:$0xff] }
 0x262   : > { %v2218_v9 = vmul.f32 %v5643_v19, %v1898_v16  ;;  %v1896_v26 = vmul.f32 %v5629_v4, %v1832_v46  ;;  %v1598_v38 = vmul.f32 %v5635_v63, %v1534_v25  ;;  %2550 = vmatpush.msra.mxu2 %v2436_v8  ;;  %v1340_v3 = vmul.f32 1.0614054, %v5646_v32  ;;  %v5655_v18 = vld [vmem:[#allocation15_spill] sm:$0xff]  ;;  %v5656_v46 = vld [vmem:[#allocation69_spill] sm:$0xff] }
 0x263   : > { %v2476_v61 = vmul.f32 %v2412_v48, %v5644_v12  ;;  %v2176_v20 = vmul.f32 %v5645_v59, %v1856_v43  ;;  %v1574_v52 = vadd.f32 1.4214138, %v1510_v53  ;;  %v2306_v35 = vmul.f32 %v2242_v24, %v5647_v2  ;;  %v5657_v43 = vld [vmem:[#allocation27_spill] sm:$0xff]  ;;  %v5658_v24 = vld [vmem:[#allocation106_spill] sm:$0xff] }
 0x264   : > { %v2282_v55 = vsub.f32 1.0, %v2218_v9  ;;  %v2216_v42 = vmul.f32 %v5648_v28, %v1896_v26  ;;  %v1662_v30 = vadd.f32 -0.28449672, %v1598_v38  ;;  %v1404_v34 = vadd.f32 -1.4531521, %v1340_v3  ;;  %v5659_v3 = vld [vmem:[#allocation205_spill] sm:$0xff] }
 0x265   : > { %2566 = vmatpush.msra.mxu3 %v2476_v61  ;;  %v2240_v5 = vsub.f32 1.0, %v2176_v20  ;;  %v1638_v4 = vmul.f32 %v5639_v11, %v1574_v52  ;;  %v1380_v33 = vmul.f32 1.0614054, %v5649_v22  ;;  %v2370_v47 = vadd.f32 1.0, %v2306_v35  ;;  %v5660_v35 = vld [vmem:[#allocation48_spill] sm:$0xff] }
 0x266   : > { %v2346_v51 = vmul.f32 %v2282_v55, %v5650_v7  ;;  %v2280_v57 = vsub.f32 1.0, %v2216_v42  ;;  %v1726_v15 = vmul.f32 %v5635_v63, %v1662_v30  ;;  %v1468_v21 = vmul.f32 %v5646_v32, %v1404_v34  ;;  %v5661_v55 = vld [vmem:[#allocation53_spill] sm:$0xff]  ;;  %v5663_v7 = vld [vmem:[#allocation4_spill] sm:$0xff] }
 0x267   : > { %v2304_v60 = vmul.f32 %v2240_v5, %v5651_v31  ;;  %v1702_v41 = vadd.f32 -0.28449672, %v1638_v4  ;;  %v1444_v44 = vadd.f32 -1.4531521, %v1380_v33  ;;  %v2434_v50 = vmul.f32 %v2370_v47, %v5652_v0  ;;  %v5662_v5 = vld [vmem:[#allocation97_spill] sm:$0xff] }
 0x268   : > { %v2410_v23 = vadd.f32 1.0, %v2346_v51  ;;  %v2344_v14 = vmul.f32 %v2280_v57, %v5653_v37  ;;  %v1790_v58 = vadd.f32 0.2548296, %v1726_v15  ;;  %v1532_v62 = vadd.f32 1.4214138, %v1468_v21  ;;  %v5664_v0 = vld [vmem:[#allocation37_spill] sm:$0xff] }
 0x269   : > { %v2368_v45 = vadd.f32 1.0, %v2304_v60  ;;  %v1766_v13 = vmul.f32 %v5639_v11, %v1702_v41  ;;  %v1508_v39 = vmul.f32 %v5649_v22, %v1444_v44  ;;  %2551 = vmatpush.msra.mxu2 %v2434_v50  ;;  %v1378_v16 = vmul.f32 1.0614054, %v5655_v18 }
 0x26a   : > { %v2474_v49 = vmul.f32 %v2410_v23, %v5654_v29  ;;  %v2408_v36 = vadd.f32 1.0, %v2344_v14  ;;  %v1854_v17 = vmul.f32 %v5635_v63, %v1790_v58  ;;  %v1596_v8 = vmul.f32 %v5646_v32, %v1532_v62  ;;  %v5665_v58 = vld [vmem:[#allocation91_spill] sm:$0xff] }
 0x26b   : > { %v2432_v25 = vmul.f32 %v2368_v45, %v5656_v46  ;;  %v1830_v27 = vadd.f32 0.2548296, %v1766_v13  ;;  %v1572_v48 = vadd.f32 1.4214138, %v1508_v39  ;;  %v1442_v9 = vadd.f32 -1.4531521, %v1378_v16 }
 0x26c   : > { %2567 = vmatpush.msra.mxu3 %v2474_v49  ;;  %v2472_v53 = vmul.f32 %v2408_v36, %v5657_v43  ;;  %v2174_v19 = vmul.f32 %v5658_v24, %v1854_v17  ;;  %v1376_v26 = vmul.f32 1.0614054, %v4451_v40  ;;  %v1660_v63 = vadd.f32 -0.28449672, %v1596_v8  ;;  %v5666_v49 = vld [vmem:[#allocation33_spill] sm:$0xff]  ;;  %v5668_v43 = vld [vmem:[#allocation80_spill] sm:$0xff] }
 0x26d   : > { %2552 = vmatpush.msra.mxu2 %v2432_v25  ;;  %v1894_v38 = vmul.f32 %v5639_v11, %v1830_v27  ;;  %v1636_v12 = vmul.f32 %v5649_v22, %v1572_v48  ;;  %v1374_v61 = vmul.f32 1.0614054, %v4420_v54  ;;  %v1506_v20 = vmul.f32 %v5655_v18, %v1442_v9  ;;  %v5667_v27 = vld [vmem:[#allocation31_spill] sm:$0xff] }
 0x26e   : > { %2568 = vmatpush.msra.mxu3 %v2472_v53  ;;  %v2238_v59 = vsub.f32 1.0, %v2174_v19  ;;  %v1440_v52 = vadd.f32 -1.4531521, %v1376_v26  ;;  %v1372_v2 = vmul.f32 1.0614054, %v5659_v3  ;;  %vm996_vm13 = vcmp.ge.f32.partialorder %v5660_v35, 0.0 }
 0x26f   : > { %v2214_v28 = vmul.f32 %v5661_v55, %v1894_v38  ;;  %v1724_v42 = vmul.f32 %v5646_v32, %v1660_v63  ;;  %v1700_v30 = vadd.f32 -0.28449672, %v1636_v12  ;;  %v1438_v11 = vadd.f32 -1.4531521, %v1374_v61  ;;  %v5669_v19 = vld [vmem:[#allocation206_spill] sm:$0xff]  ;;  %v5670_v38 = vld [vmem:[#allocation200_spill] sm:$0xff] }
 0x270   : > { %v2302_v4 = vmul.f32 %v2238_v59, %v5662_v5  ;;  %v1570_v34 = vadd.f32 1.4214138, %v1506_v20  ;;  %v1504_v33 = vmul.f32 %v4451_v40, %v1440_v52  ;;  %v1436_v47 = vadd.f32 -1.4531521, %v1372_v2  ;;  %v5672_v55 = vld [vmem:[#allocation7_spill] sm:$0xff]  ;;  %v3008_v5 = vpop.eup %3007 }
 0x271   : > { %vm994_vm14 = vcmp.ge.f32.partialorder %v5663_v7, 0.0  ;;  %v2278_v51 = vsub.f32 1.0, %v2214_v28  ;;  %v1788_v57 = vadd.f32 0.2548296, %v1724_v42  ;;  %v1764_v15 = vmul.f32 %v5649_v22, %v1700_v30 }
 0x272   : > { %v1502_v31 = vmul.f32 %v4420_v54, %v1438_v11  ;;  %v2366_v60 = vadd.f32 1.0, %v2302_v4  ;;  %v1634_v41 = vmul.f32 %v5655_v18, %v1570_v34  ;;  %v1568_v21 = vadd.f32 1.4214138, %v1504_v33  ;;  %v5673_v34 = vld [vmem:[#allocation19_spill] sm:$0xff] }
 0x273   : > { %v1500_v44 = vmul.f32 %v5659_v3, %v1436_v47  ;;  %v2342_v50 = vmul.f32 %v2278_v51, %v5664_v0  ;;  %v1852_v23 = vmul.f32 %v5646_v32, %v1788_v57  ;;  %v1828_v37 = vadd.f32 0.2548296, %v1764_v15  ;;  %v5674_v51 = vld [vmem:[#allocation35_spill] sm:$0xff] }
 0x274   : > { %v1566_v14 = vadd.f32 1.4214138, %v1502_v31  ;;  %v2430_v45 = vmul.f32 %v2366_v60, %v5665_v58  ;;  %v1698_v13 = vadd.f32 -0.28449672, %v1634_v41  ;;  %v1632_v62 = vmul.f32 %v4451_v40, %v1568_v21  ;;  %v5675_v41 = vld [vmem:[#allocation204_spill] sm:$0xff]  ;;  %v5678_v58 = vld [vmem:[#allocation190_spill] sm:$0xff] }
 0x275   : > { %v1564_v39 = vadd.f32 1.4214138, %v1500_v44  ;;  %v2406_v29 = vadd.f32 1.0, %v2342_v50  ;;  %v2172_v36 = vmul.f32 %v5666_v49, %v1852_v23  ;;  %v1892_v17 = vmul.f32 %v5649_v22, %v1828_v37  ;;  %v5676_v50 = vld [vmem:[#allocation3_spill] sm:$0xff] }
 0x276   : > { %v1630_v16 = vmul.f32 %v4420_v54, %v1566_v14  ;;  %2553 = vmatpush.msra.mxu2 %v2430_v45  ;;  %v1762_v32 = vmul.f32 %v5655_v18, %v1698_v13  ;;  %v1696_v46 = vadd.f32 -0.28449672, %v1632_v62  ;;  %3009 = vpow2.f32 %v5669_v19  ;;  %v5677_v37 = vld [vmem:[#allocation195_spill] sm:$0xff]  ;;  %v5681_v19 = vld [vmem:[#allocation189_spill] sm:$0xff] }
 0x277   : > { %v1628_v25 = vmul.f32 %v5659_v3, %v1564_v39  ;;  %v2470_v8 = vmul.f32 %v2406_v29, %v5667_v27  ;;  %v2236_v48 = vsub.f32 1.0, %v2172_v36  ;;  %v2212_v53 = vmul.f32 %v5668_v43, %v1892_v17 }
 0x278   : > { %v1694_v24 = vadd.f32 -0.28449672, %v1630_v16  ;;  %v1826_v9 = vadd.f32 0.2548296, %v1762_v32  ;;  %v1760_v22 = vmul.f32 %v4451_v40, %v1696_v46  ;;  %3011 = vpow2.f32 %v5670_v38  ;;  %v5679_v32 = vld [vmem:[#allocation201_spill] sm:$0xff]  ;;  %v2497_v38 = vpop.permute.xlu2 %2496 }
 0x279   : > { %v1692_v26 = vadd.f32 -0.28449672, %v1628_v25  ;;  %2569 = vmatpush.msra.mxu3 %v2470_v8  ;;  %v2300_v63 = vmul.f32 %v2236_v48, %v5671_v56  ;;  %v2276_v12 = vsub.f32 1.0, %v2212_v53  ;;  %v1060_v59 = vsel %vm996_vm13, 1.0, %v5288_v1  ;;  %v5680_v48 = vld [vmem:[#allocation194_spill] sm:$0xff] }
 0x27a   : > { %v1758_v61 = vmul.f32 %v4420_v54, %v1694_v24  ;;  %v1890_v20 = vmul.f32 %v5655_v18, %v1826_v9  ;;  %v1824_v52 = vadd.f32 0.2548296, %v1760_v22  ;;  %v821_v28 = vmul.f32 0.5, %v5672_v55 }
 0x27b   : > { %v1756_v2 = vmul.f32 %v5659_v3, %v1692_v26  ;;  %v2364_v42 = vadd.f32 1.0, %v2300_v63  ;;  %v2340_v30 = vmul.f32 %v2276_v12, %v1060_v59  ;;  %v1058_v4 = vsel %vm994_vm14, 1.0, %v5288_v1 }
 0x27c   : > { %v1822_v11 = vadd.f32 0.2548296, %v1758_v61  ;;  %v2210_v33 = vmul.f32 %v5673_v34, %v1890_v20  ;;  %v1888_v35 = vmul.f32 %v4451_v40, %v1824_v52  ;;  %v861_v18 = vmul.f32 0.5, %v5674_v51  ;;  %v3010_v60 = vpop.eup %3009 }
 0x27d   : > { %v1820_v47 = vadd.f32 0.2548296, %v1756_v2  ;;  %v2428_v57 = vmul.f32 %v2364_v42, %v821_v28  ;;  %v2404_v15 = vadd.f32 1.0, %v2340_v30  ;;  %vm992_vm15 = vcmp.ge.f32.partialorder %v5675_v41, 0.0 }
 0x27e   : > { %v1886_v31 = vmul.f32 %v4420_v54, %v1822_v11  ;;  %v2274_v21 = vsub.f32 1.0, %v2210_v33  ;;  %v2208_v44 = vmul.f32 %v3008_v5, %v1888_v35  ;;  %v3012_v7 = vpop.eup %3011  ;;  %v859_v23 = vmul.f32 0.5, %v5676_v50 }
 0x27f   : > { %v1884_v0 = vmul.f32 %v5659_v3, %v1820_v47  ;;  %vm990_vm0 = vcmp.ge.f32.partialorder %v5677_v37, 0.0  ;;  %2554 = vmatpush.msra.mxu2 %v2428_v57  ;;  %v2468_v40 = vmul.f32 %v2404_v15, %v861_v18  ;;  %vm988_vm1 = vcmp.ge.f32.partialorder %v5678_v58, 0.0 }
 0x280   : > { %v2206_v14 = vmul.f32 %v3010_v60, %v1886_v31  ;;  %2555 = vmatmul.f32.vlgmr.msra.gmra.mxu2 %v4878_v10  ;;  %v2338_v54 = vmul.f32 %v2274_v21, %v1058_v4  ;;  %v2272_v45 = vsub.f32 1.0, %v2208_v44  ;;  %v1056_v62 = vsel %vm992_vm15, 1.0, %v5288_v1 }
 0x281   : > { %v2204_v13 = vmul.f32 %v3012_v7, %v1884_v0  ;;  %2570 = vmatpush.msra.mxu3 %v2468_v40  ;;  %v1054_v3 = vsel %vm990_vm0, 1.0, %v5288_v1  ;;  %v1052_v17 = vsel %vm988_vm1, 1.0, %v5288_v1  ;;  %v857_v46 = vmul.f32 0.5, %v5679_v32 }
 0x282   : > { %v2270_v39 = vsub.f32 1.0, %v2206_v14  ;;  %v2402_v29 = vadd.f32 1.0, %v2338_v54  ;;  %v2336_v49 = vmul.f32 %v2272_v45, %v1056_v62  ;;  %v855_v43 = vmul.f32 0.5, %v5680_v48 }
 0x283   : > { %v2268_v36 = vsub.f32 1.0, %v2204_v13  ;;  %v853_v9 = vmul.f32 0.5, %v5681_v19 }
 0x284   : > { %v2334_v16 = vmul.f32 %v2270_v39, %v1054_v3  ;;  %v2466_v25 = vmul.f32 %v2402_v29, %v859_v23  ;;  %v2400_v10 = vadd.f32 1.0, %v2336_v49 }
 0x285   : > { %v2332_v27 = vmul.f32 %v2268_v36, %v1052_v17 }
 0x286   : > { %v2398_v8 = vadd.f32 1.0, %v2334_v16  ;;  %2571 = vmatpush.msra.mxu3 %v2466_v25  ;;  %v2464_v53 = vmul.f32 %v2400_v10, %v857_v46 }
 0x287   : > { %v2396_v24 = vadd.f32 1.0, %v2332_v27 }
 0x288   : > { %2572 = vmatpush.msra.mxu3 %v2464_v53  ;;  %v2462_v22 = vmul.f32 %v2398_v8, %v855_v43 }
 0x289   : > { %v2460_v26 = vmul.f32 %v2396_v24, %v853_v9 }
 0x28a   : > { %2573 = vmatpush.msra.mxu3 %v2462_v22 }
 0x28c   : > { %2574 = vmatpush.msra.mxu3 %v2460_v26 }
 0x28d   : > { %2575 = vmatmul.f32.vlgmr.msra.gmra.mxu3 %v4945_v6 }
 0x29c   : > { %v2516_v1 = vpop.f32.mrf.mxu2 }
 0x29d   : > { %v2517_v56 = vadd.f32 %v2516_v1, %v2497_v38 }
 0x2b5   : > { %v2536_v63 = vpop.f32.mrf.mxu3 }
 0x2b6   : > { %v2537_v12 = vadd.f32 %v2536_v63, %v2517_v56 }
 0x2b8   : > { %2579 = vst [vmem:[%s265_s9] sm:$0x1f] %v2537_v12 }
 0x303   : > { %v2556_v61 = vpop.f32.mrf.mxu2 }
 0x304   : > { %v2557_v59 = vadd.f32 %v2556_v61, %v2497_v38 }
 0x310   : > { %v2576_v20 = vpop.f32.mrf.mxu3 }
 0x311   : > { %v2577_v52 = vadd.f32 %v2576_v20, %v2557_v59 }
 0x313   : > { %2580 = vst [vmem:[%s265_s9 + $0x8] sm:$0x1f] %v2577_v52 }
 0x314 PF: > { %p12_p9 = scmp.ge.s32.totalorder %s3087_s22, 6   ;;  %s5682_s18 = smov %s3031_s19 }
 0x315   : > { %s5683_s19 = smov %s3096_s25  ;;  %s5684_s20 = smov %s3087_s22 }
 0x316   :  { %14 = sbr.rel (!%p12_p9) target bundleno = 2 (0x2), region = 113 }

</bundles_post_ra>
